<compile_context>
chip_gen: v5e
topology: v5e:2x2
jax: 0.10.0
libtpu: 0.0.40
codegen_flags: <defaults>
</compile_context>

<pallas_src>
import numpy as np
import jax
import jax.numpy as jnp
from jax import lax
from jax.experimental import pallas as pl
from jax.experimental.pallas import tpu as pltpu

# ----------------------------- small config ---------------------------------
B = 2            # batch
L = 16           # text sequence length
V = 64           # vocab size
HLM = 32         # llama hidden size
NH_LM = 4        # llama attention heads
DH_LM = HLM // NH_LM
NL_LM = 2        # llama decoder layers
I_LM = 64        # llama MLP intermediate
RMS_EPS = 1e-6

NIMG = 1         # images per sample
C, IMG, PATCH = 3, 16, 8
GRID_P = IMG // PATCH
NPATCH = GRID_P * GRID_P         # 4 patches
CPP = C * PATCH * PATCH          # 192 flattened patch features
SV = NPATCH + 1                  # 5 vision tokens (cls + patches)
HV, NHV, IV = 32, 2, 64          # vision hidden / heads / MLP
DHV = HV // NHV
LN_EPS = 1e-5

NQ = 4                           # num_query_tokens
HQ, NHQ, IQ = 32, 2, 64          # qformer hidden / heads / MLP
DHQ = HQ // NHQ


# --------------------------- in-kernel helpers --------------------------------
def _rms(x, w, eps=RMS_EPS):
    var = jnp.mean(x * x, axis=-1, keepdims=True)
    return x * lax.rsqrt(var + eps) * w


def _ln(x, w, b, eps=LN_EPS):
    mu = jnp.mean(x, axis=-1, keepdims=True)
    var = jnp.mean((x - mu) ** 2, axis=-1, keepdims=True)
    return (x - mu) * lax.rsqrt(var + eps) * w + b


def _softmax_attend(q, k, v, scale, bias=None):
    # q:[Sq,d] k:[Sk,d] v:[Sk,d]; contract last dims (no explicit k.T transpose)
    s = lax.dot_general(q, k, (((1,), (1,)), ((), ())),
                        preferred_element_type=jnp.float32) * scale
    if bias is not None:
        s = s + bias
    s = s - jnp.max(s, axis=-1, keepdims=True)
    p = jnp.exp(s)
    p = p * pl.reciprocal(jnp.sum(p, axis=-1, keepdims=True), approx=False)
    return jnp.dot(p, v, preferred_element_type=jnp.float32)


# --------------------------- fused LM decoder stack ----------------------------
def _llama_stack_kernel(x_ref, mask_ref, cos_ref, sin_ref, rot_ref,
                        innorm_ref, postnorm_ref, wqkv_ref, wo_ref,
                        wgu_ref, wd_ref, o_ref, carry_ref):
    l = pl.program_id(0)

    @pl.when(l == 0)
    def _():
        carry_ref[...] = x_ref[...]

    h = carry_ref[...].astype(jnp.float32)              # [B*L, HLM]
    cos = cos_ref[...]
    sin = sin_ref[...]
    rot = rot_ref[...]
    scale = 1.0 / (DH_LM ** 0.5)

    # ---- attention block (pre-RMSNorm, fused QKV, in-kernel RoPE) ----
    hn = _rms(h, innorm_ref[0])
    qkv = jnp.dot(hn, wqkv_ref[0], preferred_element_type=jnp.float32)   # [B*L,3H]
    q = qkv[:, :HLM]
    k = qkv[:, HLM:2 * HLM]
    v = qkv[:, 2 * HLM:]
    # rotate_half(x) == x @ rot  (block-diagonal per head) -> RoPE on all heads
    q = q * cos + jnp.dot(q, rot, preferred_element_type=jnp.float32) * sin
    k = k * cos + jnp.dot(k, rot, preferred_element_type=jnp.float32) * sin

    wo = wo_ref[0]                                       # [HLM, HLM]
    outs = []
    for b in range(B):
        mb = mask_ref[b]                                 # [L, L] additive mask
        rs = slice(b * L, (b + 1) * L)
        acc = jnp.zeros((L, HLM), jnp.float32)
        for hh in range(NH_LM):
            cs = slice(hh * DH_LM, (hh + 1) * DH_LM)
            ctx = _softmax_attend(q[rs, cs], k[rs, cs], v[rs, cs], scale, mb)
            # merge-heads + out-projection folded: sum_h ctx_h @ wo[h*dh:(h+1)*dh]
            acc = acc + jnp.dot(ctx, wo[cs, :], preferred_element_type=jnp.float32)
        outs.append(acc)
    h = h + jnp.concatenate(outs, axis=0)                # residual

    # ---- MLP block (pre-RMSNorm, fused gate|up SwiGLU) ----
    hn = _rms(h, postnorm_ref[0])
    gu = jnp.dot(hn, wgu_ref[0], preferred_element_type=jnp.float32)     # [B*L,2I]
    g = gu[:, :I_LM]
    u = gu[:, I_LM:]
    act = g * jax.nn.sigmoid(g) * u
    h = h + jnp.dot(act, wd_ref[0], preferred_element_type=jnp.float32)

    carry_ref[...] = h
    o_ref[...] = h.astype(o_ref.dtype)


def llama_stack(x2, mask3, cos_full, sin_full, rot_mat, lm):
    return pl.pallas_call(
        _llama_stack_kernel,
        out_shape=jax.ShapeDtypeStruct((B * L, HLM), jnp.float32),
        grid=(NL_LM,),
        in_specs=[
            pl.BlockSpec((B * L, HLM), lambda l: (0, 0)),          # x
            pl.BlockSpec((B, L, L), lambda l: (0, 0, 0)),          # additive mask
            pl.BlockSpec((B * L, HLM), lambda l: (0, 0)),          # cos
            pl.BlockSpec((B * L, HLM), lambda l: (0, 0)),          # sin
            pl.BlockSpec((HLM, HLM), lambda l: (0, 0)),            # rotate-half mat
            pl.BlockSpec((1, 1, HLM), lambda l: (l, 0, 0)),        # in_norm[l]
            pl.BlockSpec((1, 1, HLM), lambda l: (l, 0, 0)),        # post_norm[l]
            pl.BlockSpec((1, HLM, 3 * HLM), lambda l: (l, 0, 0)),  # wqkv[l]
            pl.BlockSpec((1, HLM, HLM), lambda l: (l, 0, 0)),      # wo[l]
            pl.BlockSpec((1, HLM, 2 * I_LM), lambda l: (l, 0, 0)), # w_gate|up[l]
            pl.BlockSpec((1, I_LM, HLM), lambda l: (l, 0, 0)),     # w_down[l]
        ],
        out_specs=pl.BlockSpec((B * L, HLM), lambda l: (0, 0)),
        scratch_shapes=[pltpu.VMEM((B * L, HLM), jnp.float32)],
        compiler_params=pltpu.CompilerParams(dimension_semantics=("arbitrary",)),
    )(x2, mask3, cos_full, sin_full, rot_mat,
      lm['in_norm'], lm['post_norm'], lm['wqkv'], lm['wo'], lm['wgu'], lm['wd'])


# ---------------- fused final RMSNorm + lm_head + shifted cross-entropy --------
def _lmhead_xent_kernel(h_ref, fn_ref, wlm_ref, lbl_ref, loss_ref):
    x = h_ref[...].astype(jnp.float32)
    xn = _rms(x, fn_ref[...])
    logits = jnp.dot(xn, wlm_ref[...], preferred_element_type=jnp.float32)  # [N, V]
    lbl = lbl_ref[...]                                                      # [N, 1]
    m = jnp.max(logits, axis=-1, keepdims=True)
    lse = jnp.log(jnp.sum(jnp.exp(logits - m), axis=-1, keepdims=True)) + m
    cls = lax.broadcasted_iota(jnp.int32, logits.shape, 1)
    onehot = (cls == lbl).astype(jnp.float32)
    tgt = jnp.sum(logits * onehot, axis=-1, keepdims=True)
    valid = (lbl >= 0).astype(jnp.float32)               # ignore_index = -100
    nll = (lse - tgt) * valid
    tot = jnp.sum(nll, axis=(0, 1), keepdims=True)
    cnt = jnp.sum(valid, axis=(0, 1), keepdims=True)
    loss_ref[...] = tot / jnp.maximum(cnt, 1.0)


def lm_head_loss(h2, final_norm, lm_head, shift_labels):
    loss = pl.pallas_call(
        _lmhead_xent_kernel,
        out_shape=jax.ShapeDtypeStruct((1, 1), jnp.float32),
        grid=(1,),
        in_specs=[pl.BlockSpec((B * L, HLM), lambda i: (0, 0)),
                  pl.BlockSpec((1, HLM), lambda i: (0, 0)),
                  pl.BlockSpec((HLM, V), lambda i: (0, 0)),
                  pl.BlockSpec((B * L, 1), lambda i: (0, 0))],
        out_specs=pl.BlockSpec((1, 1), lambda i: (0, 0)),
    )(h2, final_norm, lm_head, shift_labels)
    return loss[0, 0]


# ------------------------ fused vision encoder (per image) ---------------------
def _vision_kernel(patch_ref, pw_ref, clspos_ref,
                   preln_w_ref, preln_b_ref,
                   ln1_w_ref, ln1_b_ref, wqkv_ref, bqkv_ref, wo_ref, bo_ref,
                   ln2_w_ref, ln2_b_ref, fc1_ref, b1_ref, fc2_ref, b2_ref,
                   o_ref):
    scale = 1.0 / (DHV ** 0.5)
    # patch-embedding conv as matmul (row 0 of patch_ref is zeros -> cls slot)
    pe = jnp.dot(patch_ref[0], pw_ref[...], preferred_element_type=jnp.float32)
    x = pe + clspos_ref[...]                             # cls + position embeds
    x = _ln(x, preln_w_ref[...], preln_b_ref[...])

    # pre-LN self-attention (no mask), fused QKV, out-proj folded into head loop
    res = x
    hn = _ln(x, ln1_w_ref[...], ln1_b_ref[...])
    qkv = jnp.dot(hn, wqkv_ref[...], preferred_element_type=jnp.float32) + bqkv_ref[...]
    q = qkv[:, :HV]
    k = qkv[:, HV:2 * HV]
    v = qkv[:, 2 * HV:]
    wo = wo_ref[...]
    acc = jnp.zeros((SV, HV), jnp.float32)
    for hh in range(NHV):
        cs = slice(hh * DHV, (hh + 1) * DHV)
        ctx = _softmax_attend(q[:, cs], k[:, cs], v[:, cs], scale)
        acc = acc + jnp.dot(ctx, wo[cs, :], preferred_element_type=jnp.float32)
    x = res + acc + bo_ref[...]

    # pre-LN GELU MLP
    # TODO(synk): jax.nn.gelu defaults to the tanh approximation while
    # PyTorch nn.GELU defaults to exact erf; kept tanh for guaranteed lowering.
    res = x
    hn = _ln(x, ln2_w_ref[...], ln2_b_ref[...])
    hmid = jax.nn.gelu(jnp.dot(hn, fc1_ref[...],
                               preferred_element_type=jnp.float32) + b1_ref[...])
    x = res + jnp.dot(hmid, fc2_ref[...],
                      preferred_element_type=jnp.float32) + b2_ref[...]

    o_ref[0] = x.astype(o_ref.dtype)


def vision_encode(p, patches_aug, clspos):
    N = patches_aug.shape[0]
    full = lambda *s: pl.BlockSpec(s, lambda i: (0,) * len(s))
    return pl.pallas_call(
        _vision_kernel,
        out_shape=jax.ShapeDtypeStruct((N, SV, HV), jnp.float32),
        grid=(N,),
        in_specs=[
            pl.BlockSpec((1, SV, CPP), lambda i: (i, 0, 0)),
            full(CPP, HV), full(SV, HV),
            full(1, HV), full(1, HV),
            full(1, HV), full(1, HV), full(HV, 3 * HV), full(1, 3 * HV),
            full(HV, HV), full(1, HV),
            full(1, HV), full(1, HV), full(HV, IV), full(1, IV),
            full(IV, HV), full(1, HV),
        ],
        out_specs=pl.BlockSpec((1, SV, HV), lambda i: (i, 0, 0)),
        compiler_params=pltpu.CompilerParams(dimension_semantics=("arbitrary",)),
    )(patches_aug, p['patch_w'], clspos,
      p['pre_ln_w'], p['pre_ln_b'],
      p['ln1_w'], p['ln1_b'], p['wqkv'], p['bqkv'], p['wo'], p['bo'],
      p['ln2_w'], p['ln2_b'], p['fc1_w'], p['fc1_b'], p['fc2_w'], p['fc2_b'])


# ------------------- fused Q-Former (+ projection) per image -------------------
def _qformer_kernel(enc_ref, qtok_ref, lnq_w_ref, lnq_b_ref,
                    wsqkv_ref, bsqkv_ref, so_w_ref, so_b_ref, sln_w_ref, sln_b_ref,
                    cq_w_ref, cq_b_ref, wckv_ref, bckv_ref, co_w_ref, co_b_ref,
                    cln_w_ref, cln_b_ref,
                    fc1_ref, b1_ref, fc2_ref, b2_ref, fln_w_ref, fln_b_ref,
                    proj_w_ref, proj_b_ref, o_ref):
    scale = 1.0 / (DHQ ** 0.5)
    x = _ln(qtok_ref[...].astype(jnp.float32), lnq_w_ref[...], lnq_b_ref[...])

    # self-attention over queries (post-LN, no mask), fused QKV
    qkv = jnp.dot(x, wsqkv_ref[...], preferred_element_type=jnp.float32) + bsqkv_ref[...]
    q = qkv[:, :HQ]
    k = qkv[:, HQ:2 * HQ]
    v = qkv[:, 2 * HQ:]
    so_w = so_w_ref[...]
    acc = jnp.zeros((NQ, HQ), jnp.float32)
    for hh in range(NHQ):
        cs = slice(hh * DHQ, (hh + 1) * DHQ)
        ctx = _softmax_attend(q[:, cs], k[:, cs], v[:, cs], scale)
        acc = acc + jnp.dot(ctx, so_w[cs, :], preferred_element_type=jnp.float32)
    x = _ln(x + acc + so_b_ref[...], sln_w_ref[...], sln_b_ref[...])

    # cross-attention onto the vision encoder states (post-LN), fused K|V
    enc = enc_ref[0].astype(jnp.float32)
    q = jnp.dot(x, cq_w_ref[...], preferred_element_type=jnp.float32) + cq_b_ref[...]
    kv = jnp.dot(enc, wckv_ref[...], preferred_element_type=jnp.float32) + bckv_ref[...]
    k = kv[:, :HQ]
    v = kv[:, HQ:]
    co_w = co_w_ref[...]
    acc = jnp.zeros((NQ, HQ), jnp.float32)
    for hh in range(NHQ):
        cs = slice(hh * DHQ, (hh + 1) * DHQ)
        ctx = _softmax_attend(q[:, cs], k[:, cs], v[:, cs], scale)
        acc = acc + jnp.dot(ctx, co_w[cs, :], preferred_element_type=jnp.float32)
    x = _ln(x + acc + co_b_ref[...], cln_w_ref[...], cln_b_ref[...])

    # feed-forward (post-LN)
    hmid = jax.nn.gelu(jnp.dot(x, fc1_ref[...],
                               preferred_element_type=jnp.float32) + b1_ref[...])
    ffo = jnp.dot(hmid, fc2_ref[...],
                  preferred_element_type=jnp.float32) + b2_ref[...]
    x = _ln(x + ffo, fln_w_ref[...], fln_b_ref[...])

    # fused qformer_projection into the LM hidden size
    o_ref[0] = (jnp.dot(x, proj_w_ref[...], preferred_element_type=jnp.float32)
                + proj_b_ref[...]).astype(o_ref.dtype)


def qformer_encode(p, query_tokens, enc, proj_w, proj_b):
    N = enc.shape[0]
    full = lambda *s: pl.BlockSpec(s, lambda i: (0,) * len(s))
    return pl.pallas_call(
        _qformer_kernel,
        out_shape=jax.ShapeDtypeStruct((N, NQ, HLM), jnp.float32),
        grid=(N,),
        in_specs=[
            pl.BlockSpec((1, SV, HV), lambda i: (i, 0, 0)),
            full(NQ, HQ), full(1, HQ), full(1, HQ),
            full(HQ, 3 * HQ), full(1, 3 * HQ), full(HQ, HQ), full(1, HQ),
            full(1, HQ), full(1, HQ),
            full(HQ, HQ), full(1, HQ), full(HV, 2 * HQ), full(1, 2 * HQ),
            full(HQ, HQ), full(1, HQ), full(1, HQ), full(1, HQ),
            full(HQ, IQ), full(1, IQ), full(IQ, HQ), full(1, HQ),
            full(1, HQ), full(1, HQ),
            full(HQ, HLM), full(1, HLM),
        ],
        out_specs=pl.BlockSpec((1, NQ, HLM), lambda i: (i, 0, 0)),
        compiler_params=pltpu.CompilerParams(dimension_semantics=("arbitrary",)),
    )(enc, query_tokens, p['ln_q_w'], p['ln_q_b'],
      p['wsqkv'], p['bsqkv'], p['so_w'], p['so_b'], p['sln_w'], p['sln_b'],
      p['cq_w'], p['cq_b'], p['wckv'], p['bckv'], p['co_w'], p['co_b'],
      p['cln_w'], p['cln_b'],
      p['fc1_w'], p['fc1_b'], p['fc2_w'], p['fc2_b'], p['fln_w'], p['fln_b'],
      proj_w, proj_b)


# ------------------------------- JAX glue --------------------------------------
def make_causal_mask(bsz, tgt_len, dtype):
    minv = jnp.finfo(dtype).min
    idx = jnp.arange(tgt_len)
    mask = jnp.where(idx[:, None] >= idx[None, :], 0.0, minv).astype(dtype)
    return jnp.broadcast_to(mask[None, None], (bsz, 1, tgt_len, tgt_len))


def expand_mask_3d(mask, dtype):
    # mask: [bsz, tgt, src] -> additive [bsz, 1, tgt, src]   (mirrors _expand_mask)
    expanded = mask[:, None, :, :].astype(dtype)
    inverted = 1.0 - expanded
    return jnp.where(inverted.astype(bool), jnp.finfo(dtype).min, inverted)


def rope_tables(base=10000.0):
    """cos/sin tiled to [B*L, HLM] and the block-diagonal rotate-half matrix."""
    half = DH_LM // 2
    inv = 1.0 / (base ** (np.arange(0, DH_LM, 2, dtype=np.float32) / DH_LM))
    pos = np.arange(L, dtype=np.float32)
    freqs = pos[:, None] * inv[None, :]
    emb = np.concatenate([freqs, freqs], axis=-1)          # [L, DH]
    cos = np.cos(emb).astype(np.float32)
    sin = np.sin(emb).astype(np.float32)
    cos_full = np.tile(np.tile(cos, (1, NH_LM)), (B, 1))   # [B*L, HLM]
    sin_full = np.tile(np.tile(sin, (1, NH_LM)), (B, 1))
    r = np.zeros((DH_LM, DH_LM), np.float32)
    for j in range(half):
        r[j + half, j] = -1.0                              # col j      <- -x2[j]
        r[j, j + half] = 1.0                               # col j+half <-  x1[j]
    rot = np.zeros((HLM, HLM), np.float32)
    for hh in range(NH_LM):
        rot[hh * DH_LM:(hh + 1) * DH_LM, hh * DH_LM:(hh + 1) * DH_LM] = r
    return jnp.asarray(cos_full), jnp.asarray(sin_full), jnp.asarray(rot)


# ------------------------------ MIMModel forward --------------------------------
def mim_forward(params, input_ids, attention_mask, input_images,
                input_image_index, labels):
    bsz = input_ids.shape[0]
    # get_token_embeds (embedding gather = glue)
    text_embeds = params['lm']['embed'][input_ids]              # [B, L, HLM]

    # get_image_embeds: vision -> qformer -> projection (3 fused kernels total)
    n = input_images.shape[1]
    N = bsz * n
    imgs = input_images.reshape(N, C, IMG, IMG)
    patches = imgs.reshape(N, C, GRID_P, PATCH, GRID_P, PATCH)
    patches = patches.transpose(0, 2, 4, 1, 3, 5).reshape(N, NPATCH, CPP)
    # zero leading row: its patch-embed output is 0 and becomes the cls slot
    patches_aug = jnp.concatenate(
        [jnp.zeros((N, 1, CPP), patches.dtype), patches], axis=1)   # [N, SV, CPP]

    vp = params['vision']
    clspos = vp['pos'] + jnp.concatenate(
        [vp['cls'], jnp.zeros((SV - 1, HV), jnp.float32)], axis=0)  # [SV, HV]

    vis = vision_encode(vp, patches_aug, clspos)                    # [N, SV, HV]
    img_embeds = qformer_encode(params['qformer'], params['query_tokens'],
                                vis, params['qproj_w'], params['qproj_b'])
    img_embeds = img_embeds.reshape(bsz, n * NQ, HLM)

    # torch.scatter(dim=1) of image embeds into the text sequence
    b_idx = jnp.arange(bsz)[:, None]
    inputs_embeds = text_embeds.at[b_idx, input_image_index].set(img_embeds)

    # _prepare_decoder_attention_mask: causal + expanded 3-D mask (additive)
    causal = make_causal_mask(bsz, L, inputs_embeds.dtype)
    expanded = expand_mask_3d(attention_mask, inputs_embeds.dtype)
    combined = (expanded + causal)[:, 0]                            # [B, L, L]

    # RoPE tables (position_ids = arange(L)), shared across layers & heads
    cos_full, sin_full, rot_mat = rope_tables()

    # fused Llama decoder stack (single pallas_call over a layer grid axis)
    h = llama_stack(inputs_embeds.reshape(bsz * L, HLM).astype(jnp.float32),
                    combined, cos_full, sin_full, rot_mat, params['lm'])

    # LlamaForCausalLM loss: shift handled via a -100 sentinel at row ends,
    # then fused final-norm + lm_head + mean CE over valid tokens
    shift_labels = jnp.concatenate(
        [labels[:, 1:], jnp.full((bsz, 1), -100, labels.dtype)], axis=1)
    shift_labels = shift_labels.reshape(bsz * L, 1).astype(jnp.int32)
    return lm_head_loss(h, params['lm']['final_norm'], params['lm']['lm_head'],
                        shift_labels)
    # TODO(synk): autoregressive cache_generation / top-p sampling / SDXL image
    # decoding loop has no in-kernel equivalent and is omitted.


# ------------------------------ parameter init -----------------------------------
def init_params(key):
    kit = iter(jax.random.split(key, 256))

    def nrm(shape, scale=0.02):
        return scale * jax.random.normal(next(kit), shape, dtype=jnp.float32)

    ones = lambda s: jnp.ones(s, jnp.float32)
    zeros = lambda s: jnp.zeros(s, jnp.float32)

    def stack(fn):
        return jnp.stack([fn() for _ in range(NL_LM)], axis=0)

    lm = dict(
        embed=nrm((V, HLM)),
        in_norm=jnp.ones((NL_LM, 1, HLM), jnp.float32),
        post_norm=jnp.ones((NL_LM, 1, HLM), jnp.float32),
        wqkv=stack(lambda: nrm((HLM, 3 * HLM))),        # fused q|k|v
        wo=stack(lambda: nrm((HLM, HLM))),
        wgu=stack(lambda: nrm((HLM, 2 * I_LM))),        # fused gate|up
        wd=stack(lambda: nrm((I_LM, HLM))),
        final_norm=ones((1, HLM)),
        lm_head=nrm((HLM, V)),
    )

    vision = dict(
        patch_w=nrm((CPP, HV)),
        cls=nrm((1, HV)), pos=nrm((SV, HV)),
        pre_ln_w=ones((1, HV)), pre_ln_b=zeros((1, HV)),
        ln1_w=ones((1, HV)), ln1_b=zeros((1, HV)),
        wqkv=nrm((HV, 3 * HV)), bqkv=zeros((1, 3 * HV)),
        wo=nrm((HV, HV)), bo=zeros((1, HV)),
        ln2_w=ones((1, HV)), ln2_b=zeros((1, HV)),
        fc1_w=nrm((HV, IV)), fc1_b=zeros((1, IV)),
        fc2_w=nrm((IV, HV)), fc2_b=zeros((1, HV)),
    )

    qformer = dict(
        ln_q_w=ones((1, HQ)), ln_q_b=zeros((1, HQ)),
        wsqkv=nrm((HQ, 3 * HQ)), bsqkv=zeros((1, 3 * HQ)),
        so_w=nrm((HQ, HQ)), so_b=zeros((1, HQ)),
        sln_w=ones((1, HQ)), sln_b=zeros((1, HQ)),
        cq_w=nrm((HQ, HQ)), cq_b=zeros((1, HQ)),
        wckv=nrm((HV, 2 * HQ)), bckv=zeros((1, 2 * HQ)),    # fused cross k|v
        co_w=nrm((HQ, HQ)), co_b=zeros((1, HQ)),
        cln_w=ones((1, HQ)), cln_b=zeros((1, HQ)),
        fc1_w=nrm((HQ, IQ)), fc1_b=zeros((1, IQ)),
        fc2_w=nrm((IQ, HQ)), fc2_b=zeros((1, HQ)),
        fln_w=ones((1, HQ)), fln_b=zeros((1, HQ)),
    )

    return dict(lm=lm, vision=vision, qformer=qformer,
                query_tokens=nrm((NQ, HQ)),
                qproj_w=nrm((HQ, HLM)), qproj_b=zeros((1, HLM)))


# ----------------------------------- main -----------------------------------------
if __name__ == "__main__":
    key = jax.random.PRNGKey(0)
    pkey, k1, k2, k3 = jax.random.split(key, 4)
    params = init_params(pkey)

    input_ids = jax.random.randint(k1, (B, L), 0, V)
    input_images = jax.random.normal(k2, (B, NIMG, C, IMG, IMG), jnp.float32)
    # each image contributes NQ query embeddings scattered at positions 1..NQ
    input_image_index = jnp.tile(jnp.arange(1, 1 + NIMG * NQ)[None, :], (B, 1))
    attention_mask = jnp.ones((B, L, L), jnp.float32)   # 3-D mask, as in _expand_mask
    labels = jax.random.randint(k3, (B, L), 0, V)

    loss = jax.jit(mim_forward)(params, input_ids, attention_mask,
                                input_images, input_image_index, labels)
    jax.block_until_ready(loss)
    assert loss.shape == () and bool(jnp.isfinite(loss))
    print("KERNEL_OK")
</pallas_src>

<mosaic_0001>
module attributes {stable_mosaic.version = 11 : i64} {
  func.func @_vision_kernel(%arg0: i32, %arg1: memref<1x5x192xf32, #tpu.memory_space<vmem>>, %arg2: memref<192x32xf32, #tpu.memory_space<vmem>>, %arg3: memref<5x32xf32, #tpu.memory_space<vmem>>, %arg4: memref<1x32xf32, #tpu.memory_space<vmem>>, %arg5: memref<1x32xf32, #tpu.memory_space<vmem>>, %arg6: memref<1x32xf32, #tpu.memory_space<vmem>>, %arg7: memref<1x32xf32, #tpu.memory_space<vmem>>, %arg8: memref<32x96xf32, #tpu.memory_space<vmem>>, %arg9: memref<1x96xf32, #tpu.memory_space<vmem>>, %arg10: memref<32x32xf32, #tpu.memory_space<vmem>>, %arg11: memref<1x32xf32, #tpu.memory_space<vmem>>, %arg12: memref<1x32xf32, #tpu.memory_space<vmem>>, %arg13: memref<1x32xf32, #tpu.memory_space<vmem>>, %arg14: memref<32x64xf32, #tpu.memory_space<vmem>>, %arg15: memref<1x64xf32, #tpu.memory_space<vmem>>, %arg16: memref<64x32xf32, #tpu.memory_space<vmem>>, %arg17: memref<1x32xf32, #tpu.memory_space<vmem>>, %arg18: memref<1x5x32xf32, #tpu.memory_space<vmem>>) attributes {dimension_semantics = [#tpu.dimension_semantics<arbitrary>], iteration_bounds = array<i64: 2>, scalar_prefetch = 0 : i64, scratch_operands = 0 : i64, tpu.core_type = #tpu.core_type<tc>, window_params = [{transform_indices = @transform_0, window_bounds = array<i64: 1, 5, 192>}, {pipeline_mode = #tpu.pipeline_mode<synchronous>, transform_indices = @transform_1, window_bounds = array<i64: 192, 32>}, {pipeline_mode = #tpu.pipeline_mode<synchronous>, transform_indices = @transform_2, window_bounds = array<i64: 5, 32>}, {pipeline_mode = #tpu.pipeline_mode<synchronous>, transform_indices = @transform_3, window_bounds = array<i64: 1, 32>}, {pipeline_mode = #tpu.pipeline_mode<synchronous>, transform_indices = @transform_4, window_bounds = array<i64: 1, 32>}, {pipeline_mode = #tpu.pipeline_mode<synchronous>, transform_indices = @transform_5, window_bounds = array<i64: 1, 32>}, {pipeline_mode = #tpu.pipeline_mode<synchronous>, transform_indices = @transform_6, window_bounds = array<i64: 1, 32>}, {pipeline_mode = #tpu.pipeline_mode<synchronous>, transform_indices = @transform_7, window_bounds = array<i64: 32, 96>}, {pipeline_mode = #tpu.pipeline_mode<synchronous>, transform_indices = @transform_8, window_bounds = array<i64: 1, 96>}, {pipeline_mode = #tpu.pipeline_mode<synchronous>, transform_indices = @transform_9, window_bounds = array<i64: 32, 32>}, {pipeline_mode = #tpu.pipeline_mode<synchronous>, transform_indices = @transform_10, window_bounds = array<i64: 1, 32>}, {pipeline_mode = #tpu.pipeline_mode<synchronous>, transform_indices = @transform_11, window_bounds = array<i64: 1, 32>}, {pipeline_mode = #tpu.pipeline_mode<synchronous>, transform_indices = @transform_12, window_bounds = array<i64: 1, 32>}, {pipeline_mode = #tpu.pipeline_mode<synchronous>, transform_indices = @transform_13, window_bounds = array<i64: 32, 64>}, {pipeline_mode = #tpu.pipeline_mode<synchronous>, transform_indices = @transform_14, window_bounds = array<i64: 1, 64>}, {pipeline_mode = #tpu.pipeline_mode<synchronous>, transform_indices = @transform_15, window_bounds = array<i64: 64, 32>}, {pipeline_mode = #tpu.pipeline_mode<synchronous>, transform_indices = @transform_16, window_bounds = array<i64: 1, 32>}, {transform_indices = @transform_17, window_bounds = array<i64: 1, 5, 32>}]} {
    %c0 = arith.constant 0 : index
    %c0_0 = arith.constant 0 : index
    %c0_1 = arith.constant 0 : index
    %0 = vector.load %arg1[%c0, %c0_0, %c0_1] : memref<1x5x192xf32, #tpu.memory_space<vmem>>, vector<1x5x192xf32>
    %1 = vector.shape_cast %0 : vector<1x5x192xf32> to vector<5x192xf32>
    %c0_2 = arith.constant 0 : index
    %c0_3 = arith.constant 0 : index
    %2 = vector.load %arg2[%c0_2, %c0_3] : memref<192x32xf32, #tpu.memory_space<vmem>>, vector<192x32xf32>
    %cst = arith.constant dense<0.000000e+00> : vector<5x32xf32>
    %3 = tpu.matmul %1, %2, %cst {dimension_numbers = #tpu.dot_dimension_numbers<[1], [0], [0], [1], [0, 0, 1, 1], [], []>} : vector<5x192xf32>, vector<192x32xf32>, vector<5x32xf32> -> vector<5x32xf32>
    %c0_4 = arith.constant 0 : index
    %c0_5 = arith.constant 0 : index
    %4 = vector.load %arg3[%c0_4, %c0_5] : memref<5x32xf32, #tpu.memory_space<vmem>>, vector<5x32xf32>
    %5 = arith.addf %3, %4 : vector<5x32xf32>
    %c0_6 = arith.constant 0 : index
    %c0_7 = arith.constant 0 : index
    %6 = vector.load %arg4[%c0_6, %c0_7] : memref<1x32xf32, #tpu.memory_space<vmem>>, vector<1x32xf32>
    %c0_8 = arith.constant 0 : index
    %c0_9 = arith.constant 0 : index
    %7 = vector.load %arg5[%c0_8, %c0_9] : memref<1x32xf32, #tpu.memory_space<vmem>>, vector<1x32xf32>
    %cst_10 = arith.constant dense<0.000000e+00> : vector<5xf32>
    %8 = vector.multi_reduction <add>, %5, %cst_10 [1] : vector<5x32xf32> to vector<5xf32>
    %9 = vector.shape_cast %8 : vector<5xf32> to vector<5x1xf32>
    %cst_11 = arith.constant 3.200000e+01 : f32
    %10 = vector.broadcast %cst_11 : f32 to vector<5x1xf32>
    %11 = arith.divf %9, %10 : vector<5x1xf32>
    %12 = vector.broadcast %11 : vector<5x1xf32> to vector<5x32xf32>
    %13 = arith.subf %5, %12 : vector<5x32xf32>
    %14 = arith.mulf %13, %13 : vector<5x32xf32>
    %cst_12 = arith.constant dense<0.000000e+00> : vector<5xf32>
    %15 = vector.multi_reduction <add>, %14, %cst_12 [1] : vector<5x32xf32> to vector<5xf32>
    %16 = vector.shape_cast %15 : vector<5xf32> to vector<5x1xf32>
    %cst_13 = arith.constant 3.200000e+01 : f32
    %17 = vector.broadcast %cst_13 : f32 to vector<5x1xf32>
    %18 = arith.divf %16, %17 : vector<5x1xf32>
    %19 = vector.broadcast %11 : vector<5x1xf32> to vector<5x32xf32>
    %20 = arith.subf %5, %19 : vector<5x32xf32>
    %cst_14 = arith.constant 9.99999974E-6 : f32
    %21 = vector.broadcast %cst_14 : f32 to vector<5x1xf32>
    %22 = arith.addf %18, %21 : vector<5x1xf32>
    %23 = math.rsqrt %22 : vector<5x1xf32>
    %24 = vector.broadcast %23 : vector<5x1xf32> to vector<5x32xf32>
    %25 = arith.mulf %20, %24 : vector<5x32xf32>
    %26 = vector.broadcast %6 : vector<1x32xf32> to vector<5x32xf32>
    %27 = arith.mulf %25, %26 : vector<5x32xf32>
    %28 = vector.broadcast %7 : vector<1x32xf32> to vector<5x32xf32>
    %29 = arith.addf %27, %28 : vector<5x32xf32>
    %c0_15 = arith.constant 0 : index
    %c0_16 = arith.constant 0 : index
    %30 = vector.load %arg6[%c0_15, %c0_16] : memref<1x32xf32, #tpu.memory_space<vmem>>, vector<1x32xf32>
    %c0_17 = arith.constant 0 : index
    %c0_18 = arith.constant 0 : index
    %31 = vector.load %arg7[%c0_17, %c0_18] : memref<1x32xf32, #tpu.memory_space<vmem>>, vector<1x32xf32>
    %cst_19 = arith.constant dense<0.000000e+00> : vector<5xf32>
    %32 = vector.multi_reduction <add>, %29, %cst_19 [1] : vector<5x32xf32> to vector<5xf32>
    %33 = vector.shape_cast %32 : vector<5xf32> to vector<5x1xf32>
    %cst_20 = arith.constant 3.200000e+01 : f32
    %34 = vector.broadcast %cst_20 : f32 to vector<5x1xf32>
    %35 = arith.divf %33, %34 : vector<5x1xf32>
    %36 = vector.broadcast %35 : vector<5x1xf32> to vector<5x32xf32>
    %37 = arith.subf %29, %36 : vector<5x32xf32>
    %38 = arith.mulf %37, %37 : vector<5x32xf32>
    %cst_21 = arith.constant dense<0.000000e+00> : vector<5xf32>
    %39 = vector.multi_reduction <add>, %38, %cst_21 [1] : vector<5x32xf32> to vector<5xf32>
    %40 = vector.shape_cast %39 : vector<5xf32> to vector<5x1xf32>
    %cst_22 = arith.constant 3.200000e+01 : f32
    %41 = vector.broadcast %cst_22 : f32 to vector<5x1xf32>
    %42 = arith.divf %40, %41 : vector<5x1xf32>
    %43 = vector.broadcast %35 : vector<5x1xf32> to vector<5x32xf32>
    %44 = arith.subf %29, %43 : vector<5x32xf32>
    %cst_23 = arith.constant 9.99999974E-6 : f32
    %45 = vector.broadcast %cst_23 : f32 to vector<5x1xf32>
    %46 = arith.addf %42, %45 : vector<5x1xf32>
    %47 = math.rsqrt %46 : vector<5x1xf32>
    %48 = vector.broadcast %47 : vector<5x1xf32> to vector<5x32xf32>
    %49 = arith.mulf %44, %48 : vector<5x32xf32>
    %50 = vector.broadcast %30 : vector<1x32xf32> to vector<5x32xf32>
    %51 = arith.mulf %49, %50 : vector<5x32xf32>
    %52 = vector.broadcast %31 : vector<1x32xf32> to vector<5x32xf32>
    %53 = arith.addf %51, %52 : vector<5x32xf32>
    %c0_24 = arith.constant 0 : index
    %c0_25 = arith.constant 0 : index
    %54 = vector.load %arg8[%c0_24, %c0_25] : memref<32x96xf32, #tpu.memory_space<vmem>>, vector<32x96xf32>
    %cst_26 = arith.constant dense<0.000000e+00> : vector<5x96xf32>
    %55 = tpu.matmul %53, %54, %cst_26 {dimension_numbers = #tpu.dot_dimension_numbers<[1], [0], [0], [1], [0, 0, 1, 1], [], []>} : vector<5x32xf32>, vector<32x96xf32>, vector<5x96xf32> -> vector<5x96xf32>
    %c0_27 = arith.constant 0 : index
    %c0_28 = arith.constant 0 : index
    %56 = vector.load %arg9[%c0_27, %c0_28] : memref<1x96xf32, #tpu.memory_space<vmem>>, vector<1x96xf32>
    %57 = vector.broadcast %56 : vector<1x96xf32> to vector<5x96xf32>
    %58 = arith.addf %55, %57 : vector<5x96xf32>
    %59 = vector.extract_strided_slice %58 {offsets = [0, 0], sizes = [5, 32], strides = [1, 1]} : vector<5x96xf32> to vector<5x32xf32>
    %60 = vector.extract_strided_slice %58 {offsets = [0, 32], sizes = [5, 32], strides = [1, 1]} : vector<5x96xf32> to vector<5x32xf32>
    %61 = vector.extract_strided_slice %58 {offsets = [0, 64], sizes = [5, 32], strides = [1, 1]} : vector<5x96xf32> to vector<5x32xf32>
    %c0_29 = arith.constant 0 : index
    %c0_30 = arith.constant 0 : index
    %62 = vector.load %arg10[%c0_29, %c0_30] : memref<32x32xf32, #tpu.memory_space<vmem>>, vector<32x32xf32>
    %cst_31 = arith.constant 0.000000e+00 : f32
    %63 = vector.broadcast %cst_31 : f32 to vector<5x32xf32>
    %64 = vector.extract_strided_slice %59 {offsets = [0, 0], sizes = [5, 16], strides = [1, 1]} : vector<5x32xf32> to vector<5x16xf32>
    %65 = vector.extract_strided_slice %60 {offsets = [0, 0], sizes = [5, 16], strides = [1, 1]} : vector<5x32xf32> to vector<5x16xf32>
    %66 = vector.extract_strided_slice %61 {offsets = [0, 0], sizes = [5, 16], strides = [1, 1]} : vector<5x32xf32> to vector<5x16xf32>
    %cst_32 = arith.constant dense<0.000000e+00> : vector<5x5xf32>
    %67 = tpu.matmul %64, %65, %cst_32 {dimension_numbers = #tpu.dot_dimension_numbers<[1], [1], [0], [0], [0, 0, 1, 0], [], []>} : vector<5x16xf32>, vector<5x16xf32>, vector<5x5xf32> -> vector<5x5xf32>
    %cst_33 = arith.constant 2.500000e-01 : f32
    %68 = vector.broadcast %cst_33 : f32 to vector<5x5xf32>
    %69 = arith.mulf %67, %68 : vector<5x5xf32>
    %cst_34 = arith.constant dense<0xFF800000> : vector<5xf32>
    %70 = vector.multi_reduction <maximumf>, %69, %cst_34 [1] : vector<5x5xf32> to vector<5xf32>
    %71 = vector.shape_cast %70 : vector<5xf32> to vector<5x1xf32>
    %72 = vector.broadcast %71 : vector<5x1xf32> to vector<5x5xf32>
    %73 = arith.subf %69, %72 : vector<5x5xf32>
    %74 = math.exp %73 : vector<5x5xf32>
    %cst_35 = arith.constant dense<0.000000e+00> : vector<5xf32>
    %75 = vector.multi_reduction <add>, %74, %cst_35 [1] : vector<5x5xf32> to vector<5xf32>
    %76 = vector.shape_cast %75 : vector<5xf32> to vector<5x1xf32>
    %77 = tpu.reciprocal %76 : vector<5x1xf32> -> vector<5x1xf32>
    %78 = vector.broadcast %77 : vector<5x1xf32> to vector<5x5xf32>
    %79 = arith.mulf %74, %78 : vector<5x5xf32>
    %cst_36 = arith.constant dense<0.000000e+00> : vector<5x16xf32>
    %80 = tpu.matmul %79, %66, %cst_36 {dimension_numbers = #tpu.dot_dimension_numbers<[1], [0], [0], [1], [0, 0, 1, 1], [], []>} : vector<5x5xf32>, vector<5x16xf32>, vector<5x16xf32> -> vector<5x16xf32>
    %81 = vector.extract_strided_slice %62 {offsets = [0, 0], sizes = [16, 32], strides = [1, 1]} : vector<32x32xf32> to vector<16x32xf32>
    %cst_37 = arith.constant dense<0.000000e+00> : vector<5x32xf32>
    %82 = tpu.matmul %80, %81, %cst_37 {dimension_numbers = #tpu.dot_dimension_numbers<[1], [0], [0], [1], [0, 0, 1, 1], [], []>} : vector<5x16xf32>, vector<16x32xf32>, vector<5x32xf32> -> vector<5x32xf32>
    %83 = arith.addf %63, %82 : vector<5x32xf32>
    %84 = vector.extract_strided_slice %59 {offsets = [0, 16], sizes = [5, 16], strides = [1, 1]} : vector<5x32xf32> to vector<5x16xf32>
    %85 = vector.extract_strided_slice %60 {offsets = [0, 16], sizes = [5, 16], strides = [1, 1]} : vector<5x32xf32> to vector<5x16xf32>
    %86 = vector.extract_strided_slice %61 {offsets = [0, 16], sizes = [5, 16], strides = [1, 1]} : vector<5x32xf32> to vector<5x16xf32>
    %cst_38 = arith.constant dense<0.000000e+00> : vector<5x5xf32>
    %87 = tpu.matmul %84, %85, %cst_38 {dimension_numbers = #tpu.dot_dimension_numbers<[1], [1], [0], [0], [0, 0, 1, 0], [], []>} : vector<5x16xf32>, vector<5x16xf32>, vector<5x5xf32> -> vector<5x5xf32>
    %cst_39 = arith.constant 2.500000e-01 : f32
    %88 = vector.broadcast %cst_39 : f32 to vector<5x5xf32>
    %89 = arith.mulf %87, %88 : vector<5x5xf32>
    %cst_40 = arith.constant dense<0xFF800000> : vector<5xf32>
    %90 = vector.multi_reduction <maximumf>, %89, %cst_40 [1] : vector<5x5xf32> to vector<5xf32>
    %91 = vector.shape_cast %90 : vector<5xf32> to vector<5x1xf32>
    %92 = vector.broadcast %91 : vector<5x1xf32> to vector<5x5xf32>
    %93 = arith.subf %89, %92 : vector<5x5xf32>
    %94 = math.exp %93 : vector<5x5xf32>
    %cst_41 = arith.constant dense<0.000000e+00> : vector<5xf32>
    %95 = vector.multi_reduction <add>, %94, %cst_41 [1] : vector<5x5xf32> to vector<5xf32>
    %96 = vector.shape_cast %95 : vector<5xf32> to vector<5x1xf32>
    %97 = tpu.reciprocal %96 : vector<5x1xf32> -> vector<5x1xf32>
    %98 = vector.broadcast %97 : vector<5x1xf32> to vector<5x5xf32>
    %99 = arith.mulf %94, %98 : vector<5x5xf32>
    %cst_42 = arith.constant dense<0.000000e+00> : vector<5x16xf32>
    %100 = tpu.matmul %99, %86, %cst_42 {dimension_numbers = #tpu.dot_dimension_numbers<[1], [0], [0], [1], [0, 0, 1, 1], [], []>} : vector<5x5xf32>, vector<5x16xf32>, vector<5x16xf32> -> vector<5x16xf32>
    %101 = vector.extract_strided_slice %62 {offsets = [16, 0], sizes = [16, 32], strides = [1, 1]} : vector<32x32xf32> to vector<16x32xf32>
    %cst_43 = arith.constant dense<0.000000e+00> : vector<5x32xf32>
    %102 = tpu.matmul %100, %101, %cst_43 {dimension_numbers = #tpu.dot_dimension_numbers<[1], [0], [0], [1], [0, 0, 1, 1], [], []>} : vector<5x16xf32>, vector<16x32xf32>, vector<5x32xf32> -> vector<5x32xf32>
    %103 = arith.addf %83, %102 : vector<5x32xf32>
    %104 = arith.addf %29, %103 : vector<5x32xf32>
    %c0_44 = arith.constant 0 : index
    %c0_45 = arith.constant 0 : index
    %105 = vector.load %arg11[%c0_44, %c0_45] : memref<1x32xf32, #tpu.memory_space<vmem>>, vector<1x32xf32>
    %106 = vector.broadcast %105 : vector<1x32xf32> to vector<5x32xf32>
    %107 = arith.addf %104, %106 : vector<5x32xf32>
    %c0_46 = arith.constant 0 : index
    %c0_47 = arith.constant 0 : index
    %108 = vector.load %arg12[%c0_46, %c0_47] : memref<1x32xf32, #tpu.memory_space<vmem>>, vector<1x32xf32>
    %c0_48 = arith.constant 0 : index
    %c0_49 = arith.constant 0 : index
    %109 = vector.load %arg13[%c0_48, %c0_49] : memref<1x32xf32, #tpu.memory_space<vmem>>, vector<1x32xf32>
    %cst_50 = arith.constant dense<0.000000e+00> : vector<5xf32>
    %110 = vector.multi_reduction <add>, %107, %cst_50 [1] : vector<5x32xf32> to vector<5xf32>
    %111 = vector.shape_cast %110 : vector<5xf32> to vector<5x1xf32>
    %cst_51 = arith.constant 3.200000e+01 : f32
    %112 = vector.broadcast %cst_51 : f32 to vector<5x1xf32>
    %113 = arith.divf %111, %112 : vector<5x1xf32>
    %114 = vector.broadcast %113 : vector<5x1xf32> to vector<5x32xf32>
    %115 = arith.subf %107, %114 : vector<5x32xf32>
    %116 = arith.mulf %115, %115 : vector<5x32xf32>
    %cst_52 = arith.constant dense<0.000000e+00> : vector<5xf32>
    %117 = vector.multi_reduction <add>, %116, %cst_52 [1] : vector<5x32xf32> to vector<5xf32>
    %118 = vector.shape_cast %117 : vector<5xf32> to vector<5x1xf32>
    %cst_53 = arith.constant 3.200000e+01 : f32
    %119 = vector.broadcast %cst_53 : f32 to vector<5x1xf32>
    %120 = arith.divf %118, %119 : vector<5x1xf32>
    %121 = vector.broadcast %113 : vector<5x1xf32> to vector<5x32xf32>
    %122 = arith.subf %107, %121 : vector<5x32xf32>
    %cst_54 = arith.constant 9.99999974E-6 : f32
    %123 = vector.broadcast %cst_54 : f32 to vector<5x1xf32>
    %124 = arith.addf %120, %123 : vector<5x1xf32>
    %125 = math.rsqrt %124 : vector<5x1xf32>
    %126 = vector.broadcast %125 : vector<5x1xf32> to vector<5x32xf32>
    %127 = arith.mulf %122, %126 : vector<5x32xf32>
    %128 = vector.broadcast %108 : vector<1x32xf32> to vector<5x32xf32>
    %129 = arith.mulf %127, %128 : vector<5x32xf32>
    %130 = vector.broadcast %109 : vector<1x32xf32> to vector<5x32xf32>
    %131 = arith.addf %129, %130 : vector<5x32xf32>
    %c0_55 = arith.constant 0 : index
    %c0_56 = arith.constant 0 : index
    %132 = vector.load %arg14[%c0_55, %c0_56] : memref<32x64xf32, #tpu.memory_space<vmem>>, vector<32x64xf32>
    %cst_57 = arith.constant dense<0.000000e+00> : vector<5x64xf32>
    %133 = tpu.matmul %131, %132, %cst_57 {dimension_numbers = #tpu.dot_dimension_numbers<[1], [0], [0], [1], [0, 0, 1, 1], [], []>} : vector<5x32xf32>, vector<32x64xf32>, vector<5x64xf32> -> vector<5x64xf32>
    %c0_58 = arith.constant 0 : index
    %c0_59 = arith.constant 0 : index
    %134 = vector.load %arg15[%c0_58, %c0_59] : memref<1x64xf32, #tpu.memory_space<vmem>>, vector<1x64xf32>
    %135 = vector.broadcast %134 : vector<1x64xf32> to vector<5x64xf32>
    %136 = arith.addf %133, %135 : vector<5x64xf32>
    %137 = arith.mulf %136, %136 : vector<5x64xf32>
    %138 = arith.mulf %136, %137 : vector<5x64xf32>
    %cst_60 = arith.constant 4.471500e-02 : f32
    %139 = vector.broadcast %cst_60 : f32 to vector<5x64xf32>
    %140 = arith.mulf %139, %138 : vector<5x64xf32>
    %141 = arith.addf %136, %140 : vector<5x64xf32>
    %cst_61 = arith.constant 0.797884583 : f32
    %142 = vector.broadcast %cst_61 : f32 to vector<5x64xf32>
    %143 = arith.mulf %142, %141 : vector<5x64xf32>
    %144 = math.tanh %143 : vector<5x64xf32>
    %cst_62 = arith.constant 1.000000e+00 : f32
    %145 = vector.broadcast %cst_62 : f32 to vector<5x64xf32>
    %146 = arith.addf %145, %144 : vector<5x64xf32>
    %cst_63 = arith.constant 5.000000e-01 : f32
    %147 = vector.broadcast %cst_63 : f32 to vector<5x64xf32>
    %148 = arith.mulf %147, %146 : vector<5x64xf32>
    %149 = arith.mulf %136, %148 : vector<5x64xf32>
    %c0_64 = arith.constant 0 : index
    %c0_65 = arith.constant 0 : index
    %150 = vector.load %arg16[%c0_64, %c0_65] : memref<64x32xf32, #tpu.memory_space<vmem>>, vector<64x32xf32>
    %cst_66 = arith.constant dense<0.000000e+00> : vector<5x32xf32>
    %151 = tpu.matmul %149, %150, %cst_66 {dimension_numbers = #tpu.dot_dimension_numbers<[1], [0], [0], [1], [0, 0, 1, 1], [], []>} : vector<5x64xf32>, vector<64x32xf32>, vector<5x32xf32> -> vector<5x32xf32>
    %152 = arith.addf %107, %151 : vector<5x32xf32>
    %c0_67 = arith.constant 0 : index
    %c0_68 = arith.constant 0 : index
    %153 = vector.load %arg17[%c0_67, %c0_68] : memref<1x32xf32, #tpu.memory_space<vmem>>, vector<1x32xf32>
    %154 = vector.broadcast %153 : vector<1x32xf32> to vector<5x32xf32>
    %155 = arith.addf %152, %154 : vector<5x32xf32>
    %c0_69 = arith.constant 0 : index
    %c0_70 = arith.constant 0 : index
    %c0_71 = arith.constant 0 : index
    %156 = vector.load %arg18[%c0_69, %c0_70, %c0_71] : memref<1x5x32xf32, #tpu.memory_space<vmem>>, vector<1x5x32xf32>
    %157 = vector.shape_cast %156 : vector<1x5x32xf32> to vector<5x32xf32>
    %158 = vector.shape_cast %155 : vector<5x32xf32> to vector<1x5x32xf32>
    tpu.vector_store %arg18[%c0_69, %c0_70, %c0_71], %158 {strides = array<i32>} : memref<1x5x32xf32, #tpu.memory_space<vmem>>, vector<1x5x32xf32>,
    return
  }
  func.func @transform_0(%arg0: i32) -> (i32, i32, i32) {
    %c0_i32 = arith.constant 0 : i32
    %c0_i32_0 = arith.constant 0 : i32
    %c0_i32_1 = arith.constant 0 : i32
    return %arg0, %c0_i32, %c0_i32_0 : i32, i32, i32
  }
  func.func @transform_1(%arg0: i32) -> (i32, i32) {
    %c0_i32 = arith.constant 0 : i32
    %c0_i32_0 = arith.constant 0 : i32
    %c0_i32_1 = arith.constant 0 : i32
    return %c0_i32, %c0_i32_0 : i32, i32
  }
  func.func @transform_2(%arg0: i32) -> (i32, i32) {
    %c0_i32 = arith.constant 0 : i32
    %c0_i32_0 = arith.constant 0 : i32
    %c0_i32_1 = arith.constant 0 : i32
    return %c0_i32, %c0_i32_0 : i32, i32
  }
  func.func @transform_3(%arg0: i32) -> (i32, i32) {
    %c0_i32 = arith.constant 0 : i32
    %c0_i32_0 = arith.constant 0 : i32
    %c0_i32_1 = arith.constant 0 : i32
    return %c0_i32, %c0_i32_0 : i32, i32
  }
  func.func @transform_4(%arg0: i32) -> (i32, i32) {
    %c0_i32 = arith.constant 0 : i32
    %c0_i32_0 = arith.constant 0 : i32
    %c0_i32_1 = arith.constant 0 : i32
    return %c0_i32, %c0_i32_0 : i32, i32
  }
  func.func @transform_5(%arg0: i32) -> (i32, i32) {
    %c0_i32 = arith.constant 0 : i32
    %c0_i32_0 = arith.constant 0 : i32
    %c0_i32_1 = arith.constant 0 : i32
    return %c0_i32, %c0_i32_0 : i32, i32
  }
  func.func @transform_6(%arg0: i32) -> (i32, i32) {
    %c0_i32 = arith.constant 0 : i32
    %c0_i32_0 = arith.constant 0 : i32
    %c0_i32_1 = arith.constant 0 : i32
    return %c0_i32, %c0_i32_0 : i32, i32
  }
  func.func @transform_7(%arg0: i32) -> (i32, i32) {
    %c0_i32 = arith.constant 0 : i32
    %c0_i32_0 = arith.constant 0 : i32
    %c0_i32_1 = arith.constant 0 : i32
    return %c0_i32, %c0_i32_0 : i32, i32
  }
  func.func @transform_8(%arg0: i32) -> (i32, i32) {
    %c0_i32 = arith.constant 0 : i32
    %c0_i32_0 = arith.constant 0 : i32
    %c0_i32_1 = arith.constant 0 : i32
    return %c0_i32, %c0_i32_0 : i32, i32
  }
  func.func @transform_9(%arg0: i32) -> (i32, i32) {
    %c0_i32 = arith.constant 0 : i32
    %c0_i32_0 = arith.constant 0 : i32
    %c0_i32_1 = arith.constant 0 : i32
    return %c0_i32, %c0_i32_0 : i32, i32
  }
  func.func @transform_10(%arg0: i32) -> (i32, i32) {
    %c0_i32 = arith.constant 0 : i32
    %c0_i32_0 = arith.constant 0 : i32
    %c0_i32_1 = arith.constant 0 : i32
    return %c0_i32, %c0_i32_0 : i32, i32
  }
  func.func @transform_11(%arg0: i32) -> (i32, i32) {
    %c0_i32 = arith.constant 0 : i32
    %c0_i32_0 = arith.constant 0 : i32
    %c0_i32_1 = arith.constant 0 : i32
    return %c0_i32, %c0_i32_0 : i32, i32
  }
  func.func @transform_12(%arg0: i32) -> (i32, i32) {
    %c0_i32 = arith.constant 0 : i32
    %c0_i32_0 = arith.constant 0 : i32
    %c0_i32_1 = arith.constant 0 : i32
    return %c0_i32, %c0_i32_0 : i32, i32
  }
  func.func @transform_13(%arg0: i32) -> (i32, i32) {
    %c0_i32 = arith.constant 0 : i32
    %c0_i32_0 = arith.constant 0 : i32
    %c0_i32_1 = arith.constant 0 : i32
    return %c0_i32, %c0_i32_0 : i32, i32
  }
  func.func @transform_14(%arg0: i32) -> (i32, i32) {
    %c0_i32 = arith.constant 0 : i32
    %c0_i32_0 = arith.constant 0 : i32
    %c0_i32_1 = arith.constant 0 : i32
    return %c0_i32, %c0_i32_0 : i32, i32
  }
  func.func @transform_15(%arg0: i32) -> (i32, i32) {
    %c0_i32 = arith.constant 0 : i32
    %c0_i32_0 = arith.constant 0 : i32
    %c0_i32_1 = arith.constant 0 : i32
    return %c0_i32, %c0_i32_0 : i32, i32
  }
  func.func @transform_16(%arg0: i32) -> (i32, i32) {
    %c0_i32 = arith.constant 0 : i32
    %c0_i32_0 = arith.constant 0 : i32
    %c0_i32_1 = arith.constant 0 : i32
    return %c0_i32, %c0_i32_0 : i32, i32
  }
  func.func @transform_17(%arg0: i32) -> (i32, i32, i32) {
    %c0_i32 = arith.constant 0 : i32
    %c0_i32_0 = arith.constant 0 : i32
    %c0_i32_1 = arith.constant 0 : i32
    return %arg0, %c0_i32, %c0_i32_0 : i32, i32, i32
  }
}

module attributes {stable_mosaic.version = 11 : i64} {
  func.func @_qformer_kernel(%arg0: i32, %arg1: memref<1x5x32xf32, #tpu.memory_space<vmem>>, %arg2: memref<4x32xf32, #tpu.memory_space<vmem>>, %arg3: memref<1x32xf32, #tpu.memory_space<vmem>>, %arg4: memref<1x32xf32, #tpu.memory_space<vmem>>, %arg5: memref<32x96xf32, #tpu.memory_space<vmem>>, %arg6: memref<1x96xf32, #tpu.memory_space<vmem>>, %arg7: memref<32x32xf32, #tpu.memory_space<vmem>>, %arg8: memref<1x32xf32, #tpu.memory_space<vmem>>, %arg9: memref<1x32xf32, #tpu.memory_space<vmem>>, %arg10: memref<1x32xf32, #tpu.memory_space<vmem>>, %arg11: memref<32x32xf32, #tpu.memory_space<vmem>>, %arg12: memref<1x32xf32, #tpu.memory_space<vmem>>, %arg13: memref<32x64xf32, #tpu.memory_space<vmem>>, %arg14: memref<1x64xf32, #tpu.memory_space<vmem>>, %arg15: memref<32x32xf32, #tpu.memory_space<vmem>>, %arg16: memref<1x32xf32, #tpu.memory_space<vmem>>, %arg17: memref<1x32xf32, #tpu.memory_space<vmem>>, %arg18: memref<1x32xf32, #tpu.memory_space<vmem>>, %arg19: memref<32x64xf32, #tpu.memory_space<vmem>>, %arg20: memref<1x64xf32, #tpu.memory_space<vmem>>, %arg21: memref<64x32xf32, #tpu.memory_space<vmem>>, %arg22: memref<1x32xf32, #tpu.memory_space<vmem>>, %arg23: memref<1x32xf32, #tpu.memory_space<vmem>>, %arg24: memref<1x32xf32, #tpu.memory_space<vmem>>, %arg25: memref<32x32xf32, #tpu.memory_space<vmem>>, %arg26: memref<1x32xf32, #tpu.memory_space<vmem>>, %arg27: memref<1x4x32xf32, #tpu.memory_space<vmem>>) attributes {dimension_semantics = [#tpu.dimension_semantics<arbitrary>], iteration_bounds = array<i64: 2>, scalar_prefetch = 0 : i64, scratch_operands = 0 : i64, tpu.core_type = #tpu.core_type<tc>, window_params = [{transform_indices = @transform_0, window_bounds = array<i64: 1, 5, 32>}, {pipeline_mode = #tpu.pipeline_mode<synchronous>, transform_indices = @transform_1, window_bounds = array<i64: 4, 32>}, {pipeline_mode = #tpu.pipeline_mode<synchronous>, transform_indices = @transform_2, window_bounds = array<i64: 1, 32>}, {pipeline_mode = #tpu.pipeline_mode<synchronous>, transform_indices = @transform_3, window_bounds = array<i64: 1, 32>}, {pipeline_mode = #tpu.pipeline_mode<synchronous>, transform_indices = @transform_4, window_bounds = array<i64: 32, 96>}, {pipeline_mode = #tpu.pipeline_mode<synchronous>, transform_indices = @transform_5, window_bounds = array<i64: 1, 96>}, {pipeline_mode = #tpu.pipeline_mode<synchronous>, transform_indices = @transform_6, window_bounds = array<i64: 32, 32>}, {pipeline_mode = #tpu.pipeline_mode<synchronous>, transform_indices = @transform_7, window_bounds = array<i64: 1, 32>}, {pipeline_mode = #tpu.pipeline_mode<synchronous>, transform_indices = @transform_8, window_bounds = array<i64: 1, 32>}, {pipeline_mode = #tpu.pipeline_mode<synchronous>, transform_indices = @transform_9, window_bounds = array<i64: 1, 32>}, {pipeline_mode = #tpu.pipeline_mode<synchronous>, transform_indices = @transform_10, window_bounds = array<i64: 32, 32>}, {pipeline_mode = #tpu.pipeline_mode<synchronous>, transform_indices = @transform_11, window_bounds = array<i64: 1, 32>}, {pipeline_mode = #tpu.pipeline_mode<synchronous>, transform_indices = @transform_12, window_bounds = array<i64: 32, 64>}, {pipeline_mode = #tpu.pipeline_mode<synchronous>, transform_indices = @transform_13, window_bounds = array<i64: 1, 64>}, {pipeline_mode = #tpu.pipeline_mode<synchronous>, transform_indices = @transform_14, window_bounds = array<i64: 32, 32>}, {pipeline_mode = #tpu.pipeline_mode<synchronous>, transform_indices = @transform_15, window_bounds = array<i64: 1, 32>}, {pipeline_mode = #tpu.pipeline_mode<synchronous>, transform_indices = @transform_16, window_bounds = array<i64: 1, 32>}, {pipeline_mode = #tpu.pipeline_mode<synchronous>, transform_indices = @transform_17, window_bounds = array<i64: 1, 32>}, {pipeline_mode = #tpu.pipeline_mode<synchronous>, transform_indices = @transform_18, window_bounds = array<i64: 32, 64>}, {pipeline_mode = #tpu.pipeline_mode<synchronous>, transform_indices = @transform_19, window_bounds = array<i64: 1, 64>}, {pipeline_mode = #tpu.pipeline_mode<synchronous>, transform_indices = @transform_20, window_bounds = array<i64: 64, 32>}, {pipeline_mode = #tpu.pipeline_mode<synchronous>, transform_indices = @transform_21, window_bounds = array<i64: 1, 32>}, {pipeline_mode = #tpu.pipeline_mode<synchronous>, transform_indices = @transform_22, window_bounds = array<i64: 1, 32>}, {pipeline_mode = #tpu.pipeline_mode<synchronous>, transform_indices = @transform_23, window_bounds = array<i64: 1, 32>}, {pipeline_mode = #tpu.pipeline_mode<synchronous>, transform_indices = @transform_24, window_bounds = array<i64: 32, 32>}, {pipeline_mode = #tpu.pipeline_mode<synchronous>, transform_indices = @transform_25, window_bounds = array<i64: 1, 32>}, {transform_indices = @transform_26, window_bounds = array<i64: 1, 4, 32>}]} {
    %c0 = arith.constant 0 : index
    %c0_0 = arith.constant 0 : index
    %0 = vector.load %arg2[%c0, %c0_0] : memref<4x32xf32, #tpu.memory_space<vmem>>, vector<4x32xf32>
    %c0_1 = arith.constant 0 : index
    %c0_2 = arith.constant 0 : index
    %1 = vector.load %arg3[%c0_1, %c0_2] : memref<1x32xf32, #tpu.memory_space<vmem>>, vector<1x32xf32>
    %c0_3 = arith.constant 0 : index
    %c0_4 = arith.constant 0 : index
    %2 = vector.load %arg4[%c0_3, %c0_4] : memref<1x32xf32, #tpu.memory_space<vmem>>, vector<1x32xf32>
    %cst = arith.constant dense<0.000000e+00> : vector<4xf32>
    %3 = vector.multi_reduction <add>, %0, %cst [1] : vector<4x32xf32> to vector<4xf32>
    %4 = vector.shape_cast %3 : vector<4xf32> to vector<4x1xf32>
    %cst_5 = arith.constant 3.200000e+01 : f32
    %5 = vector.broadcast %cst_5 : f32 to vector<4x1xf32>
    %6 = arith.divf %4, %5 : vector<4x1xf32>
    %7 = vector.broadcast %6 : vector<4x1xf32> to vector<4x32xf32>
    %8 = arith.subf %0, %7 : vector<4x32xf32>
    %9 = arith.mulf %8, %8 : vector<4x32xf32>
    %cst_6 = arith.constant dense<0.000000e+00> : vector<4xf32>
    %10 = vector.multi_reduction <add>, %9, %cst_6 [1] : vector<4x32xf32> to vector<4xf32>
    %11 = vector.shape_cast %10 : vector<4xf32> to vector<4x1xf32>
    %cst_7 = arith.constant 3.200000e+01 : f32
    %12 = vector.broadcast %cst_7 : f32 to vector<4x1xf32>
    %13 = arith.divf %11, %12 : vector<4x1xf32>
    %14 = vector.broadcast %6 : vector<4x1xf32> to vector<4x32xf32>
    %15 = arith.subf %0, %14 : vector<4x32xf32>
    %cst_8 = arith.constant 9.99999974E-6 : f32
    %16 = vector.broadcast %cst_8 : f32 to vector<4x1xf32>
    %17 = arith.addf %13, %16 : vector<4x1xf32>
    %18 = math.rsqrt %17 : vector<4x1xf32>
    %19 = vector.broadcast %18 : vector<4x1xf32> to vector<4x32xf32>
    %20 = arith.mulf %15, %19 : vector<4x32xf32>
    %21 = vector.broadcast %1 : vector<1x32xf32> to vector<4x32xf32>
    %22 = arith.mulf %20, %21 : vector<4x32xf32>
    %23 = vector.broadcast %2 : vector<1x32xf32> to vector<4x32xf32>
    %24 = arith.addf %22, %23 : vector<4x32xf32>
    %c0_9 = arith.constant 0 : index
    %c0_10 = arith.constant 0 : index
    %25 = vector.load %arg5[%c0_9, %c0_10] : memref<32x96xf32, #tpu.memory_space<vmem>>, vector<32x96xf32>
    %cst_11 = arith.constant dense<0.000000e+00> : vector<4x96xf32>
    %26 = tpu.matmul %24, %25, %cst_11 {dimension_numbers = #tpu.dot_dimension_numbers<[1], [0], [0], [1], [0, 0, 1, 1], [], []>} : vector<4x32xf32>, vector<32x96xf32>, vector<4x96xf32> -> vector<4x96xf32>
    %c0_12 = arith.constant 0 : index
    %c0_13 = arith.constant 0 : index
    %27 = vector.load %arg6[%c0_12, %c0_13] : memref<1x96xf32, #tpu.memory_space<vmem>>, vector<1x96xf32>
    %28 = vector.broadcast %27 : vector<1x96xf32> to vector<4x96xf32>
    %29 = arith.addf %26, %28 : vector<4x96xf32>
    %30 = vector.extract_strided_slice %29 {offsets = [0, 0], sizes = [4, 32], strides = [1, 1]} : vector<4x96xf32> to vector<4x32xf32>
    %31 = vector.extract_strided_slice %29 {offsets = [0, 32], sizes = [4, 32], strides = [1, 1]} : vector<4x96xf32> to vector<4x32xf32>
    %32 = vector.extract_strided_slice %29 {offsets = [0, 64], sizes = [4, 32], strides = [1, 1]} : vector<4x96xf32> to vector<4x32xf32>
    %c0_14 = arith.constant 0 : index
    %c0_15 = arith.constant 0 : index
    %33 = vector.load %arg7[%c0_14, %c0_15] : memref<32x32xf32, #tpu.memory_space<vmem>>, vector<32x32xf32>
    %cst_16 = arith.constant 0.000000e+00 : f32
    %34 = vector.broadcast %cst_16 : f32 to vector<4x32xf32>
    %35 = vector.extract_strided_slice %30 {offsets = [0, 0], sizes = [4, 16], strides = [1, 1]} : vector<4x32xf32> to vector<4x16xf32>
    %36 = vector.extract_strided_slice %31 {offsets = [0, 0], sizes = [4, 16], strides = [1, 1]} : vector<4x32xf32> to vector<4x16xf32>
    %37 = vector.extract_strided_slice %32 {offsets = [0, 0], sizes = [4, 16], strides = [1, 1]} : vector<4x32xf32> to vector<4x16xf32>
    %cst_17 = arith.constant dense<0.000000e+00> : vector<4x4xf32>
    %38 = tpu.matmul %35, %36, %cst_17 {dimension_numbers = #tpu.dot_dimension_numbers<[1], [1], [0], [0], [0, 0, 1, 0], [], []>} : vector<4x16xf32>, vector<4x16xf32>, vector<4x4xf32> -> vector<4x4xf32>
    %cst_18 = arith.constant 2.500000e-01 : f32
    %39 = vector.broadcast %cst_18 : f32 to vector<4x4xf32>
    %40 = arith.mulf %38, %39 : vector<4x4xf32>
    %cst_19 = arith.constant dense<0xFF800000> : vector<4xf32>
    %41 = vector.multi_reduction <maximumf>, %40, %cst_19 [1] : vector<4x4xf32> to vector<4xf32>
    %42 = vector.shape_cast %41 : vector<4xf32> to vector<4x1xf32>
    %43 = vector.broadcast %42 : vector<4x1xf32> to vector<4x4xf32>
    %44 = arith.subf %40, %43 : vector<4x4xf32>
    %45 = math.exp %44 : vector<4x4xf32>
    %cst_20 = arith.constant dense<0.000000e+00> : vector<4xf32>
    %46 = vector.multi_reduction <add>, %45, %cst_20 [1] : vector<4x4xf32> to vector<4xf32>
    %47 = vector.shape_cast %46 : vector<4xf32> to vector<4x1xf32>
    %48 = tpu.reciprocal %47 : vector<4x1xf32> -> vector<4x1xf32>
    %49 = vector.broadcast %48 : vector<4x1xf32> to vector<4x4xf32>
    %50 = arith.mulf %45, %49 : vector<4x4xf32>
    %cst_21 = arith.constant dense<0.000000e+00> : vector<4x16xf32>
    %51 = tpu.matmul %50, %37, %cst_21 {dimension_numbers = #tpu.dot_dimension_numbers<[1], [0], [0], [1], [0, 0, 1, 1], [], []>} : vector<4x4xf32>, vector<4x16xf32>, vector<4x16xf32> -> vector<4x16xf32>
    %52 = vector.extract_strided_slice %33 {offsets = [0, 0], sizes = [16, 32], strides = [1, 1]} : vector<32x32xf32> to vector<16x32xf32>
    %cst_22 = arith.constant dense<0.000000e+00> : vector<4x32xf32>
    %53 = tpu.matmul %51, %52, %cst_22 {dimension_numbers = #tpu.dot_dimension_numbers<[1], [0], [0], [1], [0, 0, 1, 1], [], []>} : vector<4x16xf32>, vector<16x32xf32>, vector<4x32xf32> -> vector<4x32xf32>
    %54 = arith.addf %34, %53 : vector<4x32xf32>
    %55 = vector.extract_strided_slice %30 {offsets = [0, 16], sizes = [4, 16], strides = [1, 1]} : vector<4x32xf32> to vector<4x16xf32>
    %56 = vector.extract_strided_slice %31 {offsets = [0, 16], sizes = [4, 16], strides = [1, 1]} : vector<4x32xf32> to vector<4x16xf32>
    %57 = vector.extract_strided_slice %32 {offsets = [0, 16], sizes = [4, 16], strides = [1, 1]} : vector<4x32xf32> to vector<4x16xf32>
    %cst_23 = arith.constant dense<0.000000e+00> : vector<4x4xf32>
    %58 = tpu.matmul %55, %56, %cst_23 {dimension_numbers = #tpu.dot_dimension_numbers<[1], [1], [0], [0], [0, 0, 1, 0], [], []>} : vector<4x16xf32>, vector<4x16xf32>, vector<4x4xf32> -> vector<4x4xf32>
    %cst_24 = arith.constant 2.500000e-01 : f32
    %59 = vector.broadcast %cst_24 : f32 to vector<4x4xf32>
    %60 = arith.mulf %58, %59 : vector<4x4xf32>
    %cst_25 = arith.constant dense<0xFF800000> : vector<4xf32>
    %61 = vector.multi_reduction <maximumf>, %60, %cst_25 [1] : vector<4x4xf32> to vector<4xf32>
    %62 = vector.shape_cast %61 : vector<4xf32> to vector<4x1xf32>
    %63 = vector.broadcast %62 : vector<4x1xf32> to vector<4x4xf32>
    %64 = arith.subf %60, %63 : vector<4x4xf32>
    %65 = math.exp %64 : vector<4x4xf32>
    %cst_26 = arith.constant dense<0.000000e+00> : vector<4xf32>
    %66 = vector.multi_reduction <add>, %65, %cst_26 [1] : vector<4x4xf32> to vector<4xf32>
    %67 = vector.shape_cast %66 : vector<4xf32> to vector<4x1xf32>
    %68 = tpu.reciprocal %67 : vector<4x1xf32> -> vector<4x1xf32>
    %69 = vector.broadcast %68 : vector<4x1xf32> to vector<4x4xf32>
    %70 = arith.mulf %65, %69 : vector<4x4xf32>
    %cst_27 = arith.constant dense<0.000000e+00> : vector<4x16xf32>
    %71 = tpu.matmul %70, %57, %cst_27 {dimension_numbers = #tpu.dot_dimension_numbers<[1], [0], [0], [1], [0, 0, 1, 1], [], []>} : vector<4x4xf32>, vector<4x16xf32>, vector<4x16xf32> -> vector<4x16xf32>
    %72 = vector.extract_strided_slice %33 {offsets = [16, 0], sizes = [16, 32], strides = [1, 1]} : vector<32x32xf32> to vector<16x32xf32>
    %cst_28 = arith.constant dense<0.000000e+00> : vector<4x32xf32>
    %73 = tpu.matmul %71, %72, %cst_28 {dimension_numbers = #tpu.dot_dimension_numbers<[1], [0], [0], [1], [0, 0, 1, 1], [], []>} : vector<4x16xf32>, vector<16x32xf32>, vector<4x32xf32> -> vector<4x32xf32>
    %74 = arith.addf %54, %73 : vector<4x32xf32>
    %75 = arith.addf %24, %74 : vector<4x32xf32>
    %c0_29 = arith.constant 0 : index
    %c0_30 = arith.constant 0 : index
    %76 = vector.load %arg8[%c0_29, %c0_30] : memref<1x32xf32, #tpu.memory_space<vmem>>, vector<1x32xf32>
    %77 = vector.broadcast %76 : vector<1x32xf32> to vector<4x32xf32>
    %78 = arith.addf %75, %77 : vector<4x32xf32>
    %c0_31 = arith.constant 0 : index
    %c0_32 = arith.constant 0 : index
    %79 = vector.load %arg9[%c0_31, %c0_32] : memref<1x32xf32, #tpu.memory_space<vmem>>, vector<1x32xf32>
    %c0_33 = arith.constant 0 : index
    %c0_34 = arith.constant 0 : index
    %80 = vector.load %arg10[%c0_33, %c0_34] : memref<1x32xf32, #tpu.memory_space<vmem>>, vector<1x32xf32>
    %cst_35 = arith.constant dense<0.000000e+00> : vector<4xf32>
    %81 = vector.multi_reduction <add>, %78, %cst_35 [1] : vector<4x32xf32> to vector<4xf32>
    %82 = vector.shape_cast %81 : vector<4xf32> to vector<4x1xf32>
    %cst_36 = arith.constant 3.200000e+01 : f32
    %83 = vector.broadcast %cst_36 : f32 to vector<4x1xf32>
    %84 = arith.divf %82, %83 : vector<4x1xf32>
    %85 = vector.broadcast %84 : vector<4x1xf32> to vector<4x32xf32>
    %86 = arith.subf %78, %85 : vector<4x32xf32>
    %87 = arith.mulf %86, %86 : vector<4x32xf32>
    %cst_37 = arith.constant dense<0.000000e+00> : vector<4xf32>
    %88 = vector.multi_reduction <add>, %87, %cst_37 [1] : vector<4x32xf32> to vector<4xf32>
    %89 = vector.shape_cast %88 : vector<4xf32> to vector<4x1xf32>
    %cst_38 = arith.constant 3.200000e+01 : f32
    %90 = vector.broadcast %cst_38 : f32 to vector<4x1xf32>
    %91 = arith.divf %89, %90 : vector<4x1xf32>
    %92 = vector.broadcast %84 : vector<4x1xf32> to vector<4x32xf32>
    %93 = arith.subf %78, %92 : vector<4x32xf32>
    %cst_39 = arith.constant 9.99999974E-6 : f32
    %94 = vector.broadcast %cst_39 : f32 to vector<4x1xf32>
    %95 = arith.addf %91, %94 : vector<4x1xf32>
    %96 = math.rsqrt %95 : vector<4x1xf32>
    %97 = vector.broadcast %96 : vector<4x1xf32> to vector<4x32xf32>
    %98 = arith.mulf %93, %97 : vector<4x32xf32>
    %99 = vector.broadcast %79 : vector<1x32xf32> to vector<4x32xf32>
    %100 = arith.mulf %98, %99 : vector<4x32xf32>
    %101 = vector.broadcast %80 : vector<1x32xf32> to vector<4x32xf32>
    %102 = arith.addf %100, %101 : vector<4x32xf32>
    %c0_40 = arith.constant 0 : index
    %c0_41 = arith.constant 0 : index
    %c0_42 = arith.constant 0 : index
    %103 = vector.load %arg1[%c0_40, %c0_41, %c0_42] : memref<1x5x32xf32, #tpu.memory_space<vmem>>, vector<1x5x32xf32>
    %104 = vector.shape_cast %103 : vector<1x5x32xf32> to vector<5x32xf32>
    %c0_43 = arith.constant 0 : index
    %c0_44 = arith.constant 0 : index
    %105 = vector.load %arg11[%c0_43, %c0_44] : memref<32x32xf32, #tpu.memory_space<vmem>>, vector<32x32xf32>
    %cst_45 = arith.constant dense<0.000000e+00> : vector<4x32xf32>
    %106 = tpu.matmul %102, %105, %cst_45 {dimension_numbers = #tpu.dot_dimension_numbers<[1], [0], [0], [1], [0, 0, 1, 1], [], []>} : vector<4x32xf32>, vector<32x32xf32>, vector<4x32xf32> -> vector<4x32xf32>
    %c0_46 = arith.constant 0 : index
    %c0_47 = arith.constant 0 : index
    %107 = vector.load %arg12[%c0_46, %c0_47] : memref<1x32xf32, #tpu.memory_space<vmem>>, vector<1x32xf32>
    %108 = vector.broadcast %107 : vector<1x32xf32> to vector<4x32xf32>
    %109 = arith.addf %106, %108 : vector<4x32xf32>
    %c0_48 = arith.constant 0 : index
    %c0_49 = arith.constant 0 : index
    %110 = vector.load %arg13[%c0_48, %c0_49] : memref<32x64xf32, #tpu.memory_space<vmem>>, vector<32x64xf32>
    %cst_50 = arith.constant dense<0.000000e+00> : vector<5x64xf32>
    %111 = tpu.matmul %104, %110, %cst_50 {dimension_numbers = #tpu.dot_dimension_numbers<[1], [0], [0], [1], [0, 0, 1, 1], [], []>} : vector<5x32xf32>, vector<32x64xf32>, vector<5x64xf32> -> vector<5x64xf32>
    %c0_51 = arith.constant 0 : index
    %c0_52 = arith.constant 0 : index
    %112 = vector.load %arg14[%c0_51, %c0_52] : memref<1x64xf32, #tpu.memory_space<vmem>>, vector<1x64xf32>
    %113 = vector.broadcast %112 : vector<1x64xf32> to vector<5x64xf32>
    %114 = arith.addf %111, %113 : vector<5x64xf32>
    %115 = vector.extract_strided_slice %114 {offsets = [0, 0], sizes = [5, 32], strides = [1, 1]} : vector<5x64xf32> to vector<5x32xf32>
    %116 = vector.extract_strided_slice %114 {offsets = [0, 32], sizes = [5, 32], strides = [1, 1]} : vector<5x64xf32> to vector<5x32xf32>
    %c0_53 = arith.constant 0 : index
    %c0_54 = arith.constant 0 : index
    %117 = vector.load %arg15[%c0_53, %c0_54] : memref<32x32xf32, #tpu.memory_space<vmem>>, vector<32x32xf32>
    %cst_55 = arith.constant 0.000000e+00 : f32
    %118 = vector.broadcast %cst_55 : f32 to vector<4x32xf32>
    %119 = vector.extract_strided_slice %109 {offsets = [0, 0], sizes = [4, 16], strides = [1, 1]} : vector<4x32xf32> to vector<4x16xf32>
    %120 = vector.extract_strided_slice %115 {offsets = [0, 0], sizes = [5, 16], strides = [1, 1]} : vector<5x32xf32> to vector<5x16xf32>
    %121 = vector.extract_strided_slice %116 {offsets = [0, 0], sizes = [5, 16], strides = [1, 1]} : vector<5x32xf32> to vector<5x16xf32>
    %cst_56 = arith.constant dense<0.000000e+00> : vector<4x5xf32>
    %122 = tpu.matmul %119, %120, %cst_56 {dimension_numbers = #tpu.dot_dimension_numbers<[1], [1], [0], [0], [0, 0, 1, 0], [], []>} : vector<4x16xf32>, vector<5x16xf32>, vector<4x5xf32> -> vector<4x5xf32>
    %cst_57 = arith.constant 2.500000e-01 : f32
    %123 = vector.broadcast %cst_57 : f32 to vector<4x5xf32>
    %124 = arith.mulf %122, %123 : vector<4x5xf32>
    %cst_58 = arith.constant dense<0xFF800000> : vector<4xf32>
    %125 = vector.multi_reduction <maximumf>, %124, %cst_58 [1] : vector<4x5xf32> to vector<4xf32>
    %126 = vector.shape_cast %125 : vector<4xf32> to vector<4x1xf32>
    %127 = vector.broadcast %126 : vector<4x1xf32> to vector<4x5xf32>
    %128 = arith.subf %124, %127 : vector<4x5xf32>
    %129 = math.exp %128 : vector<4x5xf32>
    %cst_59 = arith.constant dense<0.000000e+00> : vector<4xf32>
    %130 = vector.multi_reduction <add>, %129, %cst_59 [1] : vector<4x5xf32> to vector<4xf32>
    %131 = vector.shape_cast %130 : vector<4xf32> to vector<4x1xf32>
    %132 = tpu.reciprocal %131 : vector<4x1xf32> -> vector<4x1xf32>
    %133 = vector.broadcast %132 : vector<4x1xf32> to vector<4x5xf32>
    %134 = arith.mulf %129, %133 : vector<4x5xf32>
    %cst_60 = arith.constant dense<0.000000e+00> : vector<4x16xf32>
    %135 = tpu.matmul %134, %121, %cst_60 {dimension_numbers = #tpu.dot_dimension_numbers<[1], [0], [0], [1], [0, 0, 1, 1], [], []>} : vector<4x5xf32>, vector<5x16xf32>, vector<4x16xf32> -> vector<4x16xf32>
    %136 = vector.extract_strided_slice %117 {offsets = [0, 0], sizes = [16, 32], strides = [1, 1]} : vector<32x32xf32> to vector<16x32xf32>
    %cst_61 = arith.constant dense<0.000000e+00> : vector<4x32xf32>
    %137 = tpu.matmul %135, %136, %cst_61 {dimension_numbers = #tpu.dot_dimension_numbers<[1], [0], [0], [1], [0, 0, 1, 1], [], []>} : vector<4x16xf32>, vector<16x32xf32>, vector<4x32xf32> -> vector<4x32xf32>
    %138 = arith.addf %118, %137 : vector<4x32xf32>
    %139 = vector.extract_strided_slice %109 {offsets = [0, 16], sizes = [4, 16], strides = [1, 1]} : vector<4x32xf32> to vector<4x16xf32>
    %140 = vector.extract_strided_slice %115 {offsets = [0, 16], sizes = [5, 16], strides = [1, 1]} : vector<5x32xf32> to vector<5x16xf32>
    %141 = vector.extract_strided_slice %116 {offsets = [0, 16], sizes = [5, 16], strides = [1, 1]} : vector<5x32xf32> to vector<5x16xf32>
    %cst_62 = arith.constant dense<0.000000e+00> : vector<4x5xf32>
    %142 = tpu.matmul %139, %140, %cst_62 {dimension_numbers = #tpu.dot_dimension_numbers<[1], [1], [0], [0], [0, 0, 1, 0], [], []>} : vector<4x16xf32>, vector<5x16xf32>, vector<4x5xf32> -> vector<4x5xf32>
    %cst_63 = arith.constant 2.500000e-01 : f32
    %143 = vector.broadcast %cst_63 : f32 to vector<4x5xf32>
    %144 = arith.mulf %142, %143 : vector<4x5xf32>
    %cst_64 = arith.constant dense<0xFF800000> : vector<4xf32>
    %145 = vector.multi_reduction <maximumf>, %144, %cst_64 [1] : vector<4x5xf32> to vector<4xf32>
    %146 = vector.shape_cast %145 : vector<4xf32> to vector<4x1xf32>
    %147 = vector.broadcast %146 : vector<4x1xf32> to vector<4x5xf32>
    %148 = arith.subf %144, %147 : vector<4x5xf32>
    %149 = math.exp %148 : vector<4x5xf32>
    %cst_65 = arith.constant dense<0.000000e+00> : vector<4xf32>
    %150 = vector.multi_reduction <add>, %149, %cst_65 [1] : vector<4x5xf32> to vector<4xf32>
    %151 = vector.shape_cast %150 : vector<4xf32> to vector<4x1xf32>
    %152 = tpu.reciprocal %151 : vector<4x1xf32> -> vector<4x1xf32>
    %153 = vector.broadcast %152 : vector<4x1xf32> to vector<4x5xf32>
    %154 = arith.mulf %149, %153 : vector<4x5xf32>
    %cst_66 = arith.constant dense<0.000000e+00> : vector<4x16xf32>
    %155 = tpu.matmul %154, %141, %cst_66 {dimension_numbers = #tpu.dot_dimension_numbers<[1], [0], [0], [1], [0, 0, 1, 1], [], []>} : vector<4x5xf32>, vector<5x16xf32>, vector<4x16xf32> -> vector<4x16xf32>
    %156 = vector.extract_strided_slice %117 {offsets = [16, 0], sizes = [16, 32], strides = [1, 1]} : vector<32x32xf32> to vector<16x32xf32>
    %cst_67 = arith.constant dense<0.000000e+00> : vector<4x32xf32>
    %157 = tpu.matmul %155, %156, %cst_67 {dimension_numbers = #tpu.dot_dimension_numbers<[1], [0], [0], [1], [0, 0, 1, 1], [], []>} : vector<4x16xf32>, vector<16x32xf32>, vector<4x32xf32> -> vector<4x32xf32>
    %158 = arith.addf %138, %157 : vector<4x32xf32>
    %159 = arith.addf %102, %158 : vector<4x32xf32>
    %c0_68 = arith.constant 0 : index
    %c0_69 = arith.constant 0 : index
    %160 = vector.load %arg16[%c0_68, %c0_69] : memref<1x32xf32, #tpu.memory_space<vmem>>, vector<1x32xf32>
    %161 = vector.broadcast %160 : vector<1x32xf32> to vector<4x32xf32>
    %162 = arith.addf %159, %161 : vector<4x32xf32>
    %c0_70 = arith.constant 0 : index
    %c0_71 = arith.constant 0 : index
    %163 = vector.load %arg17[%c0_70, %c0_71] : memref<1x32xf32, #tpu.memory_space<vmem>>, vector<1x32xf32>
    %c0_72 = arith.constant 0 : index
    %c0_73 = arith.constant 0 : index
    %164 = vector.load %arg18[%c0_72, %c0_73] : memref<1x32xf32, #tpu.memory_space<vmem>>, vector<1x32xf32>
    %cst_74 = arith.constant dense<0.000000e+00> : vector<4xf32>
    %165 = vector.multi_reduction <add>, %162, %cst_74 [1] : vector<4x32xf32> to vector<4xf32>
    %166 = vector.shape_cast %165 : vector<4xf32> to vector<4x1xf32>
    %cst_75 = arith.constant 3.200000e+01 : f32
    %167 = vector.broadcast %cst_75 : f32 to vector<4x1xf32>
    %168 = arith.divf %166, %167 : vector<4x1xf32>
    %169 = vector.broadcast %168 : vector<4x1xf32> to vector<4x32xf32>
    %170 = arith.subf %162, %169 : vector<4x32xf32>
    %171 = arith.mulf %170, %170 : vector<4x32xf32>
    %cst_76 = arith.constant dense<0.000000e+00> : vector<4xf32>
    %172 = vector.multi_reduction <add>, %171, %cst_76 [1] : vector<4x32xf32> to vector<4xf32>
    %173 = vector.shape_cast %172 : vector<4xf32> to vector<4x1xf32>
    %cst_77 = arith.constant 3.200000e+01 : f32
    %174 = vector.broadcast %cst_77 : f32 to vector<4x1xf32>
    %175 = arith.divf %173, %174 : vector<4x1xf32>
    %176 = vector.broadcast %168 : vector<4x1xf32> to vector<4x32xf32>
    %177 = arith.subf %162, %176 : vector<4x32xf32>
    %cst_78 = arith.constant 9.99999974E-6 : f32
    %178 = vector.broadcast %cst_78 : f32 to vector<4x1xf32>
    %179 = arith.addf %175, %178 : vector<4x1xf32>
    %180 = math.rsqrt %179 : vector<4x1xf32>
    %181 = vector.broadcast %180 : vector<4x1xf32> to vector<4x32xf32>
    %182 = arith.mulf %177, %181 : vector<4x32xf32>
    %183 = vector.broadcast %163 : vector<1x32xf32> to vector<4x32xf32>
    %184 = arith.mulf %182, %183 : vector<4x32xf32>
    %185 = vector.broadcast %164 : vector<1x32xf32> to vector<4x32xf32>
    %186 = arith.addf %184, %185 : vector<4x32xf32>
    %c0_79 = arith.constant 0 : index
    %c0_80 = arith.constant 0 : index
    %187 = vector.load %arg19[%c0_79, %c0_80] : memref<32x64xf32, #tpu.memory_space<vmem>>, vector<32x64xf32>
    %cst_81 = arith.constant dense<0.000000e+00> : vector<4x64xf32>
    %188 = tpu.matmul %186, %187, %cst_81 {dimension_numbers = #tpu.dot_dimension_numbers<[1], [0], [0], [1], [0, 0, 1, 1], [], []>} : vector<4x32xf32>, vector<32x64xf32>, vector<4x64xf32> -> vector<4x64xf32>
    %c0_82 = arith.constant 0 : index
    %c0_83 = arith.constant 0 : index
    %189 = vector.load %arg20[%c0_82, %c0_83] : memref<1x64xf32, #tpu.memory_space<vmem>>, vector<1x64xf32>
    %190 = vector.broadcast %189 : vector<1x64xf32> to vector<4x64xf32>
    %191 = arith.addf %188, %190 : vector<4x64xf32>
    %192 = arith.mulf %191, %191 : vector<4x64xf32>
    %193 = arith.mulf %191, %192 : vector<4x64xf32>
    %cst_84 = arith.constant 4.471500e-02 : f32
    %194 = vector.broadcast %cst_84 : f32 to vector<4x64xf32>
    %195 = arith.mulf %194, %193 : vector<4x64xf32>
    %196 = arith.addf %191, %195 : vector<4x64xf32>
    %cst_85 = arith.constant 0.797884583 : f32
    %197 = vector.broadcast %cst_85 : f32 to vector<4x64xf32>
    %198 = arith.mulf %197, %196 : vector<4x64xf32>
    %199 = math.tanh %198 : vector<4x64xf32>
    %cst_86 = arith.constant 1.000000e+00 : f32
    %200 = vector.broadcast %cst_86 : f32 to vector<4x64xf32>
    %201 = arith.addf %200, %199 : vector<4x64xf32>
    %cst_87 = arith.constant 5.000000e-01 : f32
    %202 = vector.broadcast %cst_87 : f32 to vector<4x64xf32>
    %203 = arith.mulf %202, %201 : vector<4x64xf32>
    %204 = arith.mulf %191, %203 : vector<4x64xf32>
    %c0_88 = arith.constant 0 : index
    %c0_89 = arith.constant 0 : index
    %205 = vector.load %arg21[%c0_88, %c0_89] : memref<64x32xf32, #tpu.memory_space<vmem>>, vector<64x32xf32>
    %cst_90 = arith.constant dense<0.000000e+00> : vector<4x32xf32>
    %206 = tpu.matmul %204, %205, %cst_90 {dimension_numbers = #tpu.dot_dimension_numbers<[1], [0], [0], [1], [0, 0, 1, 1], [], []>} : vector<4x64xf32>, vector<64x32xf32>, vector<4x32xf32> -> vector<4x32xf32>
    %c0_91 = arith.constant 0 : index
    %c0_92 = arith.constant 0 : index
    %207 = vector.load %arg22[%c0_91, %c0_92] : memref<1x32xf32, #tpu.memory_space<vmem>>, vector<1x32xf32>
    %208 = vector.broadcast %207 : vector<1x32xf32> to vector<4x32xf32>
    %209 = arith.addf %206, %208 : vector<4x32xf32>
    %210 = arith.addf %186, %209 : vector<4x32xf32>
    %c0_93 = arith.constant 0 : index
    %c0_94 = arith.constant 0 : index
    %211 = vector.load %arg23[%c0_93, %c0_94] : memref<1x32xf32, #tpu.memory_space<vmem>>, vector<1x32xf32>
    %c0_95 = arith.constant 0 : index
    %c0_96 = arith.constant 0 : index
    %212 = vector.load %arg24[%c0_95, %c0_96] : memref<1x32xf32, #tpu.memory_space<vmem>>, vector<1x32xf32>
    %cst_97 = arith.constant dense<0.000000e+00> : vector<4xf32>
    %213 = vector.multi_reduction <add>, %210, %cst_97 [1] : vector<4x32xf32> to vector<4xf32>
    %214 = vector.shape_cast %213 : vector<4xf32> to vector<4x1xf32>
    %cst_98 = arith.constant 3.200000e+01 : f32
    %215 = vector.broadcast %cst_98 : f32 to vector<4x1xf32>
    %216 = arith.divf %214, %215 : vector<4x1xf32>
    %217 = vector.broadcast %216 : vector<4x1xf32> to vector<4x32xf32>
    %218 = arith.subf %210, %217 : vector<4x32xf32>
    %219 = arith.mulf %218, %218 : vector<4x32xf32>
    %cst_99 = arith.constant dense<0.000000e+00> : vector<4xf32>
    %220 = vector.multi_reduction <add>, %219, %cst_99 [1] : vector<4x32xf32> to vector<4xf32>
    %221 = vector.shape_cast %220 : vector<4xf32> to vector<4x1xf32>
    %cst_100 = arith.constant 3.200000e+01 : f32
    %222 = vector.broadcast %cst_100 : f32 to vector<4x1xf32>
    %223 = arith.divf %221, %222 : vector<4x1xf32>
    %224 = vector.broadcast %216 : vector<4x1xf32> to vector<4x32xf32>
    %225 = arith.subf %210, %224 : vector<4x32xf32>
    %cst_101 = arith.constant 9.99999974E-6 : f32
    %226 = vector.broadcast %cst_101 : f32 to vector<4x1xf32>
    %227 = arith.addf %223, %226 : vector<4x1xf32>
    %228 = math.rsqrt %227 : vector<4x1xf32>
    %229 = vector.broadcast %228 : vector<4x1xf32> to vector<4x32xf32>
    %230 = arith.mulf %225, %229 : vector<4x32xf32>
    %231 = vector.broadcast %211 : vector<1x32xf32> to vector<4x32xf32>
    %232 = arith.mulf %230, %231 : vector<4x32xf32>
    %233 = vector.broadcast %212 : vector<1x32xf32> to vector<4x32xf32>
    %234 = arith.addf %232, %233 : vector<4x32xf32>
    %c0_102 = arith.constant 0 : index
    %c0_103 = arith.constant 0 : index
    %235 = vector.load %arg25[%c0_102, %c0_103] : memref<32x32xf32, #tpu.memory_space<vmem>>, vector<32x32xf32>
    %cst_104 = arith.constant dense<0.000000e+00> : vector<4x32xf32>
    %236 = tpu.matmul %234, %235, %cst_104 {dimension_numbers = #tpu.dot_dimension_numbers<[1], [0], [0], [1], [0, 0, 1, 1], [], []>} : vector<4x32xf32>, vector<32x32xf32>, vector<4x32xf32> -> vector<4x32xf32>
    %c0_105 = arith.constant 0 : index
    %c0_106 = arith.constant 0 : index
    %237 = vector.load %arg26[%c0_105, %c0_106] : memref<1x32xf32, #tpu.memory_space<vmem>>, vector<1x32xf32>
    %238 = vector.broadcast %237 : vector<1x32xf32> to vector<4x32xf32>
    %239 = arith.addf %236, %238 : vector<4x32xf32>
    %c0_107 = arith.constant 0 : index
    %c0_108 = arith.constant 0 : index
    %c0_109 = arith.constant 0 : index
    %240 = vector.load %arg27[%c0_107, %c0_108, %c0_109] : memref<1x4x32xf32, #tpu.memory_space<vmem>>, vector<1x4x32xf32>
    %241 = vector.shape_cast %240 : vector<1x4x32xf32> to vector<4x32xf32>
    %242 = vector.shape_cast %239 : vector<4x32xf32> to vector<1x4x32xf32>
    tpu.vector_store %arg27[%c0_107, %c0_108, %c0_109], %242 {strides = array<i32>} : memref<1x4x32xf32, #tpu.memory_space<vmem>>, vector<1x4x32xf32>,
    return
  }
  func.func @transform_0(%arg0: i32) -> (i32, i32, i32) {
    %c0_i32 = arith.constant 0 : i32
    %c0_i32_0 = arith.constant 0 : i32
    %c0_i32_1 = arith.constant 0 : i32
    return %arg0, %c0_i32, %c0_i32_0 : i32, i32, i32
  }
  func.func @transform_1(%arg0: i32) -> (i32, i32) {
    %c0_i32 = arith.constant 0 : i32
    %c0_i32_0 = arith.constant 0 : i32
    %c0_i32_1 = arith.constant 0 : i32
    return %c0_i32, %c0_i32_0 : i32, i32
  }
  func.func @transform_2(%arg0: i32) -> (i32, i32) {
    %c0_i32 = arith.constant 0 : i32
    %c0_i32_0 = arith.constant 0 : i32
    %c0_i32_1 = arith.constant 0 : i32
    return %c0_i32, %c0_i32_0 : i32, i32
  }
  func.func @transform_3(%arg0: i32) -> (i32, i32) {
    %c0_i32 = arith.constant 0 : i32
    %c0_i32_0 = arith.constant 0 : i32
    %c0_i32_1 = arith.constant 0 : i32
    return %c0_i32, %c0_i32_0 : i32, i32
  }
  func.func @transform_4(%arg0: i32) -> (i32, i32) {
    %c0_i32 = arith.constant 0 : i32
    %c0_i32_0 = arith.constant 0 : i32
    %c0_i32_1 = arith.constant 0 : i32
    return %c0_i32, %c0_i32_0 : i32, i32
  }
  func.func @transform_5(%arg0: i32) -> (i32, i32) {
    %c0_i32 = arith.constant 0 : i32
    %c0_i32_0 = arith.constant 0 : i32
    %c0_i32_1 = arith.constant 0 : i32
    return %c0_i32, %c0_i32_0 : i32, i32
  }
  func.func @transform_6(%arg0: i32) -> (i32, i32) {
    %c0_i32 = arith.constant 0 : i32
    %c0_i32_0 = arith.constant 0 : i32
    %c0_i32_1 = arith.constant 0 : i32
    return %c0_i32, %c0_i32_0 : i32, i32
  }
  func.func @transform_7(%arg0: i32) -> (i32, i32) {
    %c0_i32 = arith.constant 0 : i32
    %c0_i32_0 = arith.constant 0 : i32
    %c0_i32_1 = arith.constant 0 : i32
    return %c0_i32, %c0_i32_0 : i32, i32
  }
  func.func @transform_8(%arg0: i32) -> (i32, i32) {
    %c0_i32 = arith.constant 0 : i32
    %c0_i32_0 = arith.constant 0 : i32
    %c0_i32_1 = arith.constant 0 : i32
    return %c0_i32, %c0_i32_0 : i32, i32
  }
  func.func @transform_9(%arg0: i32) -> (i32, i32) {
    %c0_i32 = arith.constant 0 : i32
    %c0_i32_0 = arith.constant 0 : i32
    %c0_i32_1 = arith.constant 0 : i32
    return %c0_i32, %c0_i32_0 : i32, i32
  }
  func.func @transform_10(%arg0: i32) -> (i32, i32) {
    %c0_i32 = arith.constant 0 : i32
    %c0_i32_0 = arith.constant 0 : i32
    %c0_i32_1 = arith.constant 0 : i32
    return %c0_i32, %c0_i32_0 : i32, i32
  }
  func.func @transform_11(%arg0: i32) -> (i32, i32) {
    %c0_i32 = arith.constant 0 : i32
    %c0_i32_0 = arith.constant 0 : i32
    %c0_i32_1 = arith.constant 0 : i32
    return %c0_i32, %c0_i32_0 : i32, i32
  }
  func.func @transform_12(%arg0: i32) -> (i32, i32) {
    %c0_i32 = arith.constant 0 : i32
    %c0_i32_0 = arith.constant 0 : i32
    %c0_i32_1 = arith.constant 0 : i32
    return %c0_i32, %c0_i32_0 : i32, i32
  }
  func.func @transform_13(%arg0: i32) -> (i32, i32) {
    %c0_i32 = arith.constant 0 : i32
    %c0_i32_0 = arith.constant 0 : i32
    %c0_i32_1 = arith.constant 0 : i32
    return %c0_i32, %c0_i32_0 : i32, i32
  }
  func.func @transform_14(%arg0: i32) -> (i32, i32) {
    %c0_i32 = arith.constant 0 : i32
    %c0_i32_0 = arith.constant 0 : i32
    %c0_i32_1 = arith.constant 0 : i32
    return %c0_i32, %c0_i32_0 : i32, i32
  }
  func.func @transform_15(%arg0: i32) -> (i32, i32) {
    %c0_i32 = arith.constant 0 : i32
    %c0_i32_0 = arith.constant 0 : i32
    %c0_i32_1 = arith.constant 0 : i32
    return %c0_i32, %c0_i32_0 : i32, i32
  }
  func.func @transform_16(%arg0: i32) -> (i32, i32) {
    %c0_i32 = arith.constant 0 : i32
    %c0_i32_0 = arith.constant 0 : i32
    %c0_i32_1 = arith.constant 0 : i32
    return %c0_i32, %c0_i32_0 : i32, i32
  }
  func.func @transform_17(%arg0: i32) -> (i32, i32) {
    %c0_i32 = arith.constant 0 : i32
    %c0_i32_0 = arith.constant 0 : i32
    %c0_i32_1 = arith.constant 0 : i32
    return %c0_i32, %c0_i32_0 : i32, i32
  }
  func.func @transform_18(%arg0: i32) -> (i32, i32) {
    %c0_i32 = arith.constant 0 : i32
    %c0_i32_0 = arith.constant 0 : i32
    %c0_i32_1 = arith.constant 0 : i32
    return %c0_i32, %c0_i32_0 : i32, i32
  }
  func.func @transform_19(%arg0: i32) -> (i32, i32) {
    %c0_i32 = arith.constant 0 : i32
    %c0_i32_0 = arith.constant 0 : i32
    %c0_i32_1 = arith.constant 0 : i32
    return %c0_i32, %c0_i32_0 : i32, i32
  }
  func.func @transform_20(%arg0: i32) -> (i32, i32) {
    %c0_i32 = arith.constant 0 : i32
    %c0_i32_0 = arith.constant 0 : i32
    %c0_i32_1 = arith.constant 0 : i32
    return %c0_i32, %c0_i32_0 : i32, i32
  }
  func.func @transform_21(%arg0: i32) -> (i32, i32) {
    %c0_i32 = arith.constant 0 : i32
    %c0_i32_0 = arith.constant 0 : i32
    %c0_i32_1 = arith.constant 0 : i32
    return %c0_i32, %c0_i32_0 : i32, i32
  }
  func.func @transform_22(%arg0: i32) -> (i32, i32) {
    %c0_i32 = arith.constant 0 : i32
    %c0_i32_0 = arith.constant 0 : i32
    %c0_i32_1 = arith.constant 0 : i32
    return %c0_i32, %c0_i32_0 : i32, i32
  }
  func.func @transform_23(%arg0: i32) -> (i32, i32) {
    %c0_i32 = arith.constant 0 : i32
    %c0_i32_0 = arith.constant 0 : i32
    %c0_i32_1 = arith.constant 0 : i32
    return %c0_i32, %c0_i32_0 : i32, i32
  }
  func.func @transform_24(%arg0: i32) -> (i32, i32) {
    %c0_i32 = arith.constant 0 : i32
    %c0_i32_0 = arith.constant 0 : i32
    %c0_i32_1 = arith.constant 0 : i32
    return %c0_i32, %c0_i32_0 : i32, i32
  }
  func.func @transform_25(%arg0: i32) -> (i32, i32) {
    %c0_i32 = arith.constant 0 : i32
    %c0_i32_0 = arith.constant 0 : i32
    %c0_i32_1 = arith.constant 0 : i32
    return %c0_i32, %c0_i32_0 : i32, i32
  }
  func.func @transform_26(%arg0: i32) -> (i32, i32, i32) {
    %c0_i32 = arith.constant 0 : i32
    %c0_i32_0 = arith.constant 0 : i32
    %c0_i32_1 = arith.constant 0 : i32
    return %arg0, %c0_i32, %c0_i32_0 : i32, i32, i32
  }
}

module attributes {stable_mosaic.version = 11 : i64} {
  func.func @_llama_stack_kernel(%arg0: i32, %arg1: memref<32x32xf32, #tpu.memory_space<vmem>>, %arg2: memref<2x16x16xf32, #tpu.memory_space<vmem>>, %arg3: memref<32x32xf32, #tpu.memory_space<vmem>>, %arg4: memref<32x32xf32, #tpu.memory_space<vmem>>, %arg5: memref<32x32xf32, #tpu.memory_space<vmem>>, %arg6: memref<1x1x32xf32, #tpu.memory_space<vmem>>, %arg7: memref<1x1x32xf32, #tpu.memory_space<vmem>>, %arg8: memref<1x32x96xf32, #tpu.memory_space<vmem>>, %arg9: memref<1x32x32xf32, #tpu.memory_space<vmem>>, %arg10: memref<1x32x128xf32, #tpu.memory_space<vmem>>, %arg11: memref<1x64x32xf32, #tpu.memory_space<vmem>>, %arg12: memref<32x32xf32, #tpu.memory_space<vmem>>, %arg13: memref<32x32xf32, #tpu.memory_space<vmem>>) attributes {dimension_semantics = [#tpu.dimension_semantics<arbitrary>], iteration_bounds = array<i64: 2>, scalar_prefetch = 0 : i64, scratch_operands = 1 : i64, tpu.core_type = #tpu.core_type<tc>, window_params = [{pipeline_mode = #tpu.pipeline_mode<synchronous>, transform_indices = @transform_0, window_bounds = array<i64: 32, 32>}, {pipeline_mode = #tpu.pipeline_mode<synchronous>, transform_indices = @transform_1, window_bounds = array<i64: 2, 16, 16>}, {pipeline_mode = #tpu.pipeline_mode<synchronous>, transform_indices = @transform_2, window_bounds = array<i64: 32, 32>}, {pipeline_mode = #tpu.pipeline_mode<synchronous>, transform_indices = @transform_3, window_bounds = array<i64: 32, 32>}, {pipeline_mode = #tpu.pipeline_mode<synchronous>, transform_indices = @transform_4, window_bounds = array<i64: 32, 32>}, {transform_indices = @transform_5, window_bounds = array<i64: 1, 1, 32>}, {transform_indices = @transform_6, window_bounds = array<i64: 1, 1, 32>}, {transform_indices = @transform_7, window_bounds = array<i64: 1, 32, 96>}, {transform_indices = @transform_8, window_bounds = array<i64: 1, 32, 32>}, {transform_indices = @transform_9, window_bounds = array<i64: 1, 32, 128>}, {transform_indices = @transform_10, window_bounds = array<i64: 1, 64, 32>}, {pipeline_mode = #tpu.pipeline_mode<synchronous>, transform_indices = @transform_11, window_bounds = array<i64: 32, 32>}]} {
    %c0_i32 = arith.constant 0 : i32
    %0 = arith.cmpi eq, %arg0, %c0_i32 : i32
    %1 = arith.extui %0 : i1 to i32
    %c0_i32_0 = arith.constant 0 : i32
    %2 = arith.cmpi ne, %1, %c0_i32_0 : i32
    scf.if %2 {
      %c0_96 = arith.constant 0 : index
      %c0_97 = arith.constant 0 : index
      %245 = vector.load %arg1[%c0_96, %c0_97] : memref<32x32xf32, #tpu.memory_space<vmem>>, vector<32x32xf32>
      %c0_98 = arith.constant 0 : index
      %c0_99 = arith.constant 0 : index
      %246 = vector.load %arg13[%c0_98, %c0_99] : memref<32x32xf32, #tpu.memory_space<vmem>>, vector<32x32xf32>
      tpu.vector_store %arg13[%c0_98, %c0_99], %245 {strides = array<i32>} : memref<32x32xf32, #tpu.memory_space<vmem>>, vector<32x32xf32>,
    } else {
    }
    %c0 = arith.constant 0 : index
    %c0_1 = arith.constant 0 : index
    %3 = vector.load %arg13[%c0, %c0_1] : memref<32x32xf32, #tpu.memory_space<vmem>>, vector<32x32xf32>
    %c0_2 = arith.constant 0 : index
    %c0_3 = arith.constant 0 : index
    %4 = vector.load %arg3[%c0_2, %c0_3] : memref<32x32xf32, #tpu.memory_space<vmem>>, vector<32x32xf32>
    %c0_4 = arith.constant 0 : index
    %c0_5 = arith.constant 0 : index
    %5 = vector.load %arg4[%c0_4, %c0_5] : memref<32x32xf32, #tpu.memory_space<vmem>>, vector<32x32xf32>
    %c0_6 = arith.constant 0 : index
    %c0_7 = arith.constant 0 : index
    %6 = vector.load %arg5[%c0_6, %c0_7] : memref<32x32xf32, #tpu.memory_space<vmem>>, vector<32x32xf32>
    %c0_8 = arith.constant 0 : index
    %c0_9 = arith.constant 0 : index
    %c0_10 = arith.constant 0 : index
    %7 = vector.load %arg6[%c0_8, %c0_9, %c0_10] : memref<1x1x32xf32, #tpu.memory_space<vmem>>, vector<1x1x32xf32>
    %8 = vector.shape_cast %7 : vector<1x1x32xf32> to vector<1x32xf32>
    %9 = arith.mulf %3, %3 : vector<32x32xf32>
    %cst = arith.constant dense<0.000000e+00> : vector<32xf32>
    %10 = vector.multi_reduction <add>, %9, %cst [1] : vector<32x32xf32> to vector<32xf32>
    %11 = vector.shape_cast %10 : vector<32xf32> to vector<32x1xf32>
    %cst_11 = arith.constant 3.200000e+01 : f32
    %12 = vector.broadcast %cst_11 : f32 to vector<32x1xf32>
    %13 = arith.divf %11, %12 : vector<32x1xf32>
    %cst_12 = arith.constant 9.99999997E-7 : f32
    %14 = vector.broadcast %cst_12 : f32 to vector<32x1xf32>
    %15 = arith.addf %13, %14 : vector<32x1xf32>
    %16 = math.rsqrt %15 : vector<32x1xf32>
    %17 = vector.broadcast %16 : vector<32x1xf32> to vector<32x32xf32>
    %18 = arith.mulf %3, %17 : vector<32x32xf32>
    %19 = vector.broadcast %8 : vector<1x32xf32> to vector<32x32xf32>
    %20 = arith.mulf %18, %19 : vector<32x32xf32>
    %c0_13 = arith.constant 0 : index
    %c0_14 = arith.constant 0 : index
    %c0_15 = arith.constant 0 : index
    %21 = vector.load %arg8[%c0_13, %c0_14, %c0_15] : memref<1x32x96xf32, #tpu.memory_space<vmem>>, vector<1x32x96xf32>
    %22 = vector.shape_cast %21 : vector<1x32x96xf32> to vector<32x96xf32>
    %cst_16 = arith.constant dense<0.000000e+00> : vector<32x96xf32>
    %23 = tpu.matmul %20, %22, %cst_16 {dimension_numbers = #tpu.dot_dimension_numbers<[1], [0], [0], [1], [0, 0, 1, 1], [], []>} : vector<32x32xf32>, vector<32x96xf32>, vector<32x96xf32> -> vector<32x96xf32>
    %24 = vector.extract_strided_slice %23 {offsets = [0, 0], sizes = [32, 32], strides = [1, 1]} : vector<32x96xf32> to vector<32x32xf32>
    %25 = vector.extract_strided_slice %23 {offsets = [0, 32], sizes = [32, 32], strides = [1, 1]} : vector<32x96xf32> to vector<32x32xf32>
    %26 = vector.extract_strided_slice %23 {offsets = [0, 64], sizes = [32, 32], strides = [1, 1]} : vector<32x96xf32> to vector<32x32xf32>
    %27 = arith.mulf %24, %4 : vector<32x32xf32>
    %cst_17 = arith.constant dense<0.000000e+00> : vector<32x32xf32>
    %28 = tpu.matmul %24, %6, %cst_17 {dimension_numbers = #tpu.dot_dimension_numbers<[1], [0], [0], [1], [0, 0, 1, 1], [], []>} : vector<32x32xf32>, vector<32x32xf32>, vector<32x32xf32> -> vector<32x32xf32>
    %29 = arith.mulf %28, %5 : vector<32x32xf32>
    %30 = arith.addf %27, %29 : vector<32x32xf32>
    %31 = arith.mulf %25, %4 : vector<32x32xf32>
    %cst_18 = arith.constant dense<0.000000e+00> : vector<32x32xf32>
    %32 = tpu.matmul %25, %6, %cst_18 {dimension_numbers = #tpu.dot_dimension_numbers<[1], [0], [0], [1], [0, 0, 1, 1], [], []>} : vector<32x32xf32>, vector<32x32xf32>, vector<32x32xf32> -> vector<32x32xf32>
    %33 = arith.mulf %32, %5 : vector<32x32xf32>
    %34 = arith.addf %31, %33 : vector<32x32xf32>
    %c0_19 = arith.constant 0 : index
    %c0_20 = arith.constant 0 : index
    %c0_21 = arith.constant 0 : index
    %35 = vector.load %arg9[%c0_19, %c0_20, %c0_21] : memref<1x32x32xf32, #tpu.memory_space<vmem>>, vector<1x32x32xf32>
    %36 = vector.shape_cast %35 : vector<1x32x32xf32> to vector<32x32xf32>
    %c0_22 = arith.constant 0 : index
    %c0_23 = arith.constant 0 : index
    %c0_24 = arith.constant 0 : index
    %37 = vector.load %arg2[%c0_22, %c0_23, %c0_24] : memref<2x16x16xf32, #tpu.memory_space<vmem>>, vector<1x16x16xf32>
    %38 = vector.shape_cast %37 : vector<1x16x16xf32> to vector<16x16xf32>
    %cst_25 = arith.constant 0.000000e+00 : f32
    %39 = vector.broadcast %cst_25 : f32 to vector<16x32xf32>
    %40 = vector.extract_strided_slice %30 {offsets = [0, 0], sizes = [16, 8], strides = [1, 1]} : vector<32x32xf32> to vector<16x8xf32>
    %41 = vector.extract_strided_slice %34 {offsets = [0, 0], sizes = [16, 8], strides = [1, 1]} : vector<32x32xf32> to vector<16x8xf32>
    %42 = vector.extract_strided_slice %26 {offsets = [0, 0], sizes = [16, 8], strides = [1, 1]} : vector<32x32xf32> to vector<16x8xf32>
    %cst_26 = arith.constant dense<0.000000e+00> : vector<16x16xf32>
    %43 = tpu.matmul %40, %41, %cst_26 {dimension_numbers = #tpu.dot_dimension_numbers<[1], [1], [0], [0], [0, 0, 1, 0], [], []>} : vector<16x8xf32>, vector<16x8xf32>, vector<16x16xf32> -> vector<16x16xf32>
    %cst_27 = arith.constant 0.353553385 : f32
    %44 = vector.broadcast %cst_27 : f32 to vector<16x16xf32>
    %45 = arith.mulf %43, %44 : vector<16x16xf32>
    %46 = arith.addf %45, %38 : vector<16x16xf32>
    %cst_28 = arith.constant dense<0xFF800000> : vector<16xf32>
    %47 = vector.multi_reduction <maximumf>, %46, %cst_28 [1] : vector<16x16xf32> to vector<16xf32>
    %48 = vector.shape_cast %47 : vector<16xf32> to vector<16x1xf32>
    %49 = vector.broadcast %48 : vector<16x1xf32> to vector<16x16xf32>
    %50 = arith.subf %46, %49 : vector<16x16xf32>
    %51 = math.exp %50 : vector<16x16xf32>
    %cst_29 = arith.constant dense<0.000000e+00> : vector<16xf32>
    %52 = vector.multi_reduction <add>, %51, %cst_29 [1] : vector<16x16xf32> to vector<16xf32>
    %53 = vector.shape_cast %52 : vector<16xf32> to vector<16x1xf32>
    %54 = tpu.reciprocal %53 : vector<16x1xf32> -> vector<16x1xf32>
    %55 = vector.broadcast %54 : vector<16x1xf32> to vector<16x16xf32>
    %56 = arith.mulf %51, %55 : vector<16x16xf32>
    %cst_30 = arith.constant dense<0.000000e+00> : vector<16x8xf32>
    %57 = tpu.matmul %56, %42, %cst_30 {dimension_numbers = #tpu.dot_dimension_numbers<[1], [0], [0], [1], [0, 0, 1, 1], [], []>} : vector<16x16xf32>, vector<16x8xf32>, vector<16x8xf32> -> vector<16x8xf32>
    %58 = vector.extract_strided_slice %36 {offsets = [0, 0], sizes = [8, 32], strides = [1, 1]} : vector<32x32xf32> to vector<8x32xf32>
    %cst_31 = arith.constant dense<0.000000e+00> : vector<16x32xf32>
    %59 = tpu.matmul %57, %58, %cst_31 {dimension_numbers = #tpu.dot_dimension_numbers<[1], [0], [0], [1], [0, 0, 1, 1], [], []>} : vector<16x8xf32>, vector<8x32xf32>, vector<16x32xf32> -> vector<16x32xf32>
    %60 = arith.addf %39, %59 : vector<16x32xf32>
    %61 = vector.extract_strided_slice %30 {offsets = [0, 8], sizes = [16, 8], strides = [1, 1]} : vector<32x32xf32> to vector<16x8xf32>
    %62 = vector.extract_strided_slice %34 {offsets = [0, 8], sizes = [16, 8], strides = [1, 1]} : vector<32x32xf32> to vector<16x8xf32>
    %63 = vector.extract_strided_slice %26 {offsets = [0, 8], sizes = [16, 8], strides = [1, 1]} : vector<32x32xf32> to vector<16x8xf32>
    %cst_32 = arith.constant dense<0.000000e+00> : vector<16x16xf32>
    %64 = tpu.matmul %61, %62, %cst_32 {dimension_numbers = #tpu.dot_dimension_numbers<[1], [1], [0], [0], [0, 0, 1, 0], [], []>} : vector<16x8xf32>, vector<16x8xf32>, vector<16x16xf32> -> vector<16x16xf32>
    %cst_33 = arith.constant 0.353553385 : f32
    %65 = vector.broadcast %cst_33 : f32 to vector<16x16xf32>
    %66 = arith.mulf %64, %65 : vector<16x16xf32>
    %67 = arith.addf %66, %38 : vector<16x16xf32>
    %cst_34 = arith.constant dense<0xFF800000> : vector<16xf32>
    %68 = vector.multi_reduction <maximumf>, %67, %cst_34 [1] : vector<16x16xf32> to vector<16xf32>
    %69 = vector.shape_cast %68 : vector<16xf32> to vector<16x1xf32>
    %70 = vector.broadcast %69 : vector<16x1xf32> to vector<16x16xf32>
    %71 = arith.subf %67, %70 : vector<16x16xf32>
    %72 = math.exp %71 : vector<16x16xf32>
    %cst_35 = arith.constant dense<0.000000e+00> : vector<16xf32>
    %73 = vector.multi_reduction <add>, %72, %cst_35 [1] : vector<16x16xf32> to vector<16xf32>
    %74 = vector.shape_cast %73 : vector<16xf32> to vector<16x1xf32>
    %75 = tpu.reciprocal %74 : vector<16x1xf32> -> vector<16x1xf32>
    %76 = vector.broadcast %75 : vector<16x1xf32> to vector<16x16xf32>
    %77 = arith.mulf %72, %76 : vector<16x16xf32>
    %cst_36 = arith.constant dense<0.000000e+00> : vector<16x8xf32>
    %78 = tpu.matmul %77, %63, %cst_36 {dimension_numbers = #tpu.dot_dimension_numbers<[1], [0], [0], [1], [0, 0, 1, 1], [], []>} : vector<16x16xf32>, vector<16x8xf32>, vector<16x8xf32> -> vector<16x8xf32>
    %79 = vector.extract_strided_slice %36 {offsets = [8, 0], sizes = [8, 32], strides = [1, 1]} : vector<32x32xf32> to vector<8x32xf32>
    %cst_37 = arith.constant dense<0.000000e+00> : vector<16x32xf32>
    %80 = tpu.matmul %78, %79, %cst_37 {dimension_numbers = #tpu.dot_dimension_numbers<[1], [0], [0], [1], [0, 0, 1, 1], [], []>} : vector<16x8xf32>, vector<8x32xf32>, vector<16x32xf32> -> vector<16x32xf32>
    %81 = arith.addf %60, %80 : vector<16x32xf32>
    %82 = vector.extract_strided_slice %30 {offsets = [0, 16], sizes = [16, 8], strides = [1, 1]} : vector<32x32xf32> to vector<16x8xf32>
    %83 = vector.extract_strided_slice %34 {offsets = [0, 16], sizes = [16, 8], strides = [1, 1]} : vector<32x32xf32> to vector<16x8xf32>
    %84 = vector.extract_strided_slice %26 {offsets = [0, 16], sizes = [16, 8], strides = [1, 1]} : vector<32x32xf32> to vector<16x8xf32>
    %cst_38 = arith.constant dense<0.000000e+00> : vector<16x16xf32>
    %85 = tpu.matmul %82, %83, %cst_38 {dimension_numbers = #tpu.dot_dimension_numbers<[1], [1], [0], [0], [0, 0, 1, 0], [], []>} : vector<16x8xf32>, vector<16x8xf32>, vector<16x16xf32> -> vector<16x16xf32>
    %cst_39 = arith.constant 0.353553385 : f32
    %86 = vector.broadcast %cst_39 : f32 to vector<16x16xf32>
    %87 = arith.mulf %85, %86 : vector<16x16xf32>
    %88 = arith.addf %87, %38 : vector<16x16xf32>
    %cst_40 = arith.constant dense<0xFF800000> : vector<16xf32>
    %89 = vector.multi_reduction <maximumf>, %88, %cst_40 [1] : vector<16x16xf32> to vector<16xf32>
    %90 = vector.shape_cast %89 : vector<16xf32> to vector<16x1xf32>
    %91 = vector.broadcast %90 : vector<16x1xf32> to vector<16x16xf32>
    %92 = arith.subf %88, %91 : vector<16x16xf32>
    %93 = math.exp %92 : vector<16x16xf32>
    %cst_41 = arith.constant dense<0.000000e+00> : vector<16xf32>
    %94 = vector.multi_reduction <add>, %93, %cst_41 [1] : vector<16x16xf32> to vector<16xf32>
    %95 = vector.shape_cast %94 : vector<16xf32> to vector<16x1xf32>
    %96 = tpu.reciprocal %95 : vector<16x1xf32> -> vector<16x1xf32>
    %97 = vector.broadcast %96 : vector<16x1xf32> to vector<16x16xf32>
    %98 = arith.mulf %93, %97 : vector<16x16xf32>
    %cst_42 = arith.constant dense<0.000000e+00> : vector<16x8xf32>
    %99 = tpu.matmul %98, %84, %cst_42 {dimension_numbers = #tpu.dot_dimension_numbers<[1], [0], [0], [1], [0, 0, 1, 1], [], []>} : vector<16x16xf32>, vector<16x8xf32>, vector<16x8xf32> -> vector<16x8xf32>
    %100 = vector.extract_strided_slice %36 {offsets = [16, 0], sizes = [8, 32], strides = [1, 1]} : vector<32x32xf32> to vector<8x32xf32>
    %cst_43 = arith.constant dense<0.000000e+00> : vector<16x32xf32>
    %101 = tpu.matmul %99, %100, %cst_43 {dimension_numbers = #tpu.dot_dimension_numbers<[1], [0], [0], [1], [0, 0, 1, 1], [], []>} : vector<16x8xf32>, vector<8x32xf32>, vector<16x32xf32> -> vector<16x32xf32>
    %102 = arith.addf %81, %101 : vector<16x32xf32>
    %103 = vector.extract_strided_slice %30 {offsets = [0, 24], sizes = [16, 8], strides = [1, 1]} : vector<32x32xf32> to vector<16x8xf32>
    %104 = vector.extract_strided_slice %34 {offsets = [0, 24], sizes = [16, 8], strides = [1, 1]} : vector<32x32xf32> to vector<16x8xf32>
    %105 = vector.extract_strided_slice %26 {offsets = [0, 24], sizes = [16, 8], strides = [1, 1]} : vector<32x32xf32> to vector<16x8xf32>
    %cst_44 = arith.constant dense<0.000000e+00> : vector<16x16xf32>
    %106 = tpu.matmul %103, %104, %cst_44 {dimension_numbers = #tpu.dot_dimension_numbers<[1], [1], [0], [0], [0, 0, 1, 0], [], []>} : vector<16x8xf32>, vector<16x8xf32>, vector<16x16xf32> -> vector<16x16xf32>
    %cst_45 = arith.constant 0.353553385 : f32
    %107 = vector.broadcast %cst_45 : f32 to vector<16x16xf32>
    %108 = arith.mulf %106, %107 : vector<16x16xf32>
    %109 = arith.addf %108, %38 : vector<16x16xf32>
    %cst_46 = arith.constant dense<0xFF800000> : vector<16xf32>
    %110 = vector.multi_reduction <maximumf>, %109, %cst_46 [1] : vector<16x16xf32> to vector<16xf32>
    %111 = vector.shape_cast %110 : vector<16xf32> to vector<16x1xf32>
    %112 = vector.broadcast %111 : vector<16x1xf32> to vector<16x16xf32>
    %113 = arith.subf %109, %112 : vector<16x16xf32>
    %114 = math.exp %113 : vector<16x16xf32>
    %cst_47 = arith.constant dense<0.000000e+00> : vector<16xf32>
    %115 = vector.multi_reduction <add>, %114, %cst_47 [1] : vector<16x16xf32> to vector<16xf32>
    %116 = vector.shape_cast %115 : vector<16xf32> to vector<16x1xf32>
    %117 = tpu.reciprocal %116 : vector<16x1xf32> -> vector<16x1xf32>
    %118 = vector.broadcast %117 : vector<16x1xf32> to vector<16x16xf32>
    %119 = arith.mulf %114, %118 : vector<16x16xf32>
    %cst_48 = arith.constant dense<0.000000e+00> : vector<16x8xf32>
    %120 = tpu.matmul %119, %105, %cst_48 {dimension_numbers = #tpu.dot_dimension_numbers<[1], [0], [0], [1], [0, 0, 1, 1], [], []>} : vector<16x16xf32>, vector<16x8xf32>, vector<16x8xf32> -> vector<16x8xf32>
    %121 = vector.extract_strided_slice %36 {offsets = [24, 0], sizes = [8, 32], strides = [1, 1]} : vector<32x32xf32> to vector<8x32xf32>
    %cst_49 = arith.constant dense<0.000000e+00> : vector<16x32xf32>
    %122 = tpu.matmul %120, %121, %cst_49 {dimension_numbers = #tpu.dot_dimension_numbers<[1], [0], [0], [1], [0, 0, 1, 1], [], []>} : vector<16x8xf32>, vector<8x32xf32>, vector<16x32xf32> -> vector<16x32xf32>
    %123 = arith.addf %102, %122 : vector<16x32xf32>
    %c1 = arith.constant 1 : index
    %c0_50 = arith.constant 0 : index
    %c0_51 = arith.constant 0 : index
    %124 = vector.load %arg2[%c1, %c0_50, %c0_51] : memref<2x16x16xf32, #tpu.memory_space<vmem>>, vector<1x16x16xf32>
    %125 = vector.shape_cast %124 : vector<1x16x16xf32> to vector<16x16xf32>
    %cst_52 = arith.constant 0.000000e+00 : f32
    %126 = vector.broadcast %cst_52 : f32 to vector<16x32xf32>
    %127 = vector.extract_strided_slice %30 {offsets = [16, 0], sizes = [16, 8], strides = [1, 1]} : vector<32x32xf32> to vector<16x8xf32>
    %128 = vector.extract_strided_slice %34 {offsets = [16, 0], sizes = [16, 8], strides = [1, 1]} : vector<32x32xf32> to vector<16x8xf32>
    %129 = vector.extract_strided_slice %26 {offsets = [16, 0], sizes = [16, 8], strides = [1, 1]} : vector<32x32xf32> to vector<16x8xf32>
    %cst_53 = arith.constant dense<0.000000e+00> : vector<16x16xf32>
    %130 = tpu.matmul %127, %128, %cst_53 {dimension_numbers = #tpu.dot_dimension_numbers<[1], [1], [0], [0], [0, 0, 1, 0], [], []>} : vector<16x8xf32>, vector<16x8xf32>, vector<16x16xf32> -> vector<16x16xf32>
    %cst_54 = arith.constant 0.353553385 : f32
    %131 = vector.broadcast %cst_54 : f32 to vector<16x16xf32>
    %132 = arith.mulf %130, %131 : vector<16x16xf32>
    %133 = arith.addf %132, %125 : vector<16x16xf32>
    %cst_55 = arith.constant dense<0xFF800000> : vector<16xf32>
    %134 = vector.multi_reduction <maximumf>, %133, %cst_55 [1] : vector<16x16xf32> to vector<16xf32>
    %135 = vector.shape_cast %134 : vector<16xf32> to vector<16x1xf32>
    %136 = vector.broadcast %135 : vector<16x1xf32> to vector<16x16xf32>
    %137 = arith.subf %133, %136 : vector<16x16xf32>
    %138 = math.exp %137 : vector<16x16xf32>
    %cst_56 = arith.constant dense<0.000000e+00> : vector<16xf32>
    %139 = vector.multi_reduction <add>, %138, %cst_56 [1] : vector<16x16xf32> to vector<16xf32>
    %140 = vector.shape_cast %139 : vector<16xf32> to vector<16x1xf32>
    %141 = tpu.reciprocal %140 : vector<16x1xf32> -> vector<16x1xf32>
    %142 = vector.broadcast %141 : vector<16x1xf32> to vector<16x16xf32>
    %143 = arith.mulf %138, %142 : vector<16x16xf32>
    %cst_57 = arith.constant dense<0.000000e+00> : vector<16x8xf32>
    %144 = tpu.matmul %143, %129, %cst_57 {dimension_numbers = #tpu.dot_dimension_numbers<[1], [0], [0], [1], [0, 0, 1, 1], [], []>} : vector<16x16xf32>, vector<16x8xf32>, vector<16x8xf32> -> vector<16x8xf32>
    %145 = vector.extract_strided_slice %36 {offsets = [0, 0], sizes = [8, 32], strides = [1, 1]} : vector<32x32xf32> to vector<8x32xf32>
    %cst_58 = arith.constant dense<0.000000e+00> : vector<16x32xf32>
    %146 = tpu.matmul %144, %145, %cst_58 {dimension_numbers = #tpu.dot_dimension_numbers<[1], [0], [0], [1], [0, 0, 1, 1], [], []>} : vector<16x8xf32>, vector<8x32xf32>, vector<16x32xf32> -> vector<16x32xf32>
    %147 = arith.addf %126, %146 : vector<16x32xf32>
    %148 = vector.extract_strided_slice %30 {offsets = [16, 8], sizes = [16, 8], strides = [1, 1]} : vector<32x32xf32> to vector<16x8xf32>
    %149 = vector.extract_strided_slice %34 {offsets = [16, 8], sizes = [16, 8], strides = [1, 1]} : vector<32x32xf32> to vector<16x8xf32>
    %150 = vector.extract_strided_slice %26 {offsets = [16, 8], sizes = [16, 8], strides = [1, 1]} : vector<32x32xf32> to vector<16x8xf32>
    %cst_59 = arith.constant dense<0.000000e+00> : vector<16x16xf32>
    %151 = tpu.matmul %148, %149, %cst_59 {dimension_numbers = #tpu.dot_dimension_numbers<[1], [1], [0], [0], [0, 0, 1, 0], [], []>} : vector<16x8xf32>, vector<16x8xf32>, vector<16x16xf32> -> vector<16x16xf32>
    %cst_60 = arith.constant 0.353553385 : f32
    %152 = vector.broadcast %cst_60 : f32 to vector<16x16xf32>
    %153 = arith.mulf %151, %152 : vector<16x16xf32>
    %154 = arith.addf %153, %125 : vector<16x16xf32>
    %cst_61 = arith.constant dense<0xFF800000> : vector<16xf32>
    %155 = vector.multi_reduction <maximumf>, %154, %cst_61 [1] : vector<16x16xf32> to vector<16xf32>
    %156 = vector.shape_cast %155 : vector<16xf32> to vector<16x1xf32>
    %157 = vector.broadcast %156 : vector<16x1xf32> to vector<16x16xf32>
    %158 = arith.subf %154, %157 : vector<16x16xf32>
    %159 = math.exp %158 : vector<16x16xf32>
    %cst_62 = arith.constant dense<0.000000e+00> : vector<16xf32>
    %160 = vector.multi_reduction <add>, %159, %cst_62 [1] : vector<16x16xf32> to vector<16xf32>
    %161 = vector.shape_cast %160 : vector<16xf32> to vector<16x1xf32>
    %162 = tpu.reciprocal %161 : vector<16x1xf32> -> vector<16x1xf32>
    %163 = vector.broadcast %162 : vector<16x1xf32> to vector<16x16xf32>
    %164 = arith.mulf %159, %163 : vector<16x16xf32>
    %cst_63 = arith.constant dense<0.000000e+00> : vector<16x8xf32>
    %165 = tpu.matmul %164, %150, %cst_63 {dimension_numbers = #tpu.dot_dimension_numbers<[1], [0], [0], [1], [0, 0, 1, 1], [], []>} : vector<16x16xf32>, vector<16x8xf32>, vector<16x8xf32> -> vector<16x8xf32>
    %166 = vector.extract_strided_slice %36 {offsets = [8, 0], sizes = [8, 32], strides = [1, 1]} : vector<32x32xf32> to vector<8x32xf32>
    %cst_64 = arith.constant dense<0.000000e+00> : vector<16x32xf32>
    %167 = tpu.matmul %165, %166, %cst_64 {dimension_numbers = #tpu.dot_dimension_numbers<[1], [0], [0], [1], [0, 0, 1, 1], [], []>} : vector<16x8xf32>, vector<8x32xf32>, vector<16x32xf32> -> vector<16x32xf32>
    %168 = arith.addf %147, %167 : vector<16x32xf32>
    %169 = vector.extract_strided_slice %30 {offsets = [16, 16], sizes = [16, 8], strides = [1, 1]} : vector<32x32xf32> to vector<16x8xf32>
    %170 = vector.extract_strided_slice %34 {offsets = [16, 16], sizes = [16, 8], strides = [1, 1]} : vector<32x32xf32> to vector<16x8xf32>
    %171 = vector.extract_strided_slice %26 {offsets = [16, 16], sizes = [16, 8], strides = [1, 1]} : vector<32x32xf32> to vector<16x8xf32>
    %cst_65 = arith.constant dense<0.000000e+00> : vector<16x16xf32>
    %172 = tpu.matmul %169, %170, %cst_65 {dimension_numbers = #tpu.dot_dimension_numbers<[1], [1], [0], [0], [0, 0, 1, 0], [], []>} : vector<16x8xf32>, vector<16x8xf32>, vector<16x16xf32> -> vector<16x16xf32>
    %cst_66 = arith.constant 0.353553385 : f32
    %173 = vector.broadcast %cst_66 : f32 to vector<16x16xf32>
    %174 = arith.mulf %172, %173 : vector<16x16xf32>
    %175 = arith.addf %174, %125 : vector<16x16xf32>
    %cst_67 = arith.constant dense<0xFF800000> : vector<16xf32>
    %176 = vector.multi_reduction <maximumf>, %175, %cst_67 [1] : vector<16x16xf32> to vector<16xf32>
    %177 = vector.shape_cast %176 : vector<16xf32> to vector<16x1xf32>
    %178 = vector.broadcast %177 : vector<16x1xf32> to vector<16x16xf32>
    %179 = arith.subf %175, %178 : vector<16x16xf32>
    %180 = math.exp %179 : vector<16x16xf32>
    %cst_68 = arith.constant dense<0.000000e+00> : vector<16xf32>
    %181 = vector.multi_reduction <add>, %180, %cst_68 [1] : vector<16x16xf32> to vector<16xf32>
    %182 = vector.shape_cast %181 : vector<16xf32> to vector<16x1xf32>
    %183 = tpu.reciprocal %182 : vector<16x1xf32> -> vector<16x1xf32>
    %184 = vector.broadcast %183 : vector<16x1xf32> to vector<16x16xf32>
    %185 = arith.mulf %180, %184 : vector<16x16xf32>
    %cst_69 = arith.constant dense<0.000000e+00> : vector<16x8xf32>
    %186 = tpu.matmul %185, %171, %cst_69 {dimension_numbers = #tpu.dot_dimension_numbers<[1], [0], [0], [1], [0, 0, 1, 1], [], []>} : vector<16x16xf32>, vector<16x8xf32>, vector<16x8xf32> -> vector<16x8xf32>
    %187 = vector.extract_strided_slice %36 {offsets = [16, 0], sizes = [8, 32], strides = [1, 1]} : vector<32x32xf32> to vector<8x32xf32>
    %cst_70 = arith.constant dense<0.000000e+00> : vector<16x32xf32>
    %188 = tpu.matmul %186, %187, %cst_70 {dimension_numbers = #tpu.dot_dimension_numbers<[1], [0], [0], [1], [0, 0, 1, 1], [], []>} : vector<16x8xf32>, vector<8x32xf32>, vector<16x32xf32> -> vector<16x32xf32>
    %189 = arith.addf %168, %188 : vector<16x32xf32>
    %190 = vector.extract_strided_slice %30 {offsets = [16, 24], sizes = [16, 8], strides = [1, 1]} : vector<32x32xf32> to vector<16x8xf32>
    %191 = vector.extract_strided_slice %34 {offsets = [16, 24], sizes = [16, 8], strides = [1, 1]} : vector<32x32xf32> to vector<16x8xf32>
    %192 = vector.extract_strided_slice %26 {offsets = [16, 24], sizes = [16, 8], strides = [1, 1]} : vector<32x32xf32> to vector<16x8xf32>
    %cst_71 = arith.constant dense<0.000000e+00> : vector<16x16xf32>
    %193 = tpu.matmul %190, %191, %cst_71 {dimension_numbers = #tpu.dot_dimension_numbers<[1], [1], [0], [0], [0, 0, 1, 0], [], []>} : vector<16x8xf32>, vector<16x8xf32>, vector<16x16xf32> -> vector<16x16xf32>
    %cst_72 = arith.constant 0.353553385 : f32
    %194 = vector.broadcast %cst_72 : f32 to vector<16x16xf32>
    %195 = arith.mulf %193, %194 : vector<16x16xf32>
    %196 = arith.addf %195, %125 : vector<16x16xf32>
    %cst_73 = arith.constant dense<0xFF800000> : vector<16xf32>
    %197 = vector.multi_reduction <maximumf>, %196, %cst_73 [1] : vector<16x16xf32> to vector<16xf32>
    %198 = vector.shape_cast %197 : vector<16xf32> to vector<16x1xf32>
    %199 = vector.broadcast %198 : vector<16x1xf32> to vector<16x16xf32>
    %200 = arith.subf %196, %199 : vector<16x16xf32>
    %201 = math.exp %200 : vector<16x16xf32>
    %cst_74 = arith.constant dense<0.000000e+00> : vector<16xf32>
    %202 = vector.multi_reduction <add>, %201, %cst_74 [1] : vector<16x16xf32> to vector<16xf32>
    %203 = vector.shape_cast %202 : vector<16xf32> to vector<16x1xf32>
    %204 = tpu.reciprocal %203 : vector<16x1xf32> -> vector<16x1xf32>
    %205 = vector.broadcast %204 : vector<16x1xf32> to vector<16x16xf32>
    %206 = arith.mulf %201, %205 : vector<16x16xf32>
    %cst_75 = arith.constant dense<0.000000e+00> : vector<16x8xf32>
    %207 = tpu.matmul %206, %192, %cst_75 {dimension_numbers = #tpu.dot_dimension_numbers<[1], [0], [0], [1], [0, 0, 1, 1], [], []>} : vector<16x16xf32>, vector<16x8xf32>, vector<16x8xf32> -> vector<16x8xf32>
    %208 = vector.extract_strided_slice %36 {offsets = [24, 0], sizes = [8, 32], strides = [1, 1]} : vector<32x32xf32> to vector<8x32xf32>
    %cst_76 = arith.constant dense<0.000000e+00> : vector<16x32xf32>
    %209 = tpu.matmul %207, %208, %cst_76 {dimension_numbers = #tpu.dot_dimension_numbers<[1], [0], [0], [1], [0, 0, 1, 1], [], []>} : vector<16x8xf32>, vector<8x32xf32>, vector<16x32xf32> -> vector<16x32xf32>
    %210 = arith.addf %189, %209 : vector<16x32xf32>
    %211 = tpu.concatenate %123, %210 in 0 : vector<16x32xf32>, vector<16x32xf32> -> vector<32x32xf32>
    %212 = arith.addf %3, %211 : vector<32x32xf32>
    %c0_77 = arith.constant 0 : index
    %c0_78 = arith.constant 0 : index
    %c0_79 = arith.constant 0 : index
    %213 = vector.load %arg7[%c0_77, %c0_78, %c0_79] : memref<1x1x32xf32, #tpu.memory_space<vmem>>, vector<1x1x32xf32>
    %214 = vector.shape_cast %213 : vector<1x1x32xf32> to vector<1x32xf32>
    %215 = arith.mulf %212, %212 : vector<32x32xf32>
    %cst_80 = arith.constant dense<0.000000e+00> : vector<32xf32>
    %216 = vector.multi_reduction <add>, %215, %cst_80 [1] : vector<32x32xf32> to vector<32xf32>
    %217 = vector.shape_cast %216 : vector<32xf32> to vector<32x1xf32>
    %cst_81 = arith.constant 3.200000e+01 : f32
    %218 = vector.broadcast %cst_81 : f32 to vector<32x1xf32>
    %219 = arith.divf %217, %218 : vector<32x1xf32>
    %cst_82 = arith.constant 9.99999997E-7 : f32
    %220 = vector.broadcast %cst_82 : f32 to vector<32x1xf32>
    %221 = arith.addf %219, %220 : vector<32x1xf32>
    %222 = math.rsqrt %221 : vector<32x1xf32>
    %223 = vector.broadcast %222 : vector<32x1xf32> to vector<32x32xf32>
    %224 = arith.mulf %212, %223 : vector<32x32xf32>
    %225 = vector.broadcast %214 : vector<1x32xf32> to vector<32x32xf32>
    %226 = arith.mulf %224, %225 : vector<32x32xf32>
    %c0_83 = arith.constant 0 : index
    %c0_84 = arith.constant 0 : index
    %c0_85 = arith.constant 0 : index
    %227 = vector.load %arg10[%c0_83, %c0_84, %c0_85] : memref<1x32x128xf32, #tpu.memory_space<vmem>>, vector<1x32x128xf32>
    %228 = vector.shape_cast %227 : vector<1x32x128xf32> to vector<32x128xf32>
    %cst_86 = arith.constant dense<0.000000e+00> : vector<32x128xf32>
    %229 = tpu.matmul %226, %228, %cst_86 {dimension_numbers = #tpu.dot_dimension_numbers<[1], [0], [0], [1], [0, 0, 1, 1], [], []>} : vector<32x32xf32>, vector<32x128xf32>, vector<32x128xf32> -> vector<32x128xf32>
    %230 = vector.extract_strided_slice %229 {offsets = [0, 0], sizes = [32, 64], strides = [1, 1]} : vector<32x128xf32> to vector<32x64xf32>
    %231 = vector.extract_strided_slice %229 {offsets = [0, 64], sizes = [32, 64], strides = [1, 1]} : vector<32x128xf32> to vector<32x64xf32>
    %232 = arith.negf %230 : vector<32x64xf32>
    %233 = math.exp %232 : vector<32x64xf32>
    %cst_87 = arith.constant 1.000000e+00 : f32
    %234 = vector.broadcast %cst_87 : f32 to vector<32x64xf32>
    %235 = arith.addf %234, %233 : vector<32x64xf32>
    %236 = arith.divf %234, %235 : vector<32x64xf32>
    %237 = arith.mulf %230, %236 : vector<32x64xf32>
    %238 = arith.mulf %237, %231 : vector<32x64xf32>
    %c0_88 = arith.constant 0 : index
    %c0_89 = arith.constant 0 : index
    %c0_90 = arith.constant 0 : index
    %239 = vector.load %arg11[%c0_88, %c0_89, %c0_90] : memref<1x64x32xf32, #tpu.memory_space<vmem>>, vector<1x64x32xf32>
    %240 = vector.shape_cast %239 : vector<1x64x32xf32> to vector<64x32xf32>
    %cst_91 = arith.constant dense<0.000000e+00> : vector<32x32xf32>
    %241 = tpu.matmul %238, %240, %cst_91 {dimension_numbers = #tpu.dot_dimension_numbers<[1], [0], [0], [1], [0, 0, 1, 1], [], []>} : vector<32x64xf32>, vector<64x32xf32>, vector<32x32xf32> -> vector<32x32xf32>
    %242 = arith.addf %212, %241 : vector<32x32xf32>
    %c0_92 = arith.constant 0 : index
    %c0_93 = arith.constant 0 : index
    %243 = vector.load %arg13[%c0_92, %c0_93] : memref<32x32xf32, #tpu.memory_space<vmem>>, vector<32x32xf32>
    tpu.vector_store %arg13[%c0_92, %c0_93], %242 {strides = array<i32>} : memref<32x32xf32, #tpu.memory_space<vmem>>, vector<32x32xf32>,
    %c0_94 = arith.constant 0 : index
    %c0_95 = arith.constant 0 : index
    %244 = vector.load %arg12[%c0_94, %c0_95] : memref<32x32xf32, #tpu.memory_space<vmem>>, vector<32x32xf32>
    tpu.vector_store %arg12[%c0_94, %c0_95], %242 {strides = array<i32>} : memref<32x32xf32, #tpu.memory_space<vmem>>, vector<32x32xf32>,
    return
  }
  func.func @transform_0(%arg0: i32) -> (i32, i32) {
    %c0_i32 = arith.constant 0 : i32
    %c0_i32_0 = arith.constant 0 : i32
    %c0_i32_1 = arith.constant 0 : i32
    return %c0_i32, %c0_i32_0 : i32, i32
  }
  func.func @transform_1(%arg0: i32) -> (i32, i32, i32) {
    %c0_i32 = arith.constant 0 : i32
    %c0_i32_0 = arith.constant 0 : i32
    %c0_i32_1 = arith.constant 0 : i32
    %c0_i32_2 = arith.constant 0 : i32
    return %c0_i32, %c0_i32_0, %c0_i32_1 : i32, i32, i32
  }
  func.func @transform_2(%arg0: i32) -> (i32, i32) {
    %c0_i32 = arith.constant 0 : i32
    %c0_i32_0 = arith.constant 0 : i32
    %c0_i32_1 = arith.constant 0 : i32
    return %c0_i32, %c0_i32_0 : i32, i32
  }
  func.func @transform_3(%arg0: i32) -> (i32, i32) {
    %c0_i32 = arith.constant 0 : i32
    %c0_i32_0 = arith.constant 0 : i32
    %c0_i32_1 = arith.constant 0 : i32
    return %c0_i32, %c0_i32_0 : i32, i32
  }
  func.func @transform_4(%arg0: i32) -> (i32, i32) {
    %c0_i32 = arith.constant 0 : i32
    %c0_i32_0 = arith.constant 0 : i32
    %c0_i32_1 = arith.constant 0 : i32
    return %c0_i32, %c0_i32_0 : i32, i32
  }
  func.func @transform_5(%arg0: i32) -> (i32, i32, i32) {
    %c0_i32 = arith.constant 0 : i32
    %c0_i32_0 = arith.constant 0 : i32
    %c0_i32_1 = arith.constant 0 : i32
    return %arg0, %c0_i32, %c0_i32_0 : i32, i32, i32
  }
  func.func @transform_6(%arg0: i32) -> (i32, i32, i32) {
    %c0_i32 = arith.constant 0 : i32
    %c0_i32_0 = arith.constant 0 : i32
    %c0_i32_1 = arith.constant 0 : i32
    return %arg0, %c0_i32, %c0_i32_0 : i32, i32, i32
  }
  func.func @transform_7(%arg0: i32) -> (i32, i32, i32) {
    %c0_i32 = arith.constant 0 : i32
    %c0_i32_0 = arith.constant 0 : i32
    %c0_i32_1 = arith.constant 0 : i32
    return %arg0, %c0_i32, %c0_i32_0 : i32, i32, i32
  }
  func.func @transform_8(%arg0: i32) -> (i32, i32, i32) {
    %c0_i32 = arith.constant 0 : i32
    %c0_i32_0 = arith.constant 0 : i32
    %c0_i32_1 = arith.constant 0 : i32
    return %arg0, %c0_i32, %c0_i32_0 : i32, i32, i32
  }
  func.func @transform_9(%arg0: i32) -> (i32, i32, i32) {
    %c0_i32 = arith.constant 0 : i32
    %c0_i32_0 = arith.constant 0 : i32
    %c0_i32_1 = arith.constant 0 : i32
    return %arg0, %c0_i32, %c0_i32_0 : i32, i32, i32
  }
  func.func @transform_10(%arg0: i32) -> (i32, i32, i32) {
    %c0_i32 = arith.constant 0 : i32
    %c0_i32_0 = arith.constant 0 : i32
    %c0_i32_1 = arith.constant 0 : i32
    return %arg0, %c0_i32, %c0_i32_0 : i32, i32, i32
  }
  func.func @transform_11(%arg0: i32) -> (i32, i32) {
    %c0_i32 = arith.constant 0 : i32
    %c0_i32_0 = arith.constant 0 : i32
    %c0_i32_1 = arith.constant 0 : i32
    return %c0_i32, %c0_i32_0 : i32, i32
  }
}

module attributes {stable_mosaic.version = 11 : i64} {
  func.func @_lmhead_xent_kernel(%arg0: i32, %arg1: memref<32x32xf32, #tpu.memory_space<vmem>>, %arg2: memref<1x32xf32, #tpu.memory_space<vmem>>, %arg3: memref<32x64xf32, #tpu.memory_space<vmem>>, %arg4: memref<32x1xi32, #tpu.memory_space<vmem>>, %arg5: memref<1x1xf32, #tpu.memory_space<vmem>>) attributes {dimension_semantics = [#tpu.dimension_semantics<arbitrary>], iteration_bounds = array<i64: 1>, scalar_prefetch = 0 : i64, scratch_operands = 0 : i64, tpu.core_type = #tpu.core_type<tc>, window_params = [{pipeline_mode = #tpu.pipeline_mode<synchronous>, transform_indices = @transform_0, window_bounds = array<i64: 32, 32>}, {pipeline_mode = #tpu.pipeline_mode<synchronous>, transform_indices = @transform_1, window_bounds = array<i64: 1, 32>}, {pipeline_mode = #tpu.pipeline_mode<synchronous>, transform_indices = @transform_2, window_bounds = array<i64: 32, 64>}, {pipeline_mode = #tpu.pipeline_mode<synchronous>, transform_indices = @transform_3, window_bounds = array<i64: 32, 1>}, {pipeline_mode = #tpu.pipeline_mode<synchronous>, transform_indices = @transform_4, window_bounds = array<i64: 1, 1>}]} {
    %c0 = arith.constant 0 : index
    %c0_0 = arith.constant 0 : index
    %0 = vector.load %arg1[%c0, %c0_0] : memref<32x32xf32, #tpu.memory_space<vmem>>, vector<32x32xf32>
    %c0_1 = arith.constant 0 : index
    %c0_2 = arith.constant 0 : index
    %1 = vector.load %arg2[%c0_1, %c0_2] : memref<1x32xf32, #tpu.memory_space<vmem>>, vector<1x32xf32>
    %2 = arith.mulf %0, %0 : vector<32x32xf32>
    %cst = arith.constant dense<0.000000e+00> : vector<32xf32>
    %3 = vector.multi_reduction <add>, %2, %cst [1] : vector<32x32xf32> to vector<32xf32>
    %4 = vector.shape_cast %3 : vector<32xf32> to vector<32x1xf32>
    %cst_3 = arith.constant 3.200000e+01 : f32
    %5 = vector.broadcast %cst_3 : f32 to vector<32x1xf32>
    %6 = arith.divf %4, %5 : vector<32x1xf32>
    %cst_4 = arith.constant 9.99999997E-7 : f32
    %7 = vector.broadcast %cst_4 : f32 to vector<32x1xf32>
    %8 = arith.addf %6, %7 : vector<32x1xf32>
    %9 = math.rsqrt %8 : vector<32x1xf32>
    %10 = vector.broadcast %9 : vector<32x1xf32> to vector<32x32xf32>
    %11 = arith.mulf %0, %10 : vector<32x32xf32>
    %12 = vector.broadcast %1 : vector<1x32xf32> to vector<32x32xf32>
    %13 = arith.mulf %11, %12 : vector<32x32xf32>
    %c0_5 = arith.constant 0 : index
    %c0_6 = arith.constant 0 : index
    %14 = vector.load %arg3[%c0_5, %c0_6] : memref<32x64xf32, #tpu.memory_space<vmem>>, vector<32x64xf32>
    %cst_7 = arith.constant dense<0.000000e+00> : vector<32x64xf32>
    %15 = tpu.matmul %13, %14, %cst_7 {dimension_numbers = #tpu.dot_dimension_numbers<[1], [0], [0], [1], [0, 0, 1, 1], [], []>} : vector<32x32xf32>, vector<32x64xf32>, vector<32x64xf32> -> vector<32x64xf32>
    %c0_8 = arith.constant 0 : index
    %c0_9 = arith.constant 0 : index
    %16 = vector.load %arg4[%c0_8, %c0_9] : memref<32x1xi32, #tpu.memory_space<vmem>>, vector<32x1xi32>
    %cst_10 = arith.constant dense<0xFF800000> : vector<32xf32>
    %17 = vector.multi_reduction <maximumf>, %15, %cst_10 [1] : vector<32x64xf32> to vector<32xf32>
    %18 = vector.shape_cast %17 : vector<32xf32> to vector<32x1xf32>
    %19 = vector.broadcast %18 : vector<32x1xf32> to vector<32x64xf32>
    %20 = arith.subf %15, %19 : vector<32x64xf32>
    %21 = math.exp %20 : vector<32x64xf32>
    %cst_11 = arith.constant dense<0.000000e+00> : vector<32xf32>
    %22 = vector.multi_reduction <add>, %21, %cst_11 [1] : vector<32x64xf32> to vector<32xf32>
    %23 = vector.shape_cast %22 : vector<32xf32> to vector<32x1xf32>
    %24 = math.log %23 : vector<32x1xf32>
    %25 = arith.addf %24, %18 : vector<32x1xf32>
    %26 = tpu.iota {dimensions = array<i32: 1>} : vector<32x64xi32>
    %27 = vector.broadcast %16 : vector<32x1xi32> to vector<32x64xi32>
    %28 = arith.cmpi eq, %26, %27 : vector<32x64xi32>
    %29 = arith.extui %28 : vector<32x64xi1> to vector<32x64xi32>
    %30 = arith.sitofp %29 : vector<32x64xi32> to vector<32x64xf32>
    %31 = arith.mulf %15, %30 : vector<32x64xf32>
    %cst_12 = arith.constant dense<0.000000e+00> : vector<32xf32>
    %32 = vector.multi_reduction <add>, %31, %cst_12 [1] : vector<32x64xf32> to vector<32xf32>
    %33 = vector.shape_cast %32 : vector<32xf32> to vector<32x1xf32>
    %c0_i32 = arith.constant 0 : i32
    %34 = vector.broadcast %c0_i32 : i32 to vector<32x1xi32>
    %35 = arith.cmpi sge, %16, %34 : vector<32x1xi32>
    %36 = arith.extui %35 : vector<32x1xi1> to vector<32x1xi32>
    %37 = arith.sitofp %36 : vector<32x1xi32> to vector<32x1xf32>
    %38 = arith.subf %25, %33 : vector<32x1xf32>
    %39 = arith.mulf %38, %37 : vector<32x1xf32>
    %40 = vector.shape_cast %39 : vector<32x1xf32> to vector<1x32x1xf32>
    %cst_13 = arith.constant dense<0.000000e+00> : vector<1xf32>
    %41 = vector.multi_reduction <add>, %40, %cst_13 [1, 2] : vector<1x32x1xf32> to vector<1xf32>
    %42 = vector.shape_cast %41 : vector<1xf32> to vector<1x1x1xf32>
    %43 = vector.extract %42[0, 0, 0] : f32 from vector<1x1x1xf32>
    %44 = vector.broadcast %43 : f32 to vector<1x1xf32>
    %45 = vector.shape_cast %37 : vector<32x1xf32> to vector<1x32x1xf32>
    %cst_14 = arith.constant dense<0.000000e+00> : vector<1xf32>
    %46 = vector.multi_reduction <add>, %45, %cst_14 [1, 2] : vector<1x32x1xf32> to vector<1xf32>
    %47 = vector.shape_cast %46 : vector<1xf32> to vector<1x1x1xf32>
    %48 = vector.extract %47[0, 0, 0] : f32 from vector<1x1x1xf32>
    %49 = vector.broadcast %48 : f32 to vector<1x1xf32>
    %cst_15 = arith.constant 1.000000e+00 : f32
    %50 = vector.broadcast %cst_15 : f32 to vector<1x1xf32>
    %51 = arith.maximumf %49, %50 : vector<1x1xf32>
    %52 = arith.divf %44, %51 : vector<1x1xf32>
    %c0_16 = arith.constant 0 : index
    %c0_17 = arith.constant 0 : index
    %53 = vector.load %arg5[%c0_16, %c0_17] : memref<1x1xf32, #tpu.memory_space<vmem>>, vector<1x1xf32>
    tpu.vector_store %arg5[%c0_16, %c0_17], %52 {strides = array<i32>} : memref<1x1xf32, #tpu.memory_space<vmem>>, vector<1x1xf32>,
    return
  }
  func.func @transform_0(%arg0: i32) -> (i32, i32) {
    %c0_i32 = arith.constant 0 : i32
    %c0_i32_0 = arith.constant 0 : i32
    %c0_i32_1 = arith.constant 0 : i32
    return %c0_i32, %c0_i32_0 : i32, i32
  }
  func.func @transform_1(%arg0: i32) -> (i32, i32) {
    %c0_i32 = arith.constant 0 : i32
    %c0_i32_0 = arith.constant 0 : i32
    %c0_i32_1 = arith.constant 0 : i32
    return %c0_i32, %c0_i32_0 : i32, i32
  }
  func.func @transform_2(%arg0: i32) -> (i32, i32) {
    %c0_i32 = arith.constant 0 : i32
    %c0_i32_0 = arith.constant 0 : i32
    %c0_i32_1 = arith.constant 0 : i32
    return %c0_i32, %c0_i32_0 : i32, i32
  }
  func.func @transform_3(%arg0: i32) -> (i32, i32) {
    %c0_i32 = arith.constant 0 : i32
    %c0_i32_0 = arith.constant 0 : i32
    %c0_i32_1 = arith.constant 0 : i32
    return %c0_i32, %c0_i32_0 : i32, i32
  }
  func.func @transform_4(%arg0: i32) -> (i32, i32) {
    %c0_i32 = arith.constant 0 : i32
    %c0_i32_0 = arith.constant 0 : i32
    %c0_i32_1 = arith.constant 0 : i32
    return %c0_i32, %c0_i32_0 : i32, i32
  }
}

</mosaic_0001>

<bundles_post_ra>
// kernel: mim_forward.7
= control target key start
LH: loop header
LB: loop body
LE: loop exit
PB: predicated region body
PF: predicated region fallthrough
CT: control target
= control target key end

     0   :  { %vm27_vm0 = vcmask 261120   ;;  %s581_s0 = inlined_call_operand.vmem [shape: f32[32,32], index: 0, kind: input, shape index: {}]   ;;  %s582_s1 = inlined_call_operand.vmem [shape: f32[1,32], index: 1, kind: input, shape index: {}]   ;;  %s583_s2 = inlined_call_operand.vmem [shape: f32[32,64], index: 2, kind: input, shape index: {}]   ;;  %s584_s3 = inlined_call_operand.vmem [shape: s32[32,1], index: 3, kind: input, shape index: {}]   ;;  %s585_s4 = inlined_call_operand.hbm [shape: f32[1,1], index: 4, kind: output, shape index: {}]  }
   0x1   :  { %v457_v0 = vld [vmem:[%s581_s0 + $0x10] sm:$0xff]  ;;  %v462_v1 = vld [vmem:[%s581_s0] sm:$0xff] }
   0x2   :  { %v25_v2 = vmul.f32 %v457_v0, %v457_v0  ;;  %v23_v3 = vmul.f32 %v462_v1, %v462_v1 }
   0x3   :  { %9 = vsyncpa [#allocation3], 0  ;;  %v471_v4 = vld [vmem:[%s581_s0 + $0x18] sm:$0xff]  ;;  %v476_v5 = vld [vmem:[%s581_s0 + $0x8] sm:$0xff]  ;;  %v425_v12 = vmov 32.0   ;;  %v426_v30 = vmov 0  }
   0x4   :  { %v34_v6 = vsel %vm27_vm0, %v25_v2, 0.0  ;;  %v28_v7 = vsel %vm27_vm0, %v23_v3, 0.0  ;;  %v26_v8 = vmul.f32 %v471_v4, %v471_v4  ;;  %v24_v9 = vmul.f32 %v476_v5, %v476_v5  ;;  %v109_v16 = vld [vmem:[%s583_s2 + $0x18] sm:$0xff]  ;;  %v108_v18 = vld [vmem:[%s583_s2 + $0x10] sm:$0xff]  ;;  %v107_v19 = vld [vmem:[%s583_s2 + $0x8] sm:$0xff]  ;;  %367 = vset.pattern.permute.xlu2 %v426_v30  ;;  %368 = vset.pattern.permute.xlu0 %v426_v30  ;;  %s428_s13 = smov [#allocation2]  }
   0x5   :  { %35 = vadd.xlane.f32.xlu0 %v34_v6  ;;  %29 = vadd.xlane.f32.xlu1 %v28_v7  ;;  %371 = vrcp.f32 %v425_v12  ;;  %v106_v21 = vld [vmem:[%s583_s2] sm:$0xff]  ;;  %vm155_vm14 = vcmask 523264   ;;  %s324_s14 = sshll.u32 %s428_s13, 4  ;;  %s326_s17 = sshll.u32 %s585_s4, 4  ;;  %s325_s14 = int_to_ptr.vmem [resolvable:$true] %s324_s14  ;;  %s327_s17 = int_to_ptr.hbm [resolvable:$true] %s326_s17 }
   0x6   :  { %v37_v10 = vsel %vm27_vm0, %v26_v8, 0.0  ;;  %v31_v11 = vsel %vm27_vm0, %v24_v9, 0.0  ;;  %134 = vmatpush.msra.mxu0 %v109_v16  ;;  %348 = vmatpush.msra.mxu2 %v109_v16  ;;  %v501_v29 = vld [vmem:[%s584_s3] sm:$0xff] }
   0x7   :  { %347 = vmatpush.msra.mxu1 %v109_v16  ;;  %349 = vmatpush.msra.mxu3 %v109_v16  ;;  %v370_v53 = vld [vmem:[%s582_s1] ss:$0 sm:$0xff] }
   0x8   :  { %135 = vmatpush.msra.mxu0 %v108_v18  ;;  %351 = vmatpush.msra.mxu2 %v108_v18 }
   0x9   :  { %350 = vmatpush.msra.mxu1 %v108_v18  ;;  %352 = vmatpush.msra.mxu3 %v108_v18  ;;  %v525_v18 = vld [vmem:[%s584_s3 + $0x8] sm:$0xff] }
   0xa   :  { %136 = vmatpush.msra.mxu0 %v107_v19  ;;  %354 = vmatpush.msra.mxu2 %v107_v19 }
   0xb   :  { %v372_v13 = vpop.eup %371  ;;  %353 = vmatpush.msra.mxu1 %v107_v19  ;;  %355 = vmatpush.msra.mxu3 %v107_v19  ;;  %v531_v19 = vld [vmem:[%s584_s3 + $0x18] sm:$0xff] }
   0xc   :  { %v41_v14 = vmul.f32 32.0, %v372_v13  ;;  %vm45_vm1 = vweird.f32 %v372_v13  ;;  %137 = vmatpush.msra.mxu0 %v106_v21  ;;  %357 = vmatpush.msra.mxu2 %v106_v21 }
   0xd   :  { %38 = vadd.xlane.f32.xlu0 %v37_v10  ;;  %32 = vadd.xlane.f32.xlu1 %v31_v11 }
   0xe   :  { %v42_v15 = vsub.f32 1.0, %v41_v14  ;;  %356 = vmatpush.msra.mxu1 %v106_v21  ;;  %358 = vmatpush.msra.mxu3 %v106_v21 }
   0xf   :  { %207 = vperm.xlu2 %367, %v501_v29   ;;  %369 = vset.pattern.permute.xlu1 %v426_v30 }
  0x10   :  { %v43_v17 = vmul.f32 %v372_v13, %v42_v15 }
  0x12   :  { %v44_v20 = vadd.f32 %v372_v13, %v43_v17 }
  0x14   :  { %v46_v22 = vsel %vm45_vm1, %v372_v13, %v44_v20  ;;  %v537_v20 = vld [vmem:[%s584_s3 + $0x10] sm:$0xff] }
  0x69   :  { %v208_v21 = vpop.permute.xlu2 %207 }
  0x78   :  { %v36_v23 = vpop.xlane.xlu0 %35  ;;  %v30_v24 = vpop.xlane.xlu1 %29 }
  0x79   :  { %v49_v25 = vmul.f32 %v46_v22, %v36_v23  ;;  %v47_v26 = vmul.f32 %v46_v22, %v30_v24 }
  0x7b   :  { %v53_v27 = vadd.f32 1e-06, %v49_v25  ;;  %v51_v28 = vadd.f32 1e-06, %v47_v26 }
  0x7d   :  { %373 = vrsqrt.f32 %v53_v27  ;;  %vm61_vm3 = vweird.f32 %v51_v28  ;;  %vm81_vm5 = vweird.f32 %v53_v27 }
  0x7e   :  { %375 = vrsqrt.f32 %v51_v28 }
  0x80   :  { %v39_v31 = vpop.xlane.xlu0 %38  ;;  %v33_v32 = vpop.xlane.xlu1 %32 }
  0x81   :  { %v50_v33 = vmul.f32 %v46_v22, %v39_v31  ;;  %v48_v34 = vmul.f32 %v46_v22, %v33_v32  ;;  %v204_v31 = vlaneseq }
  0x83   :  { %v374_v35 = vpop.eup %373  ;;  %v54_v36 = vadd.f32 1e-06, %v50_v33  ;;  %v52_v37 = vadd.f32 1e-06, %v48_v34 }
  0x84   :  { %v376_v38 = vpop.eup %375  ;;  %v76_v39 = vmul.f32 %v374_v35, %v53_v27  ;;  %vm82_vm2 = vweird.f32 %v374_v35 }
  0x85   :  { %v56_v40 = vmul.f32 %v376_v38, %v51_v28  ;;  %377 = vrsqrt.f32 %v54_v36  ;;  %vm62_vm4 = vweird.f32 %v376_v38  ;;  %vm83_vm6 = vmor %vm81_vm5, %vm82_vm2  ;;  %vm71_vm9 = vweird.f32 %v52_v37 }
  0x86   :  { %v77_v41 = vmul.f32 %v374_v35, %v76_v39  ;;  %379 = vrsqrt.f32 %v52_v37  ;;  %vm63_vm7 = vmor %vm61_vm3, %vm62_vm4  ;;  %vm91_vm11 = vweird.f32 %v54_v36  ;;  %vm246_vm3 = vcmp.ge.s32.totalorder %v501_v29, 0 }
  0x87   :  { %v57_v42 = vmul.f32 %v376_v38, %v56_v40  ;;  %vm247_vm4 = vcmp.ge.s32.totalorder %v525_v18, 0  ;;  %vm266_vm5 = vcmask 7168  }
  0x88   :  { %v78_v43 = vmul.f32 0.5, %v77_v41 }
  0x89   :  { %v58_v44 = vmul.f32 0.5, %v57_v42 }
  0x8a   :  { %v79_v45 = vsub.f32 1.5, %v78_v43  ;;  %v427_v43 = vmov 0.0  }
  0x8b   :  { %v378_v46 = vpop.eup %377  ;;  %v59_v47 = vsub.f32 1.5, %v58_v44 }
  0x8c   :  { %v380_v48 = vpop.eup %379  ;;  %v80_v49 = vmul.f32 %v374_v35, %v79_v45  ;;  %v86_v50 = vmul.f32 %v378_v46, %v54_v36  ;;  %vm92_vm8 = vweird.f32 %v378_v46  ;;  %v205_v36 = vand.u32 127, %v204_v31 }
  0x8d   :  { %v60_v51 = vmul.f32 %v376_v38, %v59_v47  ;;  %v66_v52 = vmul.f32 %v380_v48, %v52_v37  ;;  %vm72_vm10 = vweird.f32 %v380_v48  ;;  %vm93_vm12 = vmor %vm91_vm11, %vm92_vm8 }
  0x8e   :  { %v87_v54 = vmul.f32 %v378_v46, %v86_v50  ;;  %v84_v55 = vsel %vm83_vm6, %v374_v35, %v80_v49  ;;  %vm73_vm13 = vmor %vm71_vm9, %vm72_vm10  ;;  %vm218_vm15 = vcmp.eq.s32.totalorder %v205_v36, %v208_v21  ;;  %vm249_vm6 = vcmp.ge.s32.totalorder %v531_v19, 0 }
  0x8f   :  { %v67_v56 = vmul.f32 %v380_v48, %v66_v52  ;;  %v64_v57 = vsel %vm63_vm7, %v376_v38, %v60_v51  ;;  %v97_v58 = vmul.f32 %v84_v55, %v457_v0  ;;  %v339_v44 = vsel %vm218_vm15, 1.0, %v427_v43 }
  0x90   :  { %v88_v59 = vmul.f32 0.5, %v87_v54  ;;  %v95_v60 = vmul.f32 %v64_v57, %v462_v1  ;;  %vm248_vm7 = vcmp.ge.s32.totalorder %v537_v20, 0 }
  0x91   :  { %v68_v61 = vmul.f32 0.5, %v67_v56  ;;  %v104_v62 = vmul.f32 %v370_v53, %v97_v58 }
  0x92   :  { %v89_v63 = vsub.f32 1.5, %v88_v59  ;;  %v102_v2 = vmul.f32 %v370_v53, %v95_v60 }
  0x93   :  { %v69_v3 = vsub.f32 1.5, %v68_v61  ;;  %337 = vmatmul.msk.f32.vlgmr.msra.gmra.mxu2 %vm27_vm0, %v104_v62  ;;  %v343_v61 = vsel %vm246_vm3, 1.0, %v427_v43  ;;  %v344_v62 = vsel %vm247_vm4, 1.0, %v427_v43 }
  0x94   :  { %v90_v6 = vmul.f32 %v378_v46, %v89_v63  ;;  %335 = vmatmul.msk.f32.vlgmr.msra.gmra.mxu0 %vm27_vm0, %v102_v2  ;;  %v284_v63 = vsel %vm266_vm5, %v343_v61, 0.0  ;;  %v285_v2 = vsel %vm266_vm5, %v344_v62, 0.0 }
  0x95   :  { %v70_v7 = vmul.f32 %v380_v48, %v69_v3  ;;  %v346_v3 = vsel %vm249_vm6, 1.0, %v427_v43 }
  0x96   :  { %v94_v0 = vsel %vm93_vm12, %v378_v46, %v90_v6  ;;  %v345_v6 = vsel %vm248_vm7, 1.0, %v427_v43  ;;  %vm317_vm12 = vcmask 0  }
  0x97   :  { %v74_v8 = vsel %vm73_vm13, %v380_v48, %v70_v7  ;;  %v98_v1 = vmul.f32 %v94_v0, %v471_v4  ;;  %v286_v7 = vadd.f32 %v285_v2, %v284_v63  ;;  %v287_v0 = vsel %vm266_vm5, %v345_v6, 0.0 }
  0x98   :  { %v96_v9 = vmul.f32 %v74_v8, %v476_v5 }
  0x99   :  { %v105_v10 = vmul.f32 %v370_v53, %v98_v1  ;;  %v288_v8 = vadd.f32 %v287_v0, %v286_v7  ;;  %v289_v1 = vsel %vm266_vm5, %v346_v3, 0.0 }
  0x9a   :  { %v103_v11 = vmul.f32 %v370_v53, %v96_v9 }
  0x9b   :  { %338 = vmatmul.msk.f32.vlgmr.msra.gmra.mxu3 %vm27_vm0, %v105_v10  ;;  %v290_v9 = vadd.f32 %v289_v1, %v288_v8 }
  0x9c   :  { %336 = vmatmul.msk.f32.vlgmr.msra.gmra.mxu1 %vm27_vm0, %v103_v11 }
 0x111   :  { %v139_v12 = vpop.f32.mrf.mxu0 }
 0x112   :  { %v156_v13 = vsel %vm155_vm14, %v139_v12, -inf  ;;  %v230_v46 = vmul.f32 %v339_v44, %v139_v12 }
 0x113   :  { %157 = vmax.xlane.f32.xlu2 %v156_v13 }
 0x114   :  { %v234_v51 = vsel %vm155_vm14, %v230_v46, 0.0 }
 0x116   :  { %v516_v14 = vpop.f32.mrf.mxu2 }
 0x117   :  { %v162_v15 = vsel %vm155_vm14, %v516_v14, -inf }
 0x118   :  { %163 = vmax.xlane.f32.xlu0 %v162_v15 }
 0x119   :  { %v142_v4 = vpop.f32.mrf.mxu1 }
 0x11a   :  { %v159_v5 = vsel %vm155_vm14, %v142_v4, -inf }
 0x11b   :  { %160 = vmax.xlane.f32.xlu2 %v159_v5 }
 0x11e   :  { %v148_v16 = vpop.f32.mrf.mxu3 }
 0x11f   :  { %v165_v17 = vsel %vm155_vm14, %v148_v16, -inf }
 0x120   :  { %166 = vmax.xlane.f32.xlu1 %v165_v17 }
 0x12c   :  { %210 = vperm.xlu0 %368, %v525_v18  }
 0x133   :  { %216 = vperm.xlu2 %367, %v531_v19  }
 0x139   :  { %213 = vperm.xlu1 %369, %v537_v20  }
 0x186   :  { %v540_v22 = vpop.xlane.xlu2 %157 }
 0x187   :  { %v168_v23 = vsub.f32 %v139_v12, %v540_v22 }
 0x189   :  { %v172_v24 = vmul.f32 1.442695, %v168_v23 }
 0x18b   :  { %381 = vpow2.f32 %v172_v24  ;;  %v543_v25 = vpop.xlane.xlu0 %163 }
 0x18c   :  { %v170_v26 = vsub.f32 %v516_v14, %v543_v25 }
 0x18e   :  { %v176_v27 = vmul.f32 1.442695, %v170_v26  ;;  %v547_v28 = vpop.xlane.xlu2 %160 }
 0x18f   :  { %v169_v30 = vsub.f32 %v142_v4, %v547_v28 }
 0x190   :  { %383 = vpow2.f32 %v176_v27 }
 0x191   :  { %v382_v32 = vpop.eup %381  ;;  %v174_v33 = vmul.f32 1.442695, %v169_v30 }
 0x192   :  { %v180_v34 = vsel %vm155_vm14, %v382_v32, 0.0 }
 0x193   :  { %385 = vpow2.f32 %v174_v33  ;;  %181 = vadd.xlane.f32.xlu2 %v180_v34  ;;  %v551_v35 = vpop.xlane.xlu1 %166 }
 0x194   :  { %v171_v37 = vsub.f32 %v148_v16, %v551_v35 }
 0x196   :  { %v384_v38 = vpop.eup %383  ;;  %v178_v39 = vmul.f32 1.442695, %v171_v37  ;;  %v217_v50 = vpop.permute.xlu2 %216 }
 0x197   :  { %v186_v40 = vsel %vm155_vm14, %v384_v38, 0.0  ;;  %vm221_vm1 = vcmp.eq.s32.totalorder %v205_v36, %v217_v50 }
 0x198   :  { %387 = vpow2.f32 %v178_v39  ;;  %187 = vadd.xlane.f32.xlu0 %v186_v40  ;;  %v342_v54 = vsel %vm221_vm1, 1.0, %v427_v43 }
 0x199   :  { %v386_v41 = vpop.eup %385  ;;  %v233_v56 = vmul.f32 %v342_v54, %v148_v16 }
 0x19a   :  { %v183_v42 = vsel %vm155_vm14, %v386_v41, 0.0 }
 0x19b   :  { %184 = vadd.xlane.f32.xlu1 %v183_v42  ;;  %v243_v59 = vsel %vm155_vm14, %v233_v56, 0.0 }
 0x19e   :  { %v388_v45 = vpop.eup %387  ;;  %v211_v47 = vpop.permute.xlu0 %210 }
 0x19f   :  { %vm219_vm0 = vcmp.eq.s32.totalorder %v205_v36, %v211_v47  ;;  %v189_v48 = vsel %vm155_vm14, %v388_v45, 0.0 }
 0x1a0   :  { %v340_v49 = vsel %vm219_vm0, 1.0, %v427_v43  ;;  %190 = vadd.xlane.f32.xlu2 %v189_v48 }
 0x1a1   :  { %v231_v52 = vmul.f32 %v340_v49, %v142_v4 }
 0x1a3   :  { %235 = vadd.xlane.f32.xlu1 %v234_v51  ;;  %v237_v53 = vsel %vm155_vm14, %v231_v52, 0.0 }
 0x1a8   :  { %238 = vadd.xlane.f32.xlu2 %v237_v53 }
 0x1ab   :  { %v214_v55 = vpop.permute.xlu1 %213 }
 0x1ac   :  { %vm220_vm2 = vcmp.eq.s32.totalorder %v205_v36, %v214_v55 }
 0x1ad   :  { %v341_v57 = vsel %vm220_vm2, 1.0, %v427_v43 }
 0x1ae   :  { %v232_v58 = vmul.f32 %v341_v57, %v516_v14 }
 0x1b0   :  { %244 = vadd.xlane.f32.xlu2 %v243_v59  ;;  %v240_v60 = vsel %vm155_vm14, %v232_v58, 0.0 }
 0x1b1   :  { %241 = vadd.xlane.f32.xlu1 %v240_v60 }
 0x1b9   :  { %291 = vadd.xlane.f32.xlu1 %v290_v9 }
 0x206   :  { %v182_v29 = vpop.xlane.xlu2 %181 }
 0x207   :  { %389 = vlog2.f32 %v182_v29 }
 0x20b   :  { %v188_v13 = vpop.xlane.xlu0 %187 }
 0x20d   :  { %v390_v11 = vpop.eup %389 }
 0x20e   :  { %v185_v10 = vpop.xlane.xlu1 %184  ;;  %v193_v12 = vmul.f32 0.6931472, %v390_v11 }
 0x20f   :  { %391 = vlog2.f32 %v185_v10 }
 0x210   :  { %v200_v5 = vadd.f32 %v193_v12, %v540_v22 }
 0x213   :  { %v191_v14 = vpop.xlane.xlu2 %190 }
 0x214   :  { %393 = vlog2.f32 %v191_v14 }
 0x215   :  { %v392_v15 = vpop.eup %391  ;;  %395 = vlog2.f32 %v188_v13 }
 0x216   :  { %v195_v4 = vmul.f32 0.6931472, %v392_v15  ;;  %v236_v16 = vpop.xlane.xlu1 %235 }
 0x217   :  { %v258_v17 = vsub.f32 %v200_v5, %v236_v16 }
 0x218   :  { %v201_v18 = vadd.f32 %v195_v4, %v547_v28 }
 0x219   :  { %v262_v23 = vmul.f32 %v343_v61, %v258_v17 }
 0x21a   :  { %v394_v19 = vpop.eup %393 }
 0x21b   :  { %v239_v20 = vpop.xlane.xlu2 %238  ;;  %v396_v21 = vpop.eup %395  ;;  %v199_v26 = vmul.f32 0.6931472, %v394_v19  ;;  %v267_v31 = vsel %vm266_vm5, %v262_v23, 0.0 }
 0x21c   :  { %v259_v24 = vsub.f32 %v201_v18, %v239_v20  ;;  %v197_v30 = vmul.f32 0.6931472, %v396_v21 }
 0x21d   :  { %v203_v34 = vadd.f32 %v199_v26, %v551_v35 }
 0x21e   :  { %v263_v27 = vmul.f32 %v344_v62, %v259_v24  ;;  %v202_v36 = vadd.f32 %v197_v30, %v543_v25 }
 0x220   :  { %v268_v32 = vsel %vm266_vm5, %v263_v27, 0.0 }
 0x221   :  { %v269_v33 = vadd.f32 %v268_v32, %v267_v31 }
 0x223   :  { %v245_v22 = vpop.xlane.xlu2 %244 }
 0x224   :  { %v261_v37 = vsub.f32 %v203_v34, %v245_v22  ;;  %v242_v28 = vpop.xlane.xlu1 %241 }
 0x225   :  { %v260_v38 = vsub.f32 %v202_v36, %v242_v28 }
 0x226   :  { %v265_v39 = vmul.f32 %v346_v3, %v261_v37 }
 0x227   :  { %v264_v40 = vmul.f32 %v345_v6, %v260_v38 }
 0x228   :  { %v272_v43 = vsel %vm266_vm5, %v265_v39, 0.0 }
 0x229   :  { %v270_v41 = vsel %vm266_vm5, %v264_v40, 0.0 }
 0x22a   :  { %v271_v42 = vadd.f32 %v270_v41, %v269_v33 }
 0x22c   :  { %v273_v44 = vadd.f32 %v272_v43, %v271_v42  ;;  %v292_v45 = vpop.xlane.xlu1 %291 }
 0x22d   :  { %v293_v46 = vrot.slane %v292_v45, 4 }
 0x22e   :  { %274 = vadd.xlane.f32.xlu0 %v273_v44 }
 0x22f   :  { %v294_v47 = vadd.f32 %v293_v46, %v292_v45 }
 0x231   :  { %v295_v48 = vrot.slane %v294_v47, 2 }
 0x233   :  { %v296_v25 = vadd.f32 %v295_v48, %v294_v47 }
 0x235   :  { %v297_v53 = vrot.slane %v296_v25, 1 }
 0x237   :  { %v298_v56 = vadd.f32 %v297_v53, %v296_v25 }
 0x2a1   :  { %v275_v35 = vpop.xlane.xlu0 %274 }
 0x2a2   :  { %v276_v49 = vrot.slane %v275_v35, 4 }
 0x2a4   :  { %v277_v50 = vadd.f32 %v276_v49, %v275_v35 }
 0x2a6   :  { %v278_v51 = vrot.slane %v277_v50, 2 }
 0x2a8   :  { %v279_v52 = vadd.f32 %v278_v51, %v277_v50 }
 0x2aa   :  { %v280_v54 = vrot.slane %v279_v52, 1 }
 0x2ac   :  { %v281_v55 = vadd.f32 %v280_v54, %v279_v52 }
 0x2ae   :  { %359 = vpush %v281_v55 }
 0x2af   :  { %361 = vpush %v298_v56 }
 0x2df   :  { %s360_s3 = spop %359 }
 0x2e0   :  { %s362_s12 = spop %361  ;;  %v283_v0 = vstv %s360_s3 }
 0x2e1   :  { %v300_v57 = vstv %s362_s12 }
 0x2e2   :  { %v301_v58 = vmax.f32 %v300_v57, 1.0 }
 0x2e4   :  { %397 = vrcp.f32 %v301_v58  ;;  %v313_v62 = vand.u32 2147483648, %v301_v58  ;;  %v311_v2 = vand.u32 2147483647, %v301_v58  ;;  %vm307_vm9 = vweird.f32 %v301_v58 }
 0x2e6   :  { %v314_v6 = vor.u32 1.1754944e-38, %v313_v62  ;;  %vm312_vm11 = vcmp.eq.f32.partialorder %v311_v2, 8.507059e+37 }
 0x2ea   :  { %v398_v59 = vpop.eup %397 }
 0x2eb   :  { %v303_v60 = vmul.f32 %v398_v59, %v301_v58  ;;  %vm308_vm8 = vweird.f32 %v398_v59 }
 0x2ec   :  { %vm309_vm10 = vmor %vm307_vm9, %vm308_vm8 }
 0x2ed   :  { %v304_v61 = vsub.f32 1.0, %v303_v60 }
 0x2ef   :  { %v305_v63 = vmul.f32 %v398_v59, %v304_v61 }
 0x2f1   :  { %v306_v3 = vadd.f32 %v398_v59, %v305_v63 }
 0x2f3   :  { %v310_v7 = vsel %vm309_vm10, %v398_v59, %v306_v3 }
 0x2f4   :  { %v315_v8 = vsel %vm312_vm11, %v314_v6, %v310_v7 }
 0x2f5   :  { %v316_v29 = vmul.f32 %v315_v8, %v283_v0 }
 0x2f7   :  { %318 = vst.msk [vmem:[#allocation2] sm:$0x1] %vm317_vm12, %v316_v29 }
 0x2f8   :  { %329 = dma.vmem_to_hbm [thread:$0]  %s325_s14, 16, %s327_s17, [#allocation3]  }
 0x2f9   :  { %423 = dma.done.wait [#allocation3], 16  }
 0x2fa   :  { %424 = vsyncadd [#allocation3], 4294967280 }
 0x2fb   :  { %334 = vsyncpa [#allocation3], 1 }

// kernel: mim_forward.4
= control target key start
LH: loop header
LB: loop body
LE: loop exit
PB: predicated region body
PF: predicated region fallthrough
CT: control target
= control target key end

     0   :  { %s1275_s24 = smov 0   ;;  %s1504_s0 = inlined_call_operand.vmem [shape: f32[2,5,192], index: 0, kind: input, shape index: {}]   ;;  %s1505_s1 = inlined_call_operand.vmem [shape: f32[192,32], index: 1, kind: input, shape index: {}]   ;;  %s1506_s2 = inlined_call_operand.vmem [shape: f32[5,32], index: 2, kind: input, shape index: {}]   ;;  %s1507_s3 = inlined_call_operand.vmem [shape: f32[1,32], index: 3, kind: input, shape index: {}]   ;;  %s1508_s4 = inlined_call_operand.vmem [shape: f32[1,32], index: 4, kind: input, shape index: {}]   ;;  %s1509_s5 = inlined_call_operand.vmem [shape: f32[1,32], index: 5, kind: input, shape index: {}]   ;;  %s1510_s6 = inlined_call_operand.vmem [shape: f32[1,32], index: 6, kind: input, shape index: {}]   ;;  %s1511_s7 = inlined_call_operand.vmem [shape: f32[32,96], index: 7, kind: input, shape index: {}]   ;;  %s1512_s8 = inlined_call_operand.vmem [shape: f32[1,96], index: 8, kind: input, shape index: {}]   ;;  %s1513_s9 = inlined_call_operand.vmem [shape: f32[32,32], index: 9, kind: input, shape index: {}]   ;;  %s1514_s10 = inlined_call_operand.vmem [shape: f32[1,32], index: 10, kind: input, shape index: {}]   ;;  %s1515_s11 = inlined_call_operand.vmem [shape: f32[1,32], index: 11, kind: input, shape index: {}]   ;;  %s1516_s12 = inlined_call_operand.vmem [shape: f32[1,32], index: 12, kind: input, shape index: {}]   ;;  %s1517_s13 = inlined_call_operand.vmem [shape: f32[32,64], index: 13, kind: input, shape index: {}]   ;;  %s1518_s14 = inlined_call_operand.vmem [shape: f32[1,64], index: 14, kind: input, shape index: {}]   ;;  %s1519_s15 = inlined_call_operand.vmem [shape: f32[64,32], index: 15, kind: input, shape index: {}]   ;;  %s1520_s16 = inlined_call_operand.vmem [shape: f32[1,32], index: 16, kind: input, shape index: {}]   ;;  %s1521_s17 = inlined_call_operand.vmem [shape: f32[2,5,32], index: 17, kind: output, shape index: {}]  }
   0x1   :  { %1524 = sst [smem:[#allocation3_spill]] %s1504_s0 }
   0x2   :  { %1525 = sst [smem:[#allocation4_spill]] %s1505_s1 }
   0x3 LB: > { %1526 = sst [smem:[#allocation2_spill]] %s1177_s24  ;;  %s1104_s25 = sadd.s32 4294967295, %s1177_s24   ;;  %s1177_s24 = sphi %s1275_s24, %s27_s24  }
   0x4   : > { %p1108_p0 = scmp.ge.s32.totalorder %s1177_s24, 1  ;;  %p487_p1 = scmp.lt.s32.totalorder %s1177_s24, 3 }
   0x6   : > { %p488_p2 = pnand %p1108_p0, %p487_p1 }
   0x7   : > { %s1527_s28 = sld [smem:[#allocation4_spill]] (!%p488_p2)  ;;  %p538_p3 = scmp.lt.s32.totalorder (!%p488_p2), %s1104_s25, 1 }
   0x8   : > { %491 = sbr.rel (%p488_p2) target bundleno = 2198 (0x896), region = 88  ;;  %s1528_s23 = sld [smem:[#allocation3_spill]] (!%p488_p2) }
   0x9   : > { %s1180_s21 = smov (!%p488_p2), 112   ;;  %s1181_s22 = smov (!%p488_p2), 96  }
   0xa   : > { %s1183_s27 = smov (!%p488_p2), 80   ;;  %s1184_s29 = smov (!%p488_p2), 48  }
   0xd   : > { %v564_v0 = vld [vmem:[%s1527_s28 + $0x78] sm:$0xff]  ;;  %v563_v1 = vld [vmem:[%s1527_s28 + $0x70] sm:$0xff]  ;;  %v562_v2 = vld [vmem:[%s1527_s28 + $0x68] sm:$0xff]  ;;  %s1531_s25 = smov (!%p538_p3, %s1104_s25), 1  ;;  %vm574_vm0 = vcmask 523264   ;;  %vm620_vm1 = vcmask 258048  }
   0xe   : > { %578 = vmatpush.msra.mxu0 %v564_v0  ;;  %v572_v3 = vld [vmem:[%s1527_s28 + $0xb8] sm:$0xff]  ;;  %v561_v4 = vld [vmem:[%s1527_s28 + $0x60] sm:$0xff]  ;;  %v571_v5 = vld [vmem:[%s1527_s28 + $0xb0] sm:$0xff]  ;;  %s1128_s30 = sshll.u32 %s1531_s25, 4  ;;  %v1179_v32 = vmov 32.0   ;;  %vm698_vm9 = vcmask 261120  }
   0xf   : > { %606 = vmatpush.msra.mxu1 %v572_v3  ;;  %v570_v6 = vld [vmem:[%s1527_s28 + $0xa8] sm:$0xff]  ;;  %v560_v7 = vld [vmem:[%s1527_s28 + $0x58] sm:$0xff]  ;;  %v569_v8 = vld [vmem:[%s1527_s28 + $0xa0] sm:$0xff]  ;;  %s542_s26 = scalar_lea.vmem %s1528_s23, %s1128_s30  ;;  %1153 = vrcp.f32 %v1179_v32  ;;  %s1182_s23 = smov 64   ;;  %vm729_vm10 = vcmask 130048   ;;  %vm786_vm11 = vcmask 1044480  }
  0x10   : > { %579 = vmatpush.msra.mxu0 %v563_v1  ;;  %v559_v9 = vld [vmem:[%s1527_s28 + $0x50] sm:$0xff]  ;;  %v558_v10 = vld [vmem:[%s1527_s28 + $0x48] sm:$0xff]  ;;  %v568_v11 = vld [vmem:[%s1527_s28 + $0x98] sm:$0xff]  ;;  %vm755_vm12 = vcmask 36864   ;;  %s1111_s18 = sshll.u32 %s1531_s25, 3 }
  0x11   : > { %607 = vmatpush.msra.mxu1 %v571_v5  ;;  %v567_v12 = vld [vmem:[%s1527_s28 + $0x90] sm:$0xff]  ;;  %v557_v13 = vld [vmem:[%s1527_s28 + $0x40] sm:$0xff]  ;;  %v566_v14 = vld [vmem:[%s1527_s28 + $0x88] sm:$0xff]  ;;  %s546_s20 = scalar_lea.vmem %s1521_s17, %s1111_s18 }
  0x12   : > { %580 = vmatpush.msra.mxu0 %v562_v2  ;;  %v556_v15 = vld [vmem:[%s1527_s28 + $0x38] sm:$0xff]  ;;  %v565_v16 = vld [vmem:[%s1527_s28 + $0x80] sm:$0xff]  ;;  %v555_v17 = vld [vmem:[%s1527_s28 + $0x30] sm:$0xff] }
  0x13   : > { %608 = vmatpush.msra.mxu1 %v570_v6  ;;  %v548_v18 = vld [vmem:[%s542_s26 + $0x8] sm:$0x1f]  ;;  %v553_v20 = vld [vmem:[%s1527_s28 + $0x20] sm:$0xff]  ;;  %v552_v21 = vld [vmem:[%s1527_s28 + $0x18] sm:$0xff] }
  0x14   : > { %581 = vmatpush.msra.mxu0 %v561_v4  ;;  %v554_v19 = vld [vmem:[%s1527_s28 + $0x28] sm:$0xff]  ;;  %v551_v22 = vld [vmem:[%s1527_s28 + $0x10] sm:$0xff]  ;;  %v549_v24 = vld [vmem:[%s1527_s28] sm:$0xff] }
  0x15   : > { %609 = vmatpush.msra.mxu1 %v569_v8  ;;  %v550_v23 = vld [vmem:[%s1527_s28 + $0x8] sm:$0xff]  ;;  %v547_v25 = vld [vmem:[%s542_s26] sm:$0x1f]  ;;  %v1154_v33 = vpop.eup %1153  ;;  %v693_v1 = vld [vmem:[%s1511_s7 + $0x18] sm:$0xff] }
  0x16   : > { %582 = vmatpush.msra.mxu0 %v560_v7  ;;  %v573_v26 = vld [vmem:[%s1506_s2] sm:$0x1f]  ;;  %v625_v34 = vmul.f32 32.0, %v1154_v33  ;;  %vm629_vm2 = vweird.f32 %v1154_v33  ;;  %714 = vmatpush.msra.mxu2 %v693_v1  ;;  %v692_v2 = vld [vmem:[%s1511_s7 + $0x10] sm:$0xff]  ;;  %v691_v3 = vld [vmem:[%s1511_s7 + $0x8] sm:$0xff] }
  0x17   : > { %610 = vmatpush.msra.mxu1 %v568_v11  ;;  %v1143_v53 = vld [vmem:[%s1507_s3] ss:$0 sm:$0xff] }
  0x18   : > { %583 = vmatpush.msra.mxu0 %v559_v9  ;;  %v626_v35 = vsub.f32 1.0, %v625_v34  ;;  %v1144_v56 = vld [vmem:[%s1508_s4] ss:$0 sm:$0xff]  ;;  %715 = vmatpush.msra.mxu2 %v692_v2 }
  0x19   : > { %611 = vmatpush.msra.mxu1 %v567_v12  ;;  %v690_v4 = vld [vmem:[%s1511_s7] sm:$0xff] }
  0x1a   : > { %584 = vmatpush.msra.mxu0 %v558_v10  ;;  %v627_v36 = vmul.f32 %v1154_v33, %v626_v35  ;;  %716 = vmatpush.msra.mxu2 %v691_v3 }
  0x1b   : > { %612 = vmatpush.msra.mxu1 %v566_v14  ;;  %v1145_v14 = vld [vmem:[%s1509_s5] ss:$0 sm:$0xff] }
  0x1c   : > { %585 = vmatpush.msra.mxu0 %v557_v13  ;;  %v628_v37 = vadd.f32 %v1154_v33, %v627_v36  ;;  %717 = vmatpush.msra.mxu2 %v690_v4 }
  0x1d   : > { %613 = vmatpush.msra.mxu1 %v565_v16 }
  0x1e   : > { %586 = vmatpush.msra.mxu0 %v556_v15  ;;  %1112 = vmatmul.msk.f32.vlgmr.msra.gmra.mxu1 %vm574_vm0, %v548_v18  ;;  %v1366_v38 = vsel %vm629_vm2, %v1154_v33, %v628_v37 }
  0x20   : > { %587 = vmatpush.msra.mxu0 %v555_v17  ;;  %v1146_v17 = vld [vmem:[%s1510_s6] ss:$0 sm:$0xff] }
  0x22   : > { %588 = vmatpush.msra.mxu0 %v554_v19 }
  0x24   : > { %589 = vmatpush.msra.mxu0 %v553_v20  ;;  %v1147_v20 = vld [vmem:[%s1512_s8] ss:$0 sm:$0xff] }
  0x26   : > { %590 = vmatpush.msra.mxu0 %v552_v21 }
  0x28   : > { %591 = vmatpush.msra.mxu0 %v551_v22 }
  0x2a   : > { %592 = vmatpush.msra.mxu0 %v550_v23 }
  0x2c   : > { %593 = vmatpush.msra.mxu0 %v549_v24 }
  0x2d   : > { %594 = vmatmul.f32.vlgmr.msra.gmra.mxu0 %v547_v25 }
  0x9b   : > { %v615_v28 = vpop.f32.mrf.mxu1 }
  0xaa   : > { %v595_v27 = vpop.f32.mrf.mxu0 }
  0xab   : > { %v596_v29 = vadd.f32 %v595_v27, %v573_v26 }
  0xad   : > { %v616_v30 = vadd.f32 %v615_v28, %v596_v29 }
  0xaf   : > { %v621_v31 = vsel %vm620_vm1, %v616_v30, 0.0 }
  0xb0   : > { %622 = vadd.xlane.f32.xlu0 %v621_v31 }
 0x123   : > { %v623_v39 = vpop.xlane.xlu0 %622 }
 0x124   : > { %v631_v40 = vmul.f32 %v1366_v38, %v623_v39 }
 0x126   : > { %v632_v41 = vsub.f32 %v616_v30, %v631_v40 }
 0x128   : > { %v633_v42 = vmul.f32 %v632_v41, %v632_v41 }
 0x12a   : > { %v634_v43 = vsel %vm620_vm1, %v633_v42, 0.0 }
 0x12b   : > { %635 = vadd.xlane.f32.xlu0 %v634_v43 }
 0x19e   : > { %v636_v44 = vpop.xlane.xlu0 %635 }
 0x19f   : > { %v637_v45 = vmul.f32 %v636_v44, %v1366_v38 }
 0x1a1   : > { %v638_v46 = vadd.f32 1e-05, %v637_v45 }
 0x1a3   : > { %1155 = vrsqrt.f32 %v638_v46  ;;  %vm645_vm4 = vweird.f32 %v638_v46 }
 0x1a9   : > { %v1156_v47 = vpop.eup %1155 }
 0x1aa   : > { %v640_v48 = vmul.f32 %v1156_v47, %v638_v46  ;;  %vm646_vm3 = vweird.f32 %v1156_v47 }
 0x1ab   : > { %vm647_vm5 = vmor %vm645_vm4, %vm646_vm3  ;;  %vm782_vm3 = vcmask 39936  }
 0x1ac   : > { %v641_v49 = vmul.f32 %v1156_v47, %v640_v48 }
 0x1ae   : > { %v642_v50 = vmul.f32 0.5, %v641_v49 }
 0x1b0   : > { %v643_v51 = vsub.f32 1.5, %v642_v50 }
 0x1b2   : > { %v644_v52 = vmul.f32 %v1156_v47, %v643_v51 }
 0x1b4   : > { %v648_v54 = vsel %vm647_vm5, %v1156_v47, %v644_v52 }
 0x1b5   : > { %v649_v55 = vmul.f32 %v648_v54, %v632_v41 }
 0x1b7   : > { %v653_v57 = vmul.f32 %v1143_v53, %v649_v55 }
 0x1b9   : > { %v1377_v58 = vadd.f32 %v1144_v56, %v653_v57 }
 0x1bb   : > { %v660_v59 = vsel %vm620_vm1, %v1377_v58, 0.0 }
 0x1bc   : > { %661 = vadd.xlane.f32.xlu1 %v660_v59 }
 0x22f   : > { %v662_v60 = vpop.xlane.xlu1 %661 }
 0x230   : > { %v663_v61 = vmul.f32 %v662_v60, %v1366_v38 }
 0x232   : > { %v664_v62 = vsub.f32 %v1377_v58, %v663_v61 }
 0x234   : > { %v665_v63 = vmul.f32 %v664_v62, %v664_v62 }
 0x236   : > { %v666_v0 = vsel %vm620_vm1, %v665_v63, 0.0 }
 0x237   : > { %667 = vadd.xlane.f32.xlu1 %v666_v0 }
 0x2aa   : > { %v668_v5 = vpop.xlane.xlu1 %667 }
 0x2ab   : > { %v669_v6 = vmul.f32 %v668_v5, %v1366_v38 }
 0x2ad   : > { %v670_v7 = vadd.f32 1e-05, %v669_v6  ;;  %v725_v6 = vld [vmem:[%s1513_s9 + $0x18] sm:$0xff] }
 0x2af   : > { %1157 = vrsqrt.f32 %v670_v7  ;;  %vm677_vm7 = vweird.f32 %v670_v7 }
 0x2b5   : > { %v1158_v8 = vpop.eup %1157 }
 0x2b6   : > { %v672_v9 = vmul.f32 %v1158_v8, %v670_v7  ;;  %vm678_vm6 = vweird.f32 %v1158_v8  ;;  %v724_v7 = vld [vmem:[%s1513_s9 + $0x10] sm:$0xff] }
 0x2b7   : > { %vm679_vm8 = vmor %vm677_vm7, %vm678_vm6 }
 0x2b8   : > { %v673_v10 = vmul.f32 %v1158_v8, %v672_v9  ;;  %v722_v9 = vld [vmem:[%s1513_s9] sm:$0xff] }
 0x2ba   : > { %v674_v11 = vmul.f32 0.5, %v673_v10 }
 0x2bc   : > { %v675_v12 = vsub.f32 1.5, %v674_v11 }
 0x2be   : > { %v676_v13 = vmul.f32 %v1158_v8, %v675_v12 }
 0x2c0   : > { %v680_v15 = vsel %vm679_vm8, %v1158_v8, %v676_v13  ;;  %v723_v8 = vld [vmem:[%s1513_s9 + $0x8] sm:$0xff] }
 0x2c1   : > { %v681_v16 = vmul.f32 %v680_v15, %v664_v62  ;;  %v1148_v15 = vld [vmem:[%s1514_s10] ss:$0 sm:$0xff] }
 0x2c3   : > { %v685_v18 = vmul.f32 %v1145_v14, %v681_v16 }
 0x2c5   : > { %v689_v19 = vadd.f32 %v1146_v17, %v685_v18 }
 0x2c7   : > { %1113 = vmatmul.msk.f32.vlgmr.msra.gmra.mxu2 %vm698_vm9, %v689_v19 }
 0x34a   : > { %v719_v21 = vpop.f32.mrf.mxu2 }
 0x34b   : > { %v720_v22 = vadd.f32 %v1147_v20, %v719_v21 }
 0x34d   : > { %809 = vrot.lane.b32.xlu0 %v720_v22, %s1180_s21  ;;  %727 = vrot.lane.b32.xlu2 %v720_v22, %s1181_s22 }
 0x355   : > { %780 = vrot.lane.b32.xlu0 %v720_v22, %s1182_s23  ;;  %811 = vrot.lane.b32.xlu2 %v720_v22, %s1183_s27 }
 0x3a7   : > { %v728_v23 = vpop.permute.xlu2 %727 }
 0x3a8   : > { %1114 = vmatpush.xpose.msk.msra.mxu3 %vm729_vm10, %v728_v23 }
 0x3ab   : > { %1115 = vmatmul.msk.f32.vlgmr.msra.gmra.mxu3 %vm729_vm10, %v720_v22 }
 0x3af   : > { %v812_v24 = vpop.permute.xlu2 %811 }
 0x3b0   : > { %1118 = vmatpush.xpose.msk.msrb.mxu2 %vm729_vm10, %v812_v24  ;;  %v976_v24 = vld [vmem:[%s1517_s13 + $0x18] sm:$0xff] }
 0x3b4   : > { %906 = vmatpush.msra.mxu2 %v725_v6 }
 0x3b6   : > { %907 = vmatpush.msra.mxu2 %v724_v7 }
 0x3bf   : > { %v810_v25 = vpop.permute.xlu0 %809 }
 0x3c0   : > { %1119 = vmatmul.msk.f32.vlgmr.msrb.gmra.mxu2 %vm729_vm10, %v810_v25  ;;  %v974_v25 = vld [vmem:[%s1517_s13 + $0x8] sm:$0xff] }
 0x3c1   : > { %929 = vmatpush.msrb.mxu2 %v723_v8 }
 0x3c3   : > { %930 = vmatpush.msrb.mxu2 %v722_v9 }
 0x3c7   : > { %v781_v26 = vpop.permute.xlu0 %780 }
 0x3c8   : > { %1116 = vmatpush.msk.msrb.mxu3 %vm786_vm11, %v781_v26  ;;  %v973_v26 = vld [vmem:[%s1517_s13] sm:$0xff] }
 0x42e   : > { %v751_v27 = vpop.f32.mrf.mxu3 }
 0x42f   : > { %v754_v28 = vmul.f32 0.25, %v751_v27 }
 0x431   : > { %v756_v29 = vsel %vm755_vm12, %v754_v28, -inf }
 0x432   : > { %757 = vmax.xlane.f32.xlu1 %v756_v29 }
 0x443   : > { %v834_v30 = vpop.f32.mrf.mxu2 }
 0x444   : > { %v837_v31 = vmul.f32 0.25, %v834_v30 }
 0x446   : > { %v838_v32 = vsel %vm755_vm12, %v837_v31, -inf }
 0x447   : > { %839 = vmax.xlane.f32.xlu2 %v838_v32 }
 0x4a5   : > { %v758_v33 = vpop.xlane.xlu1 %757 }
 0x4a6   : > { %v759_v34 = vsub.f32 %v754_v28, %v758_v33 }
 0x4a8   : > { %v760_v35 = vmul.f32 1.442695, %v759_v34 }
 0x4aa   : > { %1159 = vpow2.f32 %v760_v35 }
 0x4b0   : > { %v1160_v36 = vpop.eup %1159 }
 0x4b1   : > { %v762_v37 = vsel %vm755_vm12, %v1160_v36, 0.0 }
 0x4b2   : > { %763 = vadd.xlane.f32.xlu1 %v762_v37 }
 0x4ba   : > { %v840_v39 = vpop.xlane.xlu2 %839 }
 0x4bb   : > { %v841_v40 = vsub.f32 %v837_v31, %v840_v39 }
 0x4bd   : > { %v842_v41 = vmul.f32 1.442695, %v841_v40 }
 0x4bf   : > { %1161 = vpow2.f32 %v842_v41 }
 0x4c5   : > { %v1162_v42 = vpop.eup %1161 }
 0x4c6   : > { %v844_v43 = vsel %vm755_vm12, %v1162_v42, 0.0 }
 0x4c7   : > { %845 = vadd.xlane.f32.xlu1 %v844_v43  ;;  %v1019_v43 = vld [vmem:[%s1519_s15 + $0x30] sm:$0xff] }
 0x4e0   : > { %862 = vrot.lane.b32.xlu1 %v720_v22, %s1184_s29 }
 0x525   : > { %v764_v44 = vpop.xlane.xlu1 %763 }
 0x526   : > { %1163 = vrcp.f32 %v764_v44  ;;  %v776_v48 = vand.u32 2147483648, %v764_v44  ;;  %v774_v50 = vand.u32 2147483647, %v764_v44  ;;  %vm770_vm14 = vweird.f32 %v764_v44 }
 0x528   : > { %v777_v52 = vor.u32 1.1754944e-38, %v776_v48  ;;  %vm775_vm2 = vcmp.eq.f32.partialorder %v774_v50, 8.507059e+37  ;;  %v1014_v48 = vld [vmem:[%s1519_s15 + $0x8] sm:$0xff]  ;;  %v1151_v50 = vld [vmem:[%s1518_s14] ss:$0 sm:$0xff] }
 0x52c   : > { %v1164_v45 = vpop.eup %1163 }
 0x52d   : > { %v766_v46 = vmul.f32 %v1164_v45, %v764_v44  ;;  %vm771_vm13 = vweird.f32 %v1164_v45  ;;  %v1018_v44 = vld [vmem:[%s1519_s15 + $0x28] sm:$0xff] }
 0x52e   : > { %vm772_vm15 = vmor %vm770_vm14, %vm771_vm13 }
 0x52f   : > { %v767_v47 = vsub.f32 1.0, %v766_v46  ;;  %v1016_v46 = vld [vmem:[%s1519_s15 + $0x18] sm:$0xff] }
 0x531   : > { %v768_v49 = vmul.f32 %v1164_v45, %v767_v47  ;;  %v1015_v47 = vld [vmem:[%s1519_s15 + $0x10] sm:$0xff] }
 0x533   : > { %v769_v51 = vadd.f32 %v1164_v45, %v768_v49  ;;  %v1013_v49 = vld [vmem:[%s1519_s15] sm:$0xff] }
 0x535   : > { %v773_v53 = vsel %vm772_vm15, %v1164_v45, %v769_v51  ;;  %v1017_v45 = vld [vmem:[%s1519_s15 + $0x20] sm:$0xff] }
 0x536   : > { %v778_v54 = vsel %vm775_vm2, %v777_v52, %v773_v53 }
 0x537   : > { %v779_v55 = vmul.f32 %v1160_v36, %v778_v54  ;;  %v1149_v36 = vld [vmem:[%s1515_s11] ss:$0 sm:$0xff] }
 0x539   : > { %1117 = vmatmul.msk.f32.vlgmr.msrb.gmra.mxu3 %vm782_vm3, %v779_v55 }
 0x53a   : > { %v846_v56 = vpop.xlane.xlu1 %845 }
 0x53b   : > { %1165 = vrcp.f32 %v846_v56  ;;  %v858_v63 = vand.u32 2147483648, %v846_v56  ;;  %vm852_vm5 = vweird.f32 %v846_v56  ;;  %v856_v0 = vand.u32 2147483647, %v846_v56 }
 0x53d   : > { %v859_v2 = vor.u32 1.1754944e-38, %v858_v63  ;;  %vm857_vm7 = vcmp.eq.f32.partialorder %v856_v0, 8.507059e+37  ;;  %v1152_v63 = vld [vmem:[%s1520_s16] ss:$0 sm:$0xff] }
 0x541   : > { %v1166_v57 = vpop.eup %1165 }
 0x542   : > { %v848_v59 = vmul.f32 %v1166_v57, %v846_v56  ;;  %vm853_vm4 = vweird.f32 %v1166_v57 }
 0x543   : > { %vm854_vm6 = vmor %vm852_vm5, %vm853_vm4 }
 0x544   : > { %v849_v60 = vsub.f32 1.0, %v848_v59 }
 0x546   : > { %v850_v61 = vmul.f32 %v1166_v57, %v849_v60 }
 0x548   : > { %v851_v62 = vadd.f32 %v1166_v57, %v850_v61 }
 0x54a   : > { %v855_v1 = vsel %vm854_vm6, %v1166_v57, %v851_v62 }
 0x54b   : > { %v860_v3 = vsel %vm857_vm7, %v859_v2, %v855_v1 }
 0x54c   : > { %v861_v5 = vmul.f32 %v1162_v42, %v860_v3  ;;  %v1020_v42 = vld [vmem:[%s1519_s15 + $0x38] sm:$0xff] }
 0x54d   : > { %1032 = vmatpush.msrb.mxu1 %v1020_v42 }
 0x54f   : > { %1033 = vmatpush.msrb.mxu1 %v1019_v43 }
 0x551   : > { %1034 = vmatpush.msrb.mxu1 %v1018_v44 }
 0x552   : > { %v863_v4 = vpop.permute.xlu1 %862 }
 0x553   : > { %1120 = vmatpush.msk.msra.mxu3 %vm786_vm11, %v863_v4  ;;  %1035 = vmatpush.msrb.mxu1 %v1017_v45 }
 0x554   : > { %1121 = vmatmul.msk.f32.vlgmr.msra.gmra.mxu3 %vm782_vm3, %v861_v5 }
 0x555   : > { %996 = vmatpush.msrb.mxu3 %v976_v24  ;;  %1036 = vmatpush.msrb.mxu1 %v1016_v46 }
 0x557   : > { %1037 = vmatpush.msrb.mxu1 %v1015_v47 }
 0x559   : > { %1038 = vmatpush.msrb.mxu1 %v1014_v48 }
 0x55b   : > { %1039 = vmatpush.msrb.mxu1 %v1013_v49 }
 0x5bc   : > { %v806_v10 = vpop.f32.mrf.mxu3 }
 0x5d7   : > { %v886_v11 = vpop.f32.mrf.mxu3 }
 0x5d8   : > { %1122 = vmatmul.msk.f32.vlgmr.msra.gmra.mxu2 %vm729_vm10, %v886_v11 }
 0x5e0   : > { %1123 = vmatmul.msk.f32.vlgmr.msrb.gmra.mxu2 %vm729_vm10, %v806_v10 }
 0x65b   : > { %v909_v12 = vpop.f32.mrf.mxu2 }
 0x663   : > { %v932_v13 = vpop.f32.mrf.mxu2 }
 0x664   : > { %v933_v14 = vadd.f32 %v932_v13, %v909_v12 }
 0x666   : > { %v935_v16 = vadd.f32 %v933_v14, %v1377_v58  ;;  %v975_v58 = vld [vmem:[%s1517_s13 + $0x10] sm:$0xff] }
 0x667   : > { %997 = vmatpush.msrb.mxu3 %v975_v58 }
 0x668   : > { %v1437_v17 = vadd.f32 %v1148_v15, %v935_v16 }
 0x669   : > { %998 = vmatpush.msrb.mxu3 %v974_v25 }
 0x66a   : > { %v943_v18 = vsel %vm620_vm1, %v1437_v17, 0.0 }
 0x66b   : > { %944 = vadd.xlane.f32.xlu0 %v943_v18  ;;  %999 = vmatpush.msrb.mxu3 %v973_v26 }
 0x6de   : > { %v945_v19 = vpop.xlane.xlu0 %944 }
 0x6df   : > { %v946_v20 = vmul.f32 %v945_v19, %v1366_v38 }
 0x6e1   : > { %v947_v21 = vsub.f32 %v1437_v17, %v946_v20 }
 0x6e3   : > { %v948_v22 = vmul.f32 %v947_v21, %v947_v21 }
 0x6e5   : > { %v949_v23 = vsel %vm620_vm1, %v948_v22, 0.0 }
 0x6e6   : > { %950 = vadd.xlane.f32.xlu2 %v949_v23 }
 0x759   : > { %v951_v27 = vpop.xlane.xlu2 %950 }
 0x75a   : > { %v952_v28 = vmul.f32 %v951_v27, %v1366_v38  ;;  %v1150_v38 = vld [vmem:[%s1516_s12] ss:$0 sm:$0xff] }
 0x75c   : > { %v953_v29 = vadd.f32 1e-05, %v952_v28 }
 0x75e   : > { %1167 = vrsqrt.f32 %v953_v29  ;;  %vm960_vm10 = vweird.f32 %v953_v29 }
 0x764   : > { %v1168_v30 = vpop.eup %1167 }
 0x765   : > { %v955_v31 = vmul.f32 %v1168_v30, %v953_v29  ;;  %vm961_vm8 = vweird.f32 %v1168_v30 }
 0x766   : > { %vm962_vm11 = vmor %vm960_vm10, %vm961_vm8 }
 0x767   : > { %v956_v32 = vmul.f32 %v1168_v30, %v955_v31 }
 0x769   : > { %v957_v33 = vmul.f32 0.5, %v956_v32 }
 0x76b   : > { %v958_v34 = vsub.f32 1.5, %v957_v33 }
 0x76d   : > { %v959_v35 = vmul.f32 %v1168_v30, %v958_v34 }
 0x76f   : > { %v963_v37 = vsel %vm962_vm11, %v1168_v30, %v959_v35 }
 0x770   : > { %v964_v39 = vmul.f32 %v963_v37, %v947_v21 }
 0x772   : > { %v968_v40 = vmul.f32 %v1149_v36, %v964_v39 }
 0x774   : > { %v972_v41 = vadd.f32 %v1150_v38, %v968_v40 }
 0x776   : > { %1124 = vmatmul.msk.f32.vlgmr.msrb.gmra.mxu3 %vm698_vm9, %v972_v41 }
 0x7f9   : > { %v1001_v51 = vpop.f32.mrf.mxu3 }
 0x7fa   : > { %v1002_v52 = vadd.f32 %v1151_v50, %v1001_v51 }
 0x7fc   : > { %v1004_v53 = vmul.f32 %v1002_v52, %v1002_v52 }
 0x7fe   : > { %v1005_v54 = vmul.f32 %v1004_v53, %v1002_v52 }
 0x800   : > { %v1006_v55 = vmul.f32 0.044715, %v1005_v54 }
 0x802   : > { %v1007_v56 = vadd.f32 %v1006_v55, %v1002_v52 }
 0x804   : > { %v1008_v57 = vmul.f32 0.7978846, %v1007_v56 }
 0x806   : > { %1169 = vtanh.f32 %v1008_v57 }
 0x80c   : > { %v1170_v59 = vpop.eup %1169 }
 0x80d   : > { %v1010_v60 = vadd.f32 1.0, %v1170_v59 }
 0x80f   : > { %v1011_v61 = vmul.f32 0.5, %v1010_v60 }
 0x811   : > { %v1012_v62 = vmul.f32 %v1011_v61, %v1002_v52 }
 0x813   : > { %1125 = vmatmul.msk.f32.vlgmr.msrb.gmra.mxu1 %vm574_vm0, %v1012_v62 }
 0x890   : > { %v1041_v0 = vpop.f32.mrf.mxu1 }
 0x891   : > { %v1044_v1 = vadd.f32 %v1041_v0, %v1437_v17 }
 0x893   : > { %v1049_v2 = vadd.f32 %v1152_v63, %v1044_v1 }
 0x895   : > { %1050 = vst.msk [vmem:[%s546_s20] sm:$0x1f] %vm620_vm1, %v1049_v2 }
 0x896 PF: > { %s1529_s24 = sld [smem:[#allocation2_spill]] }
 0x89c   : > { %s27_s24 = sadd.s32 1, %s1529_s24  }
 0x89d   : > { %p24_p4 = scmp.ge.s32.totalorder %s27_s24, 4  }
 0x89f   :  { %26 = sbr.rel (!%p24_p4) target bundleno = 3 (0x3), region = 118 }

// kernel: mim_forward.5
= control target key start
LH: loop header
LB: loop body
LE: loop exit
PB: predicated region body
PF: predicated region fallthrough
CT: control target
= control target key end

     0   :  { %s2340_s0 = inlined_call_operand.vmem [shape: f32[2,5,32], index: 0, kind: input, shape index: {}]   ;;  %s2341_s1 = inlined_call_operand.vmem [shape: f32[4,32], index: 1, kind: input, shape index: {}]   ;;  %s2342_s2 = inlined_call_operand.vmem [shape: f32[1,32], index: 2, kind: input, shape index: {}]   ;;  %s2343_s3 = inlined_call_operand.vmem [shape: f32[1,32], index: 3, kind: input, shape index: {}]   ;;  %s2344_s4 = inlined_call_operand.vmem [shape: f32[32,96], index: 4, kind: input, shape index: {}]   ;;  %s2345_s5 = inlined_call_operand.vmem [shape: f32[1,96], index: 5, kind: input, shape index: {}]   ;;  %s2346_s6 = inlined_call_operand.vmem [shape: f32[32,32], index: 6, kind: input, shape index: {}]   ;;  %s2347_s7 = inlined_call_operand.vmem [shape: f32[1,32], index: 7, kind: input, shape index: {}]   ;;  %s2348_s8 = inlined_call_operand.vmem [shape: f32[1,32], index: 8, kind: input, shape index: {}]   ;;  %s2349_s9 = inlined_call_operand.vmem [shape: f32[1,32], index: 9, kind: input, shape index: {}]   ;;  %s2350_s10 = inlined_call_operand.vmem [shape: f32[32,32], index: 10, kind: input, shape index: {}]   ;;  %s2351_s11 = inlined_call_operand.vmem [shape: f32[1,32], index: 11, kind: input, shape index: {}]   ;;  %s2352_s12 = inlined_call_operand.vmem [shape: f32[32,64], index: 12, kind: input, shape index: {}]   ;;  %s2353_s13 = inlined_call_operand.vmem [shape: f32[1,64], index: 13, kind: input, shape index: {}]   ;;  %s2354_s14 = inlined_call_operand.vmem [shape: f32[32,32], index: 14, kind: input, shape index: {}]   ;;  %s2355_s15 = inlined_call_operand.vmem [shape: f32[1,32], index: 15, kind: input, shape index: {}]   ;;  %s2356_s16 = inlined_call_operand.vmem [shape: f32[1,32], index: 16, kind: input, shape index: {}]   ;;  %s2357_s17 = inlined_call_operand.vmem [shape: f32[1,32], index: 17, kind: input, shape index: {}]   ;;  %s2358_s18 = inlined_call_operand.vmem [shape: f32[32,64], index: 18, kind: input, shape index: {}]   ;;  %s2359_s19 = inlined_call_operand.vmem [shape: f32[1,64], index: 19, kind: input, shape index: {}]   ;;  %s2360_s20 = inlined_call_operand.vmem [shape: f32[64,32], index: 20, kind: input, shape index: {}]   ;;  %s2361_s21 = inlined_call_operand.vmem [shape: f32[1,32], index: 21, kind: input, shape index: {}]   ;;  %s2362_s22 = inlined_call_operand.hbm [shape: f32[1,32], index: 22, kind: input, shape index: {}]   ;;  %s2363_s23 = inlined_call_operand.hbm [shape: f32[1,32], index: 23, kind: input, shape index: {}]   ;;  %s2364_s24 = inlined_call_operand.vmem [shape: f32[32,32], index: 24, kind: input, shape index: {}]   ;;  %s2365_s25 = inlined_call_operand.hbm [shape: f32[1,32], index: 25, kind: input, shape index: {}]   ;;  %s2366_s26 = inlined_call_operand.vmem [shape: f32[2,4,32], index: 26, kind: output, shape index: {}]  }
   0x1   :  { %2375 = sst [smem:[#allocation9_spill]] %s2340_s0 }
   0x2   :  { %2376 = sst [smem:[#allocation10_spill]] %s2341_s1 }
   0x3   :  { %2377 = sst [smem:[#allocation11_spill]] %s2342_s2 }
   0x4   :  { %2378 = sst [smem:[#allocation12_spill]] %s2343_s3 }
   0x5   :  { %2379 = sst [smem:[#allocation13_spill]] %s2344_s4 }
   0x6   :  { %2380 = sst [smem:[#allocation14_spill]] %s2345_s5 }
   0x7   :  { %2381 = sst [smem:[#allocation15_spill]] %s2346_s6 }
   0x8   :  { %2382 = sst [smem:[#allocation16_spill]] %s2347_s7 }
   0x9   :  { %2383 = sst [smem:[#allocation17_spill]] %s2348_s8 }
   0xa   :  { %2384 = sst [smem:[#allocation18_spill]] %s2349_s9 }
   0xb   :  { %2385 = sst [smem:[#allocation19_spill]] %s2350_s10 }
   0xc   :  { %31 = vsyncpa [#allocation3], 0 }
   0xd   :  { %32 = vsyncpa [#allocation5], 0  ;;  %s2072_s27 = smov 0  }
   0xe LB: > { %s707_s28 = sshll.u32 %s2363_s23, 4  ;;  %s2081_s8 = sadd.s32 4294967295, %s1926_s27   ;;  %s1926_s27 = sphi %s2072_s27, %s38_s27   ;;  %s708_s28 = int_to_ptr.hbm [resolvable:$true] %s707_s28 }
   0xf   : > { %p1694_p0 = scmp.ge.s32.totalorder %s1926_s27, 1  ;;  %p620_p1 = scmp.lt.s32.totalorder %s1926_s27, 3 }
  0x10   : > { %p1755_p2 = scmp.eq.s32.totalorder %s2081_s8, 0  ;;  %s1928_s29 = smov [#allocation4]  }
  0x11   : > { %p2086_p3 = pnand %p1694_p0, %p620_p1  ;;  %s709_s0 = sshll.u32 %s1928_s29, 4  ;;  %s710_s0 = int_to_ptr.vmem [resolvable:$true] %s709_s0 }
  0x12   : > { %s695_s2 = sshll.u32 %s2362_s22, 4  ;;  %s722_s6 = sshll.u32 %s2365_s25, 4  ;;  %s696_s2 = int_to_ptr.hbm [resolvable:$true] %s695_s2  ;;  %s723_s6 = int_to_ptr.hbm [resolvable:$true] %s722_s6 }
  0x13   : > { %p1745_p4 = pneg %p2086_p3  ;;  %s1929_s1 = smov [#allocation2]  }
  0x14   : > { %s697_s3 = sshll.u32 %s1929_s1, 4  ;;  %s1930_s7 = smov [#allocation6]   ;;  %s698_s3 = int_to_ptr.vmem [resolvable:$true] %s697_s3 }
  0x15   : > { %p1746_p5 = pnand %p1755_p2, %p1745_p4  ;;  %s724_s29 = sshll.u32 %s1930_s7, 4  ;;  %s725_s29 = int_to_ptr.vmem [resolvable:$true] %s724_s29 }
  0x16   : > { %744 = sbr.rel (%p2086_p3) target bundleno = 3745 (0xea1), region = 124 }
  0x17   : > { %1751 = dma.hbm_to_vmem [thread:$0]  (!%p1746_p5), %s708_s28, 16, %s710_s0, [#allocation5]  }
  0x18   : > { %1748 = dma.hbm_to_vmem [thread:$0]  (!%p1746_p5), %s696_s2, 16, %s698_s3, [#allocation3]  }
  0x19   : > { %1754 = dma.hbm_to_vmem [thread:$0]  (!%p1746_p5), %s723_s6, 16, %s725_s29, [#allocation5]  }
  0x1b   : > { %1917 = dma.done.wait (%p1755_p2), [#allocation3], 16  }
  0x1c   : > { %1919 = vsyncadd (%p1755_p2), [#allocation3], 4294967280 }
  0x1d   : > { %1921 = dma.done.wait (%p1755_p2), [#allocation5], 32  }
  0x1e   : > { %1923 = vsyncadd (%p1755_p2), [#allocation5], 4294967264  ;;  %vm834_vm0 = vcmask 257024   ;;  %s2387_s9 = sld [smem:[#allocation10_spill]]  ;;  %v1931_v2 = vmov 32.0   ;;  %vm880_vm5 = vcmask 261120  }
  0x1f   : > { %1794 = vrcp.f32 %v1931_v2  ;;  %s2388_s2 = sld [smem:[#allocation13_spill]]  ;;  %s2371_s1 = smov 80   ;;  %vm968_vm6 = vcmask 1043456   ;;  %vm911_vm7 = vcmask 130048   ;;  %vm937_vm8 = vcmask 27648  }
  0x20   : > { %s2389_s0 = sld [smem:[#allocation11_spill]]  ;;  %s1933_s3 = smov 64   ;;  %vm964_vm13 = vcmask 31744  }
  0x21   : > { %s2390_s30 = sld [smem:[#allocation12_spill]]  ;;  %s2370_s7 = smov 96  }
  0x22   : > { %s2391_s6 = sld [smem:[#allocation14_spill]]  ;;  %s1935_s29 = smov 48  }
  0x23   : > { %s2372_s28 = smov 112   ;;  %s2392_s4 = sld [smem:[#allocation15_spill]] }
  0x24   : > { %v831_v0 = vld [vmem:[%s2387_s9] sm:$0xf]  ;;  %p823_p6 = scmp.lt.s32.totalorder %s2081_s8, 1  ;;  %s2396_s5 = sld [smem:[#allocation17_spill]] }
  0x25   : > { %v835_v1 = vsel %vm834_vm0, %v831_v0, 0.0  ;;  %v1795_v3 = vpop.eup %1794  ;;  %v875_v14 = vld [vmem:[%s2388_s2 + $0x18] sm:$0xff]  ;;  %v874_v15 = vld [vmem:[%s2388_s2 + $0x10] sm:$0xff]  ;;  %v873_v16 = vld [vmem:[%s2388_s2 + $0x8] sm:$0xff] }
  0x26   : > { %836 = vadd.xlane.f32.xlu0 %v835_v1  ;;  %v839_v4 = vmul.f32 32.0, %v1795_v3  ;;  %vm843_vm1 = vweird.f32 %v1795_v3  ;;  %896 = vmatpush.msra.mxu0 %v875_v14  ;;  %v872_v17 = vld [vmem:[%s2388_s2] sm:$0xff]  ;;  %s2402_s8 = smov (!%p823_p6, %s2081_s8), 1 }
  0x27   : > { %v1778_v27 = vld [vmem:[%s2389_s0] ss:$0 sm:$0xff]  ;;  %s2397_s0 = sld [smem:[#allocation18_spill]] }
  0x28   : > { %v840_v5 = vsub.f32 1.0, %v839_v4  ;;  %897 = vmatpush.msra.mxu0 %v874_v15  ;;  %v1779_v30 = vld [vmem:[%s2390_s30] ss:$0 sm:$0xff]  ;;  %s2393_s30 = sld [smem:[#allocation16_spill]] }
  0x29   : > { %v1780_v33 = vld [vmem:[%s2391_s6] ss:$0 sm:$0xff]  ;;  %v905_v60 = vld [vmem:[%s2392_s4 + $0x8] sm:$0xff]  ;;  %s1703_s6 = sshll.u32 %s2402_s8, 3 }
  0x2a   : > { %v841_v6 = vmul.f32 %v1795_v3, %v840_v5  ;;  %898 = vmatpush.msra.mxu0 %v873_v16  ;;  %v904_v62 = vld [vmem:[%s2392_s4] sm:$0xff] }
  0x2c   : > { %v842_v7 = vadd.f32 %v1795_v3, %v841_v6  ;;  %899 = vmatpush.msra.mxu0 %v872_v17 }
  0x2e   : > { %v2114_v8 = vsel %vm843_vm1, %v1795_v3, %v842_v7 }
  0x99   : > { %v837_v9 = vpop.xlane.xlu0 %836 }
  0x9a   : > { %v845_v10 = vmul.f32 %v2114_v8, %v837_v9  ;;  %v907_v9 = vld [vmem:[%s2392_s4 + $0x18] sm:$0xff] }
  0x9c   : > { %v846_v11 = vsub.f32 %v831_v0, %v845_v10 }
  0x9e   : > { %v847_v12 = vmul.f32 %v846_v11, %v846_v11 }
  0xa0   : > { %v848_v13 = vsel %vm834_vm0, %v847_v12, 0.0 }
  0xa1   : > { %849 = vadd.xlane.f32.xlu0 %v848_v13 }
 0x114   : > { %v850_v18 = vpop.xlane.xlu0 %849 }
 0x115   : > { %v851_v19 = vmul.f32 %v850_v18, %v2114_v8 }
 0x117   : > { %v852_v20 = vadd.f32 1e-05, %v851_v19 }
 0x119   : > { %1796 = vrsqrt.f32 %v852_v20  ;;  %vm859_vm3 = vweird.f32 %v852_v20 }
 0x11f   : > { %v1797_v21 = vpop.eup %1796 }
 0x120   : > { %v854_v22 = vmul.f32 %v1797_v21, %v852_v20  ;;  %vm860_vm2 = vweird.f32 %v1797_v21 }
 0x121   : > { %vm861_vm4 = vmor %vm859_vm3, %vm860_vm2 }
 0x122   : > { %v855_v23 = vmul.f32 %v1797_v21, %v854_v22  ;;  %v906_v22 = vld [vmem:[%s2392_s4 + $0x10] sm:$0xff] }
 0x124   : > { %v856_v24 = vmul.f32 0.5, %v855_v23 }
 0x126   : > { %v857_v25 = vsub.f32 1.5, %v856_v24 }
 0x128   : > { %v858_v26 = vmul.f32 %v1797_v21, %v857_v25 }
 0x12a   : > { %v862_v28 = vsel %vm861_vm4, %v1797_v21, %v858_v26 }
 0x12b   : > { %v863_v29 = vmul.f32 %v862_v28, %v846_v11 }
 0x12d   : > { %v867_v31 = vmul.f32 %v1778_v27, %v863_v29  ;;  %v1781_v27 = vld [vmem:[%s2393_s30] ss:$0 sm:$0xff]  ;;  %s2400_s30 = smov 96  }
 0x12f   : > { %v2137_v32 = vadd.f32 %v1779_v30, %v867_v31 }
 0x131   : > { %1705 = vmatmul.msk.f32.vlgmr.msra.gmra.mxu0 %vm880_vm5, %v2137_v32 }
 0x1ae   : > { %v901_v34 = vpop.f32.mrf.mxu0 }
 0x1af   : > { %v902_v35 = vadd.f32 %v1780_v33, %v901_v34 }
 0x1b1   : > { %993 = vrot.lane.b32.xlu0 %v902_v35, %s2371_s1  ;;  %962 = vrot.lane.b32.xlu2 %v902_v35, %s1933_s3  ;;  %s2394_s1 = sld [smem:[#allocation9_spill]] }
 0x1b2   : > { %909 = vrot.lane.b32.xlu1 %v902_v35, %s2370_s7 }
 0x20b   : > { %v963_v36 = vpop.permute.xlu2 %962 }
 0x20c   : > { %1708 = vmatpush.msk.msra.mxu3 %vm968_vm6, %v963_v36 }
 0x223   : > { %v994_v37 = vpop.permute.xlu0 %993 }
 0x224   : > { %v910_v38 = vpop.permute.xlu1 %909  ;;  %1710 = vmatpush.xpose.msk.msrb.mxu3 %vm911_vm7, %v994_v37  ;;  %v1189_v37 = vld [vmem:[%s2352_s12 + $0x10] sm:$0xff] }
 0x225   : > { %1706 = vmatpush.xpose.msk.msra.mxu1 %vm911_vm7, %v910_v38  ;;  %v1188_v38 = vld [vmem:[%s2352_s12 + $0x8] sm:$0xff] }
 0x228   : > { %1707 = vmatmul.msk.f32.vlgmr.msra.gmra.mxu1 %vm911_vm7, %v902_v35 }
 0x229   : > { %1088 = vmatpush.msrb.mxu1 %v907_v9 }
 0x22b   : > { %1089 = vmatpush.msrb.mxu1 %v906_v22 }
 0x2a5   : > { %v933_v39 = vpop.f32.mrf.mxu1 }
 0x2a6   : > { %v936_v40 = vmul.f32 0.25, %v933_v39  ;;  %v1187_v39 = vld [vmem:[%s2352_s12] sm:$0xff] }
 0x2a8   : > { %v938_v41 = vsel %vm937_vm8, %v936_v40, -inf }
 0x2a9   : > { %939 = vmax.xlane.f32.xlu1 %v938_v41 }
 0x2c2   : > { %1044 = vrot.lane.b32.xlu1 %v902_v35, %s1935_s29  ;;  %s2395_s29 = sld [smem:[#allocation19_spill]] }
 0x2c8   : > { %v1159_v41 = vld [vmem:[%s2395_s29 + $0x18] sm:$0xff] }
 0x2c9   : > { %1179 = vmatpush.msrb.mxu0 %v1159_v41 }
 0x31c   : > { %v940_v42 = vpop.xlane.xlu1 %939 }
 0x31d   : > { %v941_v43 = vsub.f32 %v936_v40, %v940_v42  ;;  %v1158_v42 = vld [vmem:[%s2395_s29 + $0x10] sm:$0xff] }
 0x31e   : > { %1180 = vmatpush.msrb.mxu0 %v1158_v42 }
 0x31f   : > { %v942_v44 = vmul.f32 1.442695, %v941_v43  ;;  %v1157_v43 = vld [vmem:[%s2395_s29 + $0x8] sm:$0xff] }
 0x320   : > { %1181 = vmatpush.msrb.mxu0 %v1157_v43 }
 0x321   : > { %1798 = vpow2.f32 %v942_v44  ;;  %v1156_v44 = vld [vmem:[%s2395_s29] sm:$0xff] }
 0x322   : > { %1182 = vmatpush.msrb.mxu0 %v1156_v44 }
 0x327   : > { %v1799_v45 = vpop.eup %1798 }
 0x328   : > { %v944_v46 = vsel %vm937_vm8, %v1799_v45, 0.0 }
 0x329   : > { %945 = vadd.xlane.f32.xlu2 %v944_v46 }
 0x334   : > { %v1045_v47 = vpop.permute.xlu1 %1044 }
 0x335   : > { %1712 = vmatpush.msk.msra.mxu2 %vm968_vm6, %v1045_v47 }
 0x341   : > { %991 = vrot.lane.b32.xlu2 %v902_v35, %s2372_s28  ;;  %s826_s28 = scalar_lea.vmem %s2394_s1, %s1703_s6  ;;  %s2398_s1 = smov 112  }
 0x342   : > { %v1155_v40 = vld [vmem:[%s826_s28] sm:$0x1f]  ;;  %s2399_s28 = smov 80  }
 0x39c   : > { %v946_v48 = vpop.xlane.xlu2 %945 }
 0x39d   : > { %1800 = vrcp.f32 %v946_v48  ;;  %v958_v52 = vand.u32 2147483648, %v946_v48  ;;  %v956_v54 = vand.u32 2147483647, %v946_v48  ;;  %vm952_vm10 = vweird.f32 %v946_v48 }
 0x39f   : > { %v959_v56 = vor.u32 1.1754944e-38, %v958_v52  ;;  %vm957_vm12 = vcmp.eq.f32.partialorder %v956_v54, 8.507059e+37  ;;  %v1782_v54 = vld [vmem:[%s2396_s5] ss:$0 sm:$0xff] }
 0x3a3   : > { %v1801_v49 = vpop.eup %1800 }
 0x3a4   : > { %v948_v50 = vmul.f32 %v1801_v49, %v946_v48  ;;  %vm953_vm9 = vweird.f32 %v1801_v49  ;;  %v992_v61 = vpop.permute.xlu2 %991 }
 0x3a5   : > { %vm954_vm11 = vmor %vm952_vm10, %vm953_vm9  ;;  %vm1280_vm9 = vcmask 1044480  }
 0x3a6   : > { %v949_v51 = vsub.f32 1.0, %v948_v50 }
 0x3a8   : > { %v950_v53 = vmul.f32 %v1801_v49, %v949_v51 }
 0x3aa   : > { %v951_v55 = vadd.f32 %v1801_v49, %v950_v53 }
 0x3ac   : > { %v955_v57 = vsel %vm954_vm11, %v1801_v49, %v951_v55 }
 0x3ad   : > { %v960_v58 = vsel %vm957_vm12, %v959_v56, %v955_v57  ;;  %v1783_v57 = vld [vmem:[%s2397_s0] ss:$0 sm:$0xff] }
 0x3ae   : > { %v961_v59 = vmul.f32 %v1799_v45, %v960_v58 }
 0x3b0   : > { %1709 = vmatmul.msk.f32.vlgmr.msra.gmra.mxu3 %vm964_vm13, %v961_v59 }
 0x3b1   : > { %1111 = vmatpush.msra.mxu3 %v905_v60  ;;  %v1784_v60 = vld [vmem:[%s2353_s13] ss:$0 sm:$0xff] }
 0x3b3   : > { %1112 = vmatpush.msra.mxu3 %v904_v62 }
 0x3b8   : > { %1711 = vmatmul.msk.f32.vlgmr.msrb.gmra.mxu3 %vm911_vm7, %v992_v61 }
 0x433   : > { %v988_v63 = vpop.f32.mrf.mxu3 }
 0x434   : > { %1715 = vmatmul.msk.f32.vlgmr.msra.gmra.mxu3 %vm911_vm7, %v988_v63  ;;  %v1785_v63 = vld [vmem:[%s2351_s11] ss:$0 sm:$0xff] }
 0x43b   : > { %v1016_v0 = vpop.f32.mrf.mxu3 }
 0x43c   : > { %v1019_v1 = vmul.f32 0.25, %v1016_v0 }
 0x43e   : > { %v1020_v2 = vsel %vm937_vm8, %v1019_v1, -inf }
 0x43f   : > { %1021 = vmax.xlane.f32.xlu0 %v1020_v2 }
 0x4b2   : > { %v1022_v3 = vpop.xlane.xlu0 %1021 }
 0x4b3   : > { %v1023_v4 = vsub.f32 %v1019_v1, %v1022_v3 }
 0x4b5   : > { %v1024_v5 = vmul.f32 1.442695, %v1023_v4 }
 0x4b7   : > { %1802 = vpow2.f32 %v1024_v5  ;;  %v1114_v24 = vpop.f32.mrf.mxu3 }
 0x4bd   : > { %v1803_v6 = vpop.eup %1802 }
 0x4be   : > { %v1026_v7 = vsel %vm937_vm8, %v1803_v6, 0.0  ;;  %vm1249_vm8 = vcmask 35840  }
 0x4bf   : > { %1027 = vadd.xlane.f32.xlu2 %v1026_v7 }
 0x532   : > { %v1028_v10 = vpop.xlane.xlu2 %1027 }
 0x533   : > { %1804 = vrcp.f32 %v1028_v10  ;;  %v1040_v14 = vand.u32 2147483648, %v1028_v10  ;;  %v1038_v16 = vand.u32 2147483647, %v1028_v10  ;;  %vm1034_vm15 = vweird.f32 %v1028_v10 }
 0x535   : > { %v1041_v18 = vor.u32 1.1754944e-38, %v1040_v14  ;;  %vm1039_vm2 = vcmp.eq.f32.partialorder %v1038_v16, 8.507059e+37 }
 0x539   : > { %v1805_v11 = vpop.eup %1804 }
 0x53a   : > { %v1030_v12 = vmul.f32 %v1805_v11, %v1028_v10  ;;  %vm1035_vm14 = vweird.f32 %v1805_v11 }
 0x53b   : > { %vm1036_vm1 = vmor %vm1034_vm15, %vm1035_vm14 }
 0x53c   : > { %v1031_v13 = vsub.f32 1.0, %v1030_v12 }
 0x53e   : > { %v1032_v15 = vmul.f32 %v1805_v11, %v1031_v13 }
 0x540   : > { %v1033_v17 = vadd.f32 %v1805_v11, %v1032_v15 }
 0x542   : > { %v1037_v19 = vsel %vm1036_vm1, %v1805_v11, %v1033_v17 }
 0x543   : > { %v1042_v20 = vsel %vm1039_vm2, %v1041_v18, %v1037_v19  ;;  %vm1276_vm2 = vcmask 39936  }
 0x544   : > { %v1043_v21 = vmul.f32 %v1803_v6, %v1042_v20 }
 0x546   : > { %1713 = vmatmul.msk.f32.vlgmr.msra.gmra.mxu2 %vm964_vm13, %v1043_v21 }
 0x5c9   : > { %v1068_v23 = vpop.f32.mrf.mxu2 }
 0x5ca   : > { %1714 = vmatmul.msk.f32.vlgmr.msrb.gmra.mxu1 %vm911_vm7, %v1068_v23  ;;  %v1221_v23 = vld [vmem:[%s2354_s14 + $0x18] sm:$0xff] }
 0x647   : > { %v1091_v25 = vpop.f32.mrf.mxu1 }
 0x648   : > { %v1115_v26 = vadd.f32 %v1114_v24, %v1091_v25 }
 0x64a   : > { %v1117_v28 = vadd.f32 %v1115_v26, %v2137_v32  ;;  %v1190_v32 = vld [vmem:[%s2352_s12 + $0x18] sm:$0xff] }
 0x64b   : > { %1210 = vmatpush.msrb.mxu2 %v1190_v32 }
 0x64c   : > { %v1122_v29 = vadd.f32 %v1781_v27, %v1117_v28 }
 0x64d   : > { %1211 = vmatpush.msrb.mxu2 %v1189_v37 }
 0x64e   : > { %v1125_v30 = vsel %vm834_vm0, %v1122_v29, 0.0 }
 0x64f   : > { %1126 = vadd.xlane.f32.xlu1 %v1125_v30  ;;  %1212 = vmatpush.msrb.mxu2 %v1188_v38 }
 0x651   : > { %1213 = vmatpush.msrb.mxu2 %v1187_v39 }
 0x652   : > { %1717 = vmatmul.msk.f32.vlgmr.msrb.gmra.mxu2 %vm880_vm5, %v1155_v40 }
 0x6c2   : > { %v1127_v31 = vpop.xlane.xlu1 %1126 }
 0x6c3   : > { %v1128_v33 = vmul.f32 %v1127_v31, %v2114_v8 }
 0x6c5   : > { %v1129_v34 = vsub.f32 %v1122_v29, %v1128_v33 }
 0x6c7   : > { %v1130_v35 = vmul.f32 %v1129_v34, %v1129_v34 }
 0x6c9   : > { %v1131_v36 = vsel %vm834_vm0, %v1130_v35, 0.0 }
 0x6ca   : > { %1132 = vadd.xlane.f32.xlu0 %v1131_v36 }
 0x6d5   : > { %v1215_v61 = vpop.f32.mrf.mxu2 }
 0x6d6   : > { %v1216_v62 = vadd.f32 %v1784_v60, %v1215_v61 }
 0x6d8   : > { %1718 = vmatpush.xpose.msk.msra.mxu1 %vm911_vm7, %v1216_v62  ;;  %1305 = vrot.lane.b32.xlu2 %v1216_v62, %s2398_s1 }
 0x6dc   : > { %1400 = vmatpush.msrb.mxu1 %v1221_v23  ;;  %v1512_v23 = vld [vmem:[%s2360_s20 + $0x28] sm:$0xff] }
 0x732   : > { %v1306_v2 = vpop.permute.xlu2 %1305 }
 0x733   : > { %1722 = vmatpush.xpose.msk.msra.mxu0 %vm911_vm7, %v1306_v2  ;;  %v1470_v2 = vld [vmem:[%s2358_s18 + $0x18] sm:$0xff] }
 0x73d   : > { %v1133_v45 = vpop.xlane.xlu0 %1132 }
 0x73e   : > { %v1134_v46 = vmul.f32 %v1133_v45, %v2114_v8 }
 0x740   : > { %v1135_v47 = vadd.f32 1e-05, %v1134_v46 }
 0x742   : > { %1806 = vrsqrt.f32 %v1135_v47  ;;  %vm1142_vm4 = vweird.f32 %v1135_v47 }
 0x748   : > { %v1807_v48 = vpop.eup %1806 }
 0x749   : > { %v1137_v49 = vmul.f32 %v1807_v48, %v1135_v47  ;;  %vm1143_vm3 = vweird.f32 %v1807_v48 }
 0x74a   : > { %vm1144_vm6 = vmor %vm1142_vm4, %vm1143_vm3 }
 0x74b   : > { %v1138_v50 = vmul.f32 %v1807_v48, %v1137_v49  ;;  %v1219_v49 = vld [vmem:[%s2354_s14 + $0x8] sm:$0xff] }
 0x74d   : > { %v1139_v51 = vmul.f32 0.5, %v1138_v50  ;;  %v1218_v50 = vld [vmem:[%s2354_s14] sm:$0xff] }
 0x74f   : > { %v1140_v52 = vsub.f32 1.5, %v1139_v51 }
 0x751   : > { %v1141_v53 = vmul.f32 %v1807_v48, %v1140_v52 }
 0x753   : > { %v1145_v55 = vsel %vm1144_vm6, %v1807_v48, %v1141_v53  ;;  %v1220_v48 = vld [vmem:[%s2354_s14 + $0x10] sm:$0xff] }
 0x754   : > { %v1146_v56 = vmul.f32 %v1145_v55, %v1129_v34  ;;  %1401 = vmatpush.msrb.mxu1 %v1220_v48 }
 0x756   : > { %v1150_v58 = vmul.f32 %v1782_v54, %v1146_v56  ;;  %v1786_v56 = vld [vmem:[%s2355_s15] ss:$0 sm:$0xff] }
 0x758   : > { %v2220_v59 = vadd.f32 %v1783_v57, %v1150_v58 }
 0x75a   : > { %1716 = vmatmul.msk.f32.vlgmr.msrb.gmra.mxu0 %vm880_vm5, %v2220_v59 }
 0x75b   : > { %1490 = vmatpush.msrb.mxu0 %v1470_v2 }
 0x7d7   : > { %v1184_v0 = vpop.f32.mrf.mxu0 }
 0x7d8   : > { %v1185_v1 = vadd.f32 %v1785_v63, %v1184_v0 }
 0x7da   : > { %1303 = vrot.lane.b32.xlu0 %v1185_v1, %s2398_s1  ;;  %1719 = vmatmul.msk.f32.vlgmr.msra.gmra.mxu1 %vm911_vm7, %v1185_v1  ;;  %s1704_s1 = sshll.u32 %s2402_s8, 2 }
 0x84c   : > { %v1304_v3 = vpop.permute.xlu0 %1303 }
 0x84d   : > { %1723 = vmatmul.msk.f32.vlgmr.msra.gmra.mxu0 %vm911_vm7, %v1304_v3  ;;  %v1468_v3 = vld [vmem:[%s2358_s18 + $0x8] sm:$0xff] }
 0x857   : > { %v1245_v4 = vpop.f32.mrf.mxu1 }
 0x858   : > { %v1248_v5 = vmul.f32 0.25, %v1245_v4  ;;  %v1467_v4 = vld [vmem:[%s2358_s18] sm:$0xff] }
 0x85a   : > { %v1250_v6 = vsel %vm1249_vm8, %v1248_v5, -inf }
 0x85b   : > { %1251 = vmax.xlane.f32.xlu2 %v1250_v6 }
 0x873   : > { %1356 = vrot.lane.b32.xlu2 %v1216_v62, %s2399_s28  ;;  %s830_s28 = scalar_lea.vmem %s2366_s26, %s1704_s1 }
 0x8ca   : > { %v1328_v7 = vpop.f32.mrf.mxu0 }
 0x8cb   : > { %v1331_v9 = vmul.f32 0.25, %v1328_v7 }
 0x8cd   : > { %v1332_v10 = vsel %vm1249_vm8, %v1331_v9, -inf }
 0x8ce   : > { %1333 = vmax.xlane.f32.xlu0 %v1332_v10  ;;  %v1252_v11 = vpop.xlane.xlu2 %1251 }
 0x8cf   : > { %v1253_v12 = vsub.f32 %v1248_v5, %v1252_v11 }
 0x8d1   : > { %v1254_v13 = vmul.f32 1.442695, %v1253_v12 }
 0x8d3   : > { %1808 = vpow2.f32 %v1254_v13 }
 0x8d6   : > { %v1357_v14 = vpop.permute.xlu2 %1356 }
 0x8d7   : > { %1724 = vmatpush.msk.msra.mxu2 %vm1280_vm9, %v1357_v14 }
 0x8d9   : > { %v1809_v15 = vpop.eup %1808 }
 0x8da   : > { %v1256_v16 = vsel %vm1249_vm8, %v1809_v15, 0.0 }
 0x8db   : > { %1257 = vadd.xlane.f32.xlu1 %v1256_v16 }
 0x941   : > { %v1334_v17 = vpop.xlane.xlu0 %1333 }
 0x942   : > { %v1335_v18 = vsub.f32 %v1331_v9, %v1334_v17 }
 0x944   : > { %v1336_v19 = vmul.f32 1.442695, %v1335_v18  ;;  %v1788_v18 = vld [vmem:[%s2357_s17] ss:$0 sm:$0xff] }
 0x946   : > { %1810 = vpow2.f32 %v1336_v19 }
 0x94c   : > { %v1811_v20 = vpop.eup %1810 }
 0x94d   : > { %v1338_v21 = vsel %vm1249_vm8, %v1811_v20, 0.0  ;;  %vm1519_vm8 = vcmask 523264  }
 0x94e   : > { %1339 = vadd.xlane.f32.xlu1 %v1338_v21  ;;  %v1258_v22 = vpop.xlane.xlu1 %1257  ;;  %v1514_v21 = vld [vmem:[%s2360_s20 + $0x38] sm:$0xff] }
 0x94f   : > { %1812 = vrcp.f32 %v1258_v22  ;;  %v1270_v37 = vand.u32 2147483648, %v1258_v22  ;;  %vm1264_vm14 = vweird.f32 %v1258_v22  ;;  %v1268_v39 = vand.u32 2147483647, %v1258_v22  ;;  %1531 = vmatpush.msrb.mxu2 %v1514_v21 }
 0x951   : > { %v1271_v44 = vor.u32 1.1754944e-38, %v1270_v37  ;;  %vm1269_vm3 = vcmp.eq.f32.partialorder %v1268_v39, 8.507059e+37 }
 0x955   : > { %v1813_v24 = vpop.eup %1812 }
 0x956   : > { %v1260_v26 = vmul.f32 %v1813_v24, %v1258_v22  ;;  %vm1265_vm11 = vweird.f32 %v1813_v24  ;;  %v1513_v22 = vld [vmem:[%s2360_s20 + $0x30] sm:$0xff] }
 0x957   : > { %vm1266_vm1 = vmor %vm1264_vm14, %vm1265_vm11  ;;  %1532 = vmatpush.msrb.mxu2 %v1513_v22 }
 0x958   : > { %v1261_v27 = vsub.f32 1.0, %v1260_v26  ;;  %v1509_v26 = vld [vmem:[%s2360_s20 + $0x10] sm:$0xff] }
 0x959   : > { %1533 = vmatpush.msrb.mxu2 %v1512_v23 }
 0x95a   : > { %v1262_v30 = vmul.f32 %v1813_v24, %v1261_v27  ;;  %v1508_v27 = vld [vmem:[%s2360_s20 + $0x8] sm:$0xff] }
 0x95c   : > { %v1263_v36 = vadd.f32 %v1813_v24, %v1262_v30 }
 0x95e   : > { %v1267_v42 = vsel %vm1266_vm1, %v1813_v24, %v1263_v36  ;;  %v1511_v24 = vld [vmem:[%s2360_s20 + $0x20] sm:$0xff] }
 0x95f   : > { %v1272_v45 = vsel %vm1269_vm3, %v1271_v44, %v1267_v42  ;;  %1534 = vmatpush.msrb.mxu2 %v1511_v24 }
 0x960   : > { %v1273_v47 = vmul.f32 %v1809_v15, %v1272_v45  ;;  %v1787_v15 = vld [vmem:[%s2356_s16] ss:$0 sm:$0xff] }
 0x967   : > { %1274 = vrot.lane.b32.xlu1 %v1216_v62, %s2400_s30 }
 0x9c1   : > { %v1340_v25 = vpop.xlane.xlu1 %1339 }
 0x9c2   : > { %1814 = vrcp.f32 %v1340_v25  ;;  %v1352_v33 = vand.u32 2147483648, %v1340_v25  ;;  %v1350_v35 = vand.u32 2147483647, %v1340_v25  ;;  %vm1346_vm12 = vweird.f32 %v1340_v25 }
 0x9c4   : > { %v1353_v38 = vor.u32 1.1754944e-38, %v1352_v33  ;;  %vm1351_vm15 = vcmp.eq.f32.partialorder %v1350_v35, 8.507059e+37 }
 0x9c8   : > { %v1815_v28 = vpop.eup %1814 }
 0x9c9   : > { %v1342_v29 = vmul.f32 %v1815_v28, %v1340_v25  ;;  %vm1347_vm10 = vweird.f32 %v1815_v28  ;;  %v1510_v25 = vld [vmem:[%s2360_s20 + $0x18] sm:$0xff] }
 0x9ca   : > { %vm1348_vm13 = vmor %vm1346_vm12, %vm1347_vm10  ;;  %1535 = vmatpush.msrb.mxu2 %v1510_v25 }
 0x9cb   : > { %v1343_v31 = vsub.f32 1.0, %v1342_v29  ;;  %v1789_v29 = vld [vmem:[%s2359_s19] ss:$0 sm:$0xff] }
 0x9cc   : > { %1536 = vmatpush.msrb.mxu2 %v1509_v26 }
 0x9cd   : > { %v1344_v34 = vmul.f32 %v1815_v28, %v1343_v31 }
 0x9ce   : > { %1537 = vmatpush.msrb.mxu2 %v1508_v27 }
 0x9cf   : > { %v1345_v32 = vadd.f32 %v1815_v28, %v1344_v34 }
 0x9d1   : > { %v1349_v40 = vsel %vm1348_vm13, %v1815_v28, %v1345_v32  ;;  %v1507_v28 = vld [vmem:[%s2360_s20] sm:$0xff] }
 0x9d2   : > { %v1354_v41 = vsel %vm1351_vm15, %v1353_v38, %v1349_v40  ;;  %1538 = vmatpush.msrb.mxu2 %v1507_v28 }
 0x9d3   : > { %v1355_v43 = vmul.f32 %v1811_v20, %v1354_v41  ;;  %v1790_v41 = vld [vmem:[%s2361_s21] ss:$0 sm:$0xff] }
 0x9d5   : > { %1725 = vmatmul.msk.f32.vlgmr.msra.gmra.mxu2 %vm1276_vm2, %v1355_v43 }
 0x9d9   : > { %v1275_v46 = vpop.permute.xlu1 %1274 }
 0x9da   : > { %1720 = vmatpush.msk.msrb.mxu3 %vm1280_vm9, %v1275_v46 }
 0x9db   : > { %1721 = vmatmul.msk.f32.vlgmr.msrb.gmra.mxu3 %vm1276_vm2, %v1273_v47 }
 0x9dc   : > { %1423 = vmatpush.msra.mxu3 %v1219_v49 }
 0x9de   : > { %1424 = vmatpush.msra.mxu3 %v1218_v50 }
 0xa58   : > { %v1380_v51 = vpop.f32.mrf.mxu2 }
 0xa59   : > { %1726 = vmatmul.msk.f32.vlgmr.msrb.gmra.mxu1 %vm911_vm7, %v1380_v51  ;;  %v1579_v51 = vld [vmem:[%s2364_s24 + $0x18] sm:$0xff] }
 0xa5a   : > { %1599 = vmatpush.msra.mxu1 %v1579_v51 }
 0xa5e   : > { %v1300_v52 = vpop.f32.mrf.mxu3 }
 0xa5f   : > { %1727 = vmatmul.msk.f32.vlgmr.msra.gmra.mxu3 %vm911_vm7, %v1300_v52  ;;  %v1578_v52 = vld [vmem:[%s2364_s24 + $0x10] sm:$0xff] }
 0xa60   : > { %1600 = vmatpush.msra.mxu1 %v1578_v52 }
 0xad6   : > { %v1403_v53 = vpop.f32.mrf.mxu1 }
 0xae2   : > { %v1426_v54 = vpop.f32.mrf.mxu3 }
 0xae3   : > { %v1427_v55 = vadd.f32 %v1426_v54, %v1403_v53  ;;  %v1577_v53 = vld [vmem:[%s2364_s24 + $0x8] sm:$0xff]  ;;  %v1576_v54 = vld [vmem:[%s2364_s24] sm:$0xff] }
 0xae4   : > { %1601 = vmatpush.msra.mxu1 %v1577_v53 }
 0xae5   : > { %v1429_v57 = vadd.f32 %v1427_v55, %v2220_v59  ;;  %v1469_v59 = vld [vmem:[%s2358_s18 + $0x10] sm:$0xff] }
 0xae6   : > { %1491 = vmatpush.msrb.mxu0 %v1469_v59  ;;  %1602 = vmatpush.msra.mxu1 %v1576_v54 }
 0xae7   : > { %v1434_v58 = vadd.f32 %v1786_v56, %v1429_v57 }
 0xae8   : > { %1492 = vmatpush.msrb.mxu0 %v1468_v3  ;;  %v1792_v3 = vld [vmem:[#allocation4] ss:$0 sm:$0xff] }
 0xae9   : > { %v1437_v60 = vsel %vm834_vm0, %v1434_v58, 0.0 }
 0xaea   : > { %1438 = vadd.xlane.f32.xlu0 %v1437_v60  ;;  %1493 = vmatpush.msrb.mxu0 %v1467_v4 }
 0xb5d   : > { %v1439_v61 = vpop.xlane.xlu0 %1438 }
 0xb5e   : > { %v1440_v62 = vmul.f32 %v1439_v61, %v2114_v8 }
 0xb60   : > { %v1441_v63 = vsub.f32 %v1434_v58, %v1440_v62 }
 0xb62   : > { %v1442_v0 = vmul.f32 %v1441_v63, %v1441_v63 }
 0xb64   : > { %v1443_v1 = vsel %vm834_vm0, %v1442_v0, 0.0 }
 0xb65   : > { %1444 = vadd.xlane.f32.xlu0 %v1443_v1  ;;  %v1791_v1 = vld [vmem:[#allocation2] ss:$0 sm:$0xff] }
 0xbd8   : > { %v1445_v5 = vpop.xlane.xlu0 %1444 }
 0xbd9   : > { %v1446_v6 = vmul.f32 %v1445_v5, %v2114_v8 }
 0xbdb   : > { %v1447_v7 = vadd.f32 1e-05, %v1446_v6 }
 0xbdd   : > { %1816 = vrsqrt.f32 %v1447_v7  ;;  %vm1454_vm4 = vweird.f32 %v1447_v7 }
 0xbe3   : > { %v1817_v9 = vpop.eup %1816 }
 0xbe4   : > { %v1449_v10 = vmul.f32 %v1817_v9, %v1447_v7  ;;  %vm1455_vm7 = vweird.f32 %v1817_v9 }
 0xbe5   : > { %vm1456_vm6 = vmor %vm1454_vm4, %vm1455_vm7 }
 0xbe6   : > { %v1450_v11 = vmul.f32 %v1817_v9, %v1449_v10 }
 0xbe8   : > { %v1451_v12 = vmul.f32 0.5, %v1450_v11 }
 0xbea   : > { %v1452_v13 = vsub.f32 1.5, %v1451_v12 }
 0xbec   : > { %v1453_v14 = vmul.f32 %v1817_v9, %v1452_v13 }
 0xbee   : > { %v1457_v16 = vsel %vm1456_vm6, %v1817_v9, %v1453_v14 }
 0xbef   : > { %v1458_v17 = vmul.f32 %v1457_v16, %v1441_v63 }
 0xbf1   : > { %v1462_v19 = vmul.f32 %v1787_v15, %v1458_v17 }
 0xbf3   : > { %v1466_v20 = vadd.f32 %v1788_v18, %v1462_v19 }
 0xbf5   : > { %1728 = vmatmul.msk.f32.vlgmr.msrb.gmra.mxu0 %vm880_vm5, %v1466_v20 }
 0xc72   : > { %v1495_v30 = vpop.f32.mrf.mxu0 }
 0xc73   : > { %v1496_v31 = vadd.f32 %v1789_v29, %v1495_v30 }
 0xc75   : > { %v1498_v33 = vmul.f32 %v1496_v31, %v1496_v31 }
 0xc77   : > { %v1499_v34 = vmul.f32 %v1498_v33, %v1496_v31 }
 0xc79   : > { %v1500_v35 = vmul.f32 0.044715, %v1499_v34 }
 0xc7b   : > { %v1501_v36 = vadd.f32 %v1500_v35, %v1496_v31 }
 0xc7d   : > { %v1502_v32 = vmul.f32 0.7978846, %v1501_v36 }
 0xc7f   : > { %1818 = vtanh.f32 %v1502_v32 }
 0xc85   : > { %v1819_v37 = vpop.eup %1818 }
 0xc86   : > { %v1504_v38 = vadd.f32 1.0, %v1819_v37 }
 0xc88   : > { %v1505_v39 = vmul.f32 0.5, %v1504_v38 }
 0xc8a   : > { %v1506_v40 = vmul.f32 %v1505_v39, %v1496_v31 }
 0xc8c   : > { %1729 = vmatmul.msk.f32.vlgmr.msrb.gmra.mxu2 %vm1519_vm8, %v1506_v40 }
 0xd0f   : > { %v1540_v42 = vpop.f32.mrf.mxu2 }
 0xd10   : > { %v1541_v43 = vadd.f32 %v1790_v41, %v1540_v42 }
 0xd12   : > { %v1543_v44 = vadd.f32 %v1541_v43, %v1466_v20 }
 0xd14   : > { %v1546_v45 = vsel %vm834_vm0, %v1543_v44, 0.0 }
 0xd15   : > { %1547 = vadd.xlane.f32.xlu1 %v1546_v45 }
 0xd88   : > { %v1548_v46 = vpop.xlane.xlu1 %1547 }
 0xd89   : > { %v1549_v47 = vmul.f32 %v1548_v46, %v2114_v8 }
 0xd8b   : > { %v1550_v48 = vsub.f32 %v1543_v44, %v1549_v47 }
 0xd8d   : > { %v1551_v49 = vmul.f32 %v1550_v48, %v1550_v48 }
 0xd8f   : > { %v1552_v50 = vsel %vm834_vm0, %v1551_v49, 0.0 }
 0xd90   : > { %1553 = vadd.xlane.f32.xlu0 %v1552_v50 }
 0xe03   : > { %v1554_v55 = vpop.xlane.xlu0 %1553 }
 0xe04   : > { %v1555_v56 = vmul.f32 %v1554_v55, %v2114_v8  ;;  %v1793_v8 = vld [vmem:[#allocation6] ss:$0 sm:$0xff] }
 0xe06   : > { %v1556_v57 = vadd.f32 1e-05, %v1555_v56 }
 0xe08   : > { %1820 = vrsqrt.f32 %v1556_v57  ;;  %vm1563_vm10 = vweird.f32 %v1556_v57 }
 0xe0e   : > { %v1821_v58 = vpop.eup %1820 }
 0xe0f   : > { %v1558_v60 = vmul.f32 %v1821_v58, %v1556_v57  ;;  %vm1564_vm9 = vweird.f32 %v1821_v58 }
 0xe10   : > { %vm1565_vm11 = vmor %vm1563_vm10, %vm1564_vm9 }
 0xe11   : > { %v1559_v61 = vmul.f32 %v1821_v58, %v1558_v60 }
 0xe13   : > { %v1560_v62 = vmul.f32 0.5, %v1559_v61 }
 0xe15   : > { %v1561_v63 = vsub.f32 1.5, %v1560_v62 }
 0xe17   : > { %v1562_v0 = vmul.f32 %v1821_v58, %v1561_v63 }
 0xe19   : > { %v1566_v2 = vsel %vm1565_vm11, %v1821_v58, %v1562_v0 }
 0xe1a   : > { %v1567_v59 = vmul.f32 %v1566_v2, %v1550_v48 }
 0xe1c   : > { %v1571_v4 = vmul.f32 %v1791_v1, %v1567_v59 }
 0xe1e   : > { %v1575_v5 = vadd.f32 %v1792_v3, %v1571_v4 }
 0xe20   : > { %1730 = vmatmul.msk.f32.vlgmr.msra.gmra.mxu1 %vm880_vm5, %v1575_v5 }
 0xe9d   : > { %v1604_v6 = vpop.f32.mrf.mxu1 }
 0xe9e   : > { %v1605_v7 = vadd.f32 %v1793_v8, %v1604_v6 }
 0xea0   : > { %1607 = vst.msk [vmem:[%s830_s28] sm:$0xf] %vm834_vm0, %v1605_v7 }
 0xea1 PF: > { %s38_s27 = sadd.s32 1, %s1926_s27  }
 0xea2   : > { %p35_p7 = scmp.ge.s32.totalorder %s38_s27, 4  }
 0xea4   :  { %37 = sbr.rel (!%p35_p7) target bundleno = 14 (0xe), region = 167 }
 0xea9   :  { %1627 = vsyncpa [#allocation3], 1 }
 0xeaa   :  { %1629 = vsyncpa [#allocation3 + $0x1], 1 }
 0xeab   :  { %1630 = vsyncpa [#allocation5], 1 }

// kernel: mim_forward.6
= control target key start
LH: loop header
LB: loop body
LE: loop exit
PB: predicated region body
PF: predicated region fallthrough
CT: control target
= control target key end

     0   :  { %s2749_s17 = smov 0   ;;  %s3391_s0 = inlined_call_operand.vmem [shape: f32[32,32], index: 0, kind: input, shape index: {}]   ;;  %s3392_s1 = inlined_call_operand.vmem [shape: f32[2,16,16], index: 1, kind: input, shape index: {}]   ;;  %s3393_s2 = inlined_call_operand.vmem [shape: f32[32,32], index: 2, kind: input, shape index: {}]   ;;  %s3394_s3 = inlined_call_operand.vmem [shape: f32[32,32], index: 3, kind: input, shape index: {}]   ;;  %s3395_s4 = inlined_call_operand.vmem [shape: f32[32,32], index: 4, kind: input, shape index: {}]   ;;  %s3396_s5 = inlined_call_operand.vmem [shape: f32[2,1,32], index: 5, kind: input, shape index: {}]   ;;  %s3397_s6 = inlined_call_operand.vmem [shape: f32[2,1,32], index: 6, kind: input, shape index: {}]   ;;  %s3398_s7 = inlined_call_operand.vmem [shape: f32[2,32,96], index: 7, kind: input, shape index: {}]   ;;  %s3399_s8 = inlined_call_operand.vmem [shape: f32[2,32,32], index: 8, kind: input, shape index: {}]   ;;  %s3400_s9 = inlined_call_operand.vmem [shape: f32[2,32,128], index: 9, kind: input, shape index: {}]   ;;  %s3401_s10 = inlined_call_operand.vmem [shape: f32[2,64,32], index: 10, kind: input, shape index: {}]   ;;  %s3402_s11 = inlined_call_operand.vmem [shape: f32[32,32], index: 11, kind: output, shape index: {}]  }
   0x1 LB: > { %s2388_s18 = sadd.s32 4294967295, %s2674_s17   ;;  %p2391_p0 = scmp.ge.s32.totalorder %s2674_s17, 1  ;;  %s2674_s17 = sphi %s2749_s17, %s21_s17  }
   0x2   : > { %p378_p1 = scmp.lt.s32.totalorder %s2674_s17, 3 }
   0x4   : > { %p379_p2 = pnand %p2391_p0, %p378_p1 }
   0x5   : > { %p434_p3 = scmp.lt.s32.totalorder (!%p379_p2), %s2388_s18, 1  ;;  %p2400_p4 = scmp.ne.s32.totalorder (!%p379_p2), %s2388_s18, 0 }
   0x6   : > { %382 = sbr.rel (%p379_p2) target bundleno = 3106 (0xc22), region = 64 }
   0xb   : > { %s2757_s19 = scalar_select %p434_p3, %s2388_s18, 1 }
   0xc   : > { %463 = sbr.rel (%p2400_p4) target bundleno = 22 (0x16), region = 68 }
   0xd   : > { %s436_s22 = scalar_lea.vmem %s3396_s5, %s2757_s19  ;;  %s2493_s26 = sshll.u32 %s2757_s19, 5 }
   0xe   : > { %s2496_s27 = sshll.u32 %s2757_s19, 6  ;;  %s2772_s30 = scalar_lea.vmem %s3398_s7, %s2493_s26 }
   0xf   : > { %s2777_s14 = scalar_lea.vmem %s3399_s8, %s2493_s26  ;;  %s2782_s20 = scalar_lea.vmem %s3400_s9, %s2493_s26 }
  0x10   : > { %s2787_s24 = scalar_lea.vmem %s3401_s10, %s2496_s27 }
  0x11   : > { %v464_v0 = vld [vmem:[%s3391_s0] sm:$0xff]  ;;  %vm468_vm0 = vcmask 261120   ;;  %v465_v1 = vld [vmem:[%s3391_s0 + $0x8] sm:$0xff]  ;;  %v466_v2 = vld [vmem:[%s3391_s0 + $0x10] sm:$0xff] }
  0x12   : > { %469 = vst.msk [vmem:[#allocation2] sm:$0xff] %vm468_vm0, %v464_v0  ;;  %v467_v3 = vld [vmem:[%s3391_s0 + $0x18] sm:$0xff] }
  0x13   : > { %470 = vst.msk [vmem:[#allocation2 + $0x8] sm:$0xff] %vm468_vm0, %v465_v1 }
  0x14   : > { %471 = vst.msk [vmem:[#allocation2 + $0x10] sm:$0xff] %vm468_vm0, %v466_v2 }
  0x15   : > { %472 = vst.msk [vmem:[#allocation2 + $0x18] sm:$0xff] %vm468_vm0, %v467_v3 }
  0x16 PF: > { %vm494_vm1 = vcmask 261120   ;;  %v2676_v16 = vmov 32.0   ;;  %v576_v20 = vld [vmem:[%s2772_s30 + $0x18] sm:$0xff]  ;;  %v575_v21 = vld [vmem:[%s2772_s30 + $0x10] sm:$0xff]  ;;  %v574_v23 = vld [vmem:[%s2772_s30 + $0x8] sm:$0xff]  ;;  %s2677_s27 = smov 32  }
  0x17   : > { %2566 = vrcp.f32 %v2676_v16  ;;  %601 = vmatpush.msra.mxu0 %v576_v20  ;;  %v573_v24 = vld [vmem:[%s2772_s30] sm:$0xff]  ;;  %v2831_v30 = vld [vmem:[%s3393_s2 + $0x8] sm:$0xff]  ;;  %v488_v49 = vld [vmem:[%s3395_s4 + $0x18] sm:$0xff]  ;;  %s2678_s16 = smov 96   ;;  %s2679_s29 = smov 120   ;;  %vm772_vm15 = vcmask 64512  }
  0x18   : > { %v487_v50 = vld [vmem:[%s3395_s4 + $0x10] sm:$0xff]  ;;  %646 = vmatpush.msra.mxu1 %v488_v49  ;;  %2497 = vmatpush.msra.mxu2 %v488_v49  ;;  %v2564_v54 = vld [vmem:[%s436_s22] ss:$0 sm:$0xff]  ;;  %v486_v55 = vld [vmem:[%s3395_s4 + $0x8] sm:$0xff]  ;;  %s2680_s12 = smov 112   ;;  %s2681_s13 = smov 88  }
  0x19   : > { %v2801_v4 = vld [vmem:[#allocation2] sm:$0xff]  ;;  %602 = vmatpush.msra.mxu0 %v575_v21  ;;  %s2682_s15 = smov 80   ;;  %vm810_vm0 = vcmask 130048   ;;  %s2683_s30 = smov 56  }
  0x1a   : > { %v490_v6 = vmul.f32 %v2801_v4, %v2801_v4  ;;  %v2809_v8 = vld [vmem:[#allocation2 + $0x8] sm:$0xff]  ;;  %647 = vmatpush.msra.mxu1 %v487_v50  ;;  %2498 = vmatpush.msra.mxu2 %v487_v50  ;;  %v477_v20 = vld [vmem:[%s3393_s2] sm:$0xff]  ;;  %s2684_s21 = smov 48   ;;  %s2685_s22 = smov 64  }
  0x1b   : > { %v2803_v5 = vld [vmem:[#allocation2 + $0x10] sm:$0xff]  ;;  %v491_v12 = vmul.f32 %v2809_v8, %v2809_v8  ;;  %603 = vmatpush.msra.mxu0 %v574_v23  ;;  %s2687_s26 = smov 104   ;;  %s2688_s28 = smov 40  }
  0x1c   : > { %v492_v7 = vmul.f32 %v2803_v5, %v2803_v5  ;;  %v2811_v9 = vld [vmem:[#allocation2 + $0x18] sm:$0xff]  ;;  %v495_v10 = vsel %vm494_vm1, %v490_v6, 0.0  ;;  %648 = vmatpush.msra.mxu1 %v486_v55  ;;  %2499 = vmatpush.msra.mxu2 %v486_v55 }
  0x1d   : > { %496 = vadd.xlane.f32.xlu0 %v495_v10  ;;  %v493_v13 = vmul.f32 %v2811_v9, %v2811_v9  ;;  %v498_v14 = vsel %vm494_vm1, %v491_v12, 0.0  ;;  %v2567_v17 = vpop.eup %2566  ;;  %604 = vmatpush.msra.mxu0 %v573_v24 }
  0x1e   : > { %v501_v11 = vsel %vm494_vm1, %v492_v7, 0.0  ;;  %v508_v18 = vmul.f32 32.0, %v2567_v17  ;;  %vm512_vm2 = vweird.f32 %v2567_v17 }
  0x1f   : > { %502 = vadd.xlane.f32.xlu1 %v501_v11  ;;  %v504_v15 = vsel %vm494_vm1, %v493_v13, 0.0  ;;  %719 = vmatpush.msrb.mxu0 %v488_v49 }
  0x20   : > { %v509_v19 = vsub.f32 1.0, %v508_v18 }
  0x21   : > { %720 = vmatpush.msrb.mxu0 %v487_v50 }
  0x22   : > { %v510_v22 = vmul.f32 %v2567_v17, %v509_v19 }
  0x23   : > { %721 = vmatpush.msrb.mxu0 %v486_v55 }
  0x24   : > { %v511_v25 = vadd.f32 %v2567_v17, %v510_v22 }
  0x25   : > { %499 = vadd.xlane.f32.xlu0 %v498_v14 }
  0x26   : > { %v2825_v26 = vsel %vm512_vm2, %v2567_v17, %v511_v25  ;;  %v482_v25 = vld [vmem:[%s3394_s3 + $0x8] sm:$0xff] }
  0x27   : > { %505 = vadd.xlane.f32.xlu1 %v504_v15 }
  0x39   : > { %677 = vrot.lane.b32.xlu0 %v2831_v30, %s2677_s27 }
  0x90   : > { %v497_v27 = vpop.xlane.xlu0 %496 }
  0x91   : > { %v514_v28 = vmul.f32 %v2825_v26, %v497_v27 }
  0x92   : > { %v503_v31 = vpop.xlane.xlu1 %502 }
  0x93   : > { %v518_v29 = vadd.f32 1e-06, %v514_v28  ;;  %v516_v32 = vmul.f32 %v2825_v26, %v503_v31 }
  0x95   : > { %2568 = vrsqrt.f32 %v518_v29  ;;  %v520_v33 = vadd.f32 1e-06, %v516_v32  ;;  %vm528_vm4 = vweird.f32 %v518_v29 }
  0x97   : > { %2570 = vrsqrt.f32 %v520_v33  ;;  %vm548_vm6 = vweird.f32 %v520_v33 }
  0x98   : > { %v500_v34 = vpop.xlane.xlu0 %499 }
  0x99   : > { %v515_v35 = vmul.f32 %v2825_v26, %v500_v34 }
  0x9a   : > { %v506_v38 = vpop.xlane.xlu1 %505 }
  0x9b   : > { %v2569_v36 = vpop.eup %2568  ;;  %v519_v37 = vadd.f32 1e-06, %v515_v35  ;;  %v517_v40 = vmul.f32 %v2825_v26, %v506_v38 }
  0x9c   : > { %v523_v39 = vmul.f32 %v2569_v36, %v518_v29  ;;  %vm529_vm3 = vweird.f32 %v2569_v36  ;;  %v481_v29 = vld [vmem:[%s3394_s3] sm:$0xff] }
  0x9d   : > { %2572 = vrsqrt.f32 %v519_v37  ;;  %v2571_v41 = vpop.eup %2570  ;;  %v521_v43 = vadd.f32 1e-06, %v517_v40  ;;  %vm530_vm5 = vmor %vm528_vm4, %vm529_vm3  ;;  %vm538_vm9 = vweird.f32 %v519_v37 }
  0x9e   : > { %v524_v42 = vmul.f32 %v2569_v36, %v523_v39  ;;  %v543_v44 = vmul.f32 %v2571_v41, %v520_v33  ;;  %vm549_vm7 = vweird.f32 %v2571_v41 }
  0x9f   : > { %2574 = vrsqrt.f32 %v521_v43  ;;  %vm550_vm10 = vmor %vm548_vm6, %vm549_vm7  ;;  %vm558_vm12 = vweird.f32 %v521_v43 }
  0xa0   : > { %v525_v45 = vmul.f32 0.5, %v524_v42  ;;  %v544_v46 = vmul.f32 %v2571_v41, %v543_v44 }
  0xa2   : > { %v526_v47 = vsub.f32 1.5, %v525_v45  ;;  %v545_v53 = vmul.f32 0.5, %v544_v46 }
  0xa3   : > { %v2573_v48 = vpop.eup %2572 }
  0xa4   : > { %v527_v51 = vmul.f32 %v2569_v36, %v526_v47  ;;  %v533_v52 = vmul.f32 %v2573_v48, %v519_v37  ;;  %v546_v62 = vsub.f32 1.5, %v545_v53  ;;  %vm539_vm8 = vweird.f32 %v2573_v48 }
  0xa5   : > { %v2575_v56 = vpop.eup %2574  ;;  %vm540_vm11 = vmor %vm538_vm9, %vm539_vm8 }
  0xa6   : > { %v534_v57 = vmul.f32 %v2573_v48, %v533_v52  ;;  %v531_v58 = vsel %vm530_vm5, %v2569_v36, %v527_v51  ;;  %v553_v60 = vmul.f32 %v2575_v56, %v521_v43  ;;  %v547_v3 = vmul.f32 %v2571_v41, %v546_v62 }
  0xa7   : > { %v562_v59 = vmul.f32 %v531_v58, %v2801_v4  ;;  %vm559_vm13 = vweird.f32 %v2575_v56 }
  0xa8   : > { %v535_v61 = vmul.f32 0.5, %v534_v57  ;;  %v554_v0 = vmul.f32 %v2575_v56, %v553_v60  ;;  %v551_v11 = vsel %vm550_vm10, %v2571_v41, %v547_v3  ;;  %vm560_vm14 = vmor %vm558_vm12, %vm559_vm13  ;;  %v2955_v60 = vld [vmem:[%s3392_s1] sm:$0xff] }
  0xa9   : > { %v569_v63 = vmul.f32 %v2564_v54, %v562_v59  ;;  %v564_v13 = vmul.f32 %v551_v11, %v2803_v5 }
  0xaa   : > { %v536_v1 = vsub.f32 1.5, %v535_v61  ;;  %v555_v4 = vmul.f32 0.5, %v554_v0 }
  0xab   : > { %2401 = vmatmul.msk.f32.vlgmr.msra.gmra.mxu0 %vm494_vm1, %v569_v63  ;;  %v571_v15 = vmul.f32 %v2564_v54, %v564_v13  ;;  %v678_v43 = vpop.permute.xlu0 %677 }
  0xac   : > { %v537_v2 = vmul.f32 %v2573_v48, %v536_v1  ;;  %v556_v10 = vsub.f32 1.5, %v555_v4  ;;  %v2962_v1 = vld [vmem:[%s3392_s1 + $0x8] sm:$0xff] }
  0xae   : > { %v541_v6 = vsel %vm540_vm11, %v2573_v48, %v537_v2  ;;  %v557_v14 = vmul.f32 %v2575_v56, %v556_v10 }
  0xaf   : > { %v563_v7 = vmul.f32 %v541_v6, %v2809_v8  ;;  %v485_v8 = vld [vmem:[%s3395_s4] sm:$0xff] }
  0xb0   : > { %v561_v16 = vsel %vm560_vm14, %v2575_v56, %v557_v14  ;;  %649 = vmatpush.msra.mxu1 %v485_v8  ;;  %2500 = vmatpush.msra.mxu2 %v485_v8 }
  0xb1   : > { %v570_v12 = vmul.f32 %v2564_v54, %v563_v7  ;;  %v565_v17 = vmul.f32 %v561_v16, %v2811_v9  ;;  %722 = vmatpush.msrb.mxu0 %v485_v8 }
  0xb3   : > { %2402 = vmatmul.msk.f32.gmra.mxu0 %vm494_vm1, %v570_v12  ;;  %v572_v18 = vmul.f32 %v2564_v54, %v565_v17 }
  0xbb   : > { %2403 = vmatmul.msk.f32.gmra.mxu0 %vm494_vm1, %v571_v15 }
  0xc3   : > { %2404 = vmatmul.msk.f32.gmra.mxu0 %vm494_vm1, %v572_v18 }
 0x128   : > { %v2863_v19 = vpop.f32.mrf.mxu0 }
 0x129   : > { %2405 = vmatmul.msk.f32.vlgmr.msra.gmra.mxu1 %vm494_vm1, %v2863_v19  ;;  %v618_v38 = vmul.f32 %v2863_v19, %v477_v20 }
 0x130   : > { %v2867_v5 = vpop.f32.mrf.mxu0 }
 0x131   : > { %693 = vrot.lane.b32.xlu2 %v2867_v5, %s2678_s16  ;;  %2406 = vmatmul.msk.f32.gmra.mxu1 %vm494_vm1, %v2867_v5  ;;  %v619_v35 = vmul.f32 %v2867_v5, %v2831_v30  ;;  %v688_v44 = vmul.f32 %v678_v43, %v2867_v5 }
 0x138   : > { %v2873_v9 = vpop.f32.mrf.mxu0 }
 0x139   : > { %691 = vrot.lane.b32.xlu2 %v2863_v19, %s2678_s16  ;;  %2407 = vmatmul.msk.f32.gmra.mxu1 %vm494_vm1, %v2873_v9 }
 0x140   : > { %v2882_v21 = vpop.f32.mrf.mxu0 }
 0x141   : > { %675 = vrot.lane.b32.xlu2 %v477_v20, %s2677_s27  ;;  %2408 = vmatmul.msk.f32.gmra.mxu1 %vm494_vm1, %v2882_v21 }
 0x18b   : > { %v694_v22 = vpop.permute.xlu2 %693 }
 0x18c   : > { %2410 = vmatmul.msk.f32.vlgmr.msra.gmra.mxu2 %vm494_vm1, %v694_v22 }
 0x193   : > { %v692_v23 = vpop.permute.xlu2 %691 }
 0x194   : > { %2409 = vmatmul.msk.f32.vlgmr.msrb.gmra.mxu0 %vm494_vm1, %v692_v23 }
 0x19b   : > { %v676_v40 = vpop.permute.xlu2 %675 }
 0x19c   : > { %v687_v41 = vmul.f32 %v676_v40, %v2863_v19 }
 0x1a6   : > { %v651_v24 = vpop.f32.mrf.mxu1 }
 0x1a7   : > { %v663_v37 = vmul.f32 %v651_v24, %v481_v29 }
 0x1a9   : > { %v2904_v39 = vadd.f32 %v663_v37, %v618_v38 }
 0x1ae   : > { %v654_v31 = vpop.f32.mrf.mxu1 }
 0x1af   : > { %v664_v34 = vmul.f32 %v654_v31, %v482_v25 }
 0x1b1   : > { %v2899_v36 = vadd.f32 %v664_v34, %v619_v35 }
 0x20f   : > { %v727_v27 = vpop.f32.mrf.mxu2 }
 0x210   : > { %v737_v28 = vmul.f32 %v727_v27, %v482_v25 }
 0x211   : > { %v724_v32 = vpop.f32.mrf.mxu0 }
 0x212   : > { %v736_v33 = vmul.f32 %v724_v32, %v481_v29  ;;  %746 = vrot.lane.b32.xlu1 %v737_v28, %s2677_s27  ;;  %v2978_v28 = vpop.f32.mrf.mxu1 }
 0x214   : > { %744 = vrot.lane.b32.xlu2 %v736_v33, %s2677_s27 }
 0x21a   : > { %896 = vrot.lane.b32.xlu1 %v2899_v36, %s2679_s29  ;;  %v2980_v34 = vpop.f32.mrf.mxu1 }
 0x222   : > { %1078 = vrot.lane.b32.xlu1 %v2904_v39, %s2680_s12 }
 0x26e   : > { %v745_v42 = vpop.permute.xlu2 %744 }
 0x26f   : > { %v2909_v30 = vadd.f32 %v745_v42, %v687_v41  ;;  %v2988_v41 = vpack.i.bf16 %v2863_v19, %v2867_v5 }
 0x271   : > { %768 = vrot.lane.b32.xlu1 %v2909_v30, %s2678_s16  ;;  %898 = vrot.lane.b32.xlu0 %v2909_v30, %s2681_s13 }
 0x284   : > { %v747_v45 = vpop.permute.xlu1 %746 }
 0x285   : > { %v2916_v46 = vadd.f32 %v747_v45, %v688_v44 }
 0x287   : > { %1084 = vrot.lane.b32.xlu0 %v2916_v46, %s2682_s15  ;;  %900 = vrot.lane.b32.xlu2 %v2916_v46, %s2681_s13 }
 0x28c   : > { %v897_v50 = vpop.permute.xlu1 %896 }
 0x28f   : > { %1080 = vrot.lane.b32.xlu0 %v2899_v36, %s2680_s12  ;;  %894 = vrot.lane.b32.xlu2 %v2904_v39, %s2679_s29 }
 0x294   : > { %v1079_v52 = vpop.permute.xlu1 %1078 }
 0x297   : > { %1082 = vrot.lane.b32.xlu2 %v2909_v30, %s2682_s15 }
 0x29f   : > { %770 = vrot.lane.b32.xlu2 %v2916_v46, %s2678_s16 }
 0x2a7   : > { %695 = vrot.lane.b32.xlu2 %v2873_v9, %s2678_s16 }
 0x2af   : > { %697 = vrot.lane.b32.xlu2 %v2882_v21, %s2678_s16 }
 0x2e1   : > { %v901_v47 = vpop.permute.xlu2 %900 }
 0x2e2   : > { %2419 = vmatpush.xpose.msk.msra.mxu0 %vm772_vm15, %v901_v47 }
 0x2e3   : > { %v899_v48 = vpop.permute.xlu0 %898  ;;  %v769_v55 = vpop.permute.xlu1 %768 }
 0x2e6   : > { %2420 = vmatpush.xpose.msk.msra.mxu0 %vm772_vm15, %v899_v48 }
 0x2e9   : > { %v895_v49 = vpop.permute.xlu2 %894 }
 0x2ea   : > { %2421 = vmatmul.msk.f32.vlgmr.msra.gmra.mxu0 %vm772_vm15, %v895_v49 }
 0x2f1   : > { %v1083_v51 = vpop.permute.xlu2 %1082 }
 0x2f2   : > { %2422 = vmatmul.msk.f32.gmra.mxu0 %vm772_vm15, %v897_v50 }
 0x2f9   : > { %v771_v53 = vpop.permute.xlu2 %770  ;;  %v1085_v54 = vpop.permute.xlu0 %1084 }
 0x2fa   : > { %2413 = vmatpush.xpose.msk.msrb.mxu1 %vm772_vm15, %v771_v53  ;;  %2501 = vmatpush.xpose.msk.msra.mxu3 %vm772_vm15, %v771_v53  ;;  %v3011_v53 = vld [vmem:[%s3394_s3 + $0x18] sm:$0xff] }
 0x2fb   : > { %2429 = vmatpush.xpose.msk.msrb.mxu0 %vm772_vm15, %v1085_v54 }
 0x2fe   : > { %2414 = vmatpush.xpose.msk.msrb.mxu1 %vm772_vm15, %v769_v55  ;;  %2502 = vmatpush.xpose.msk.msra.mxu3 %vm772_vm15, %v769_v55  ;;  %v3018_v55 = vld [vmem:[%s3393_s2 + $0x10] sm:$0xff] }
 0x2ff   : > { %2430 = vmatpush.xpose.msk.msrb.mxu0 %vm772_vm15, %v1083_v51 }
 0x301   : > { %2415 = vmatmul.msk.f32.vlgmr.msrb.gmra.mxu1 %vm772_vm15, %v2904_v39  ;;  %2416 = vmatmul.msk.f32.vlgmr.msra.gmra.mxu3 %vm772_vm15, %v2899_v36  ;;  %v696_v56 = vpop.permute.xlu2 %695  ;;  %v1081_v57 = vpop.permute.xlu0 %1080 }
 0x302   : > { %2431 = vmatmul.msk.f32.vlgmr.msrb.gmra.mxu0 %vm772_vm15, %v1079_v52  ;;  %2411 = vmatmul.msk.f32.gmra.mxu2 %vm494_vm1, %v696_v56  ;;  %v3025_v56 = vld [vmem:[%s3393_s2 + $0x18] sm:$0xff] }
 0x309   : > { %v698_v58 = vpop.permute.xlu2 %697 }
 0x30a   : > { %2432 = vmatmul.msk.f32.gmra.mxu0 %vm772_vm15, %v1081_v57  ;;  %2412 = vmatmul.msk.f32.gmra.mxu2 %vm494_vm1, %v698_v58  ;;  %v3032_v57 = vld [vmem:[%s3394_s3 + $0x10] sm:$0xff] }
 0x367   : > { %v927_v59 = vpop.f32.mrf.mxu0 }
 0x368   : > { %v933_v61 = vmul.f32 0.35355338, %v927_v59 }
 0x36a   : > { %v935_v62 = vadd.f32 %v933_v61, %v2955_v60 }
 0x36c   : > { %v937_v63 = vsel %vm810_vm0, %v935_v62, -inf }
 0x36d   : > { %938 = vmax.xlane.f32.xlu0 %v937_v63 }
 0x36f   : > { %v930_v0 = vpop.f32.mrf.mxu0 }
 0x370   : > { %v934_v2 = vmul.f32 0.35355338, %v930_v0 }
 0x372   : > { %v936_v3 = vadd.f32 %v934_v2, %v2962_v1 }
 0x374   : > { %v940_v4 = vsel %vm810_vm0, %v936_v3, -inf }
 0x375   : > { %941 = vmax.xlane.f32.xlu1 %v940_v4 }
 0x37e   : > { %v800_v42 = vpop.f32.mrf.mxu1 }
 0x37f   : > { %v1111_v6 = vpop.f32.mrf.mxu0  ;;  %v806_v44 = vmul.f32 0.35355338, %v800_v42 }
 0x380   : > { %v1117_v7 = vmul.f32 0.35355338, %v1111_v6 }
 0x381   : > { %v2997_v47 = vadd.f32 %v806_v44, %v2955_v60 }
 0x382   : > { %v1119_v10 = vadd.f32 %v1117_v7, %v2955_v60 }
 0x383   : > { %v811_v19 = vsel %vm810_vm0, %v2997_v47, -inf }
 0x384   : > { %v1121_v11 = vsel %vm810_vm0, %v1119_v10, -inf  ;;  %v803_v48 = vpop.f32.mrf.mxu3 }
 0x385   : > { %1122 = vmax.xlane.f32.xlu2 %v1121_v11  ;;  %v807_v49 = vmul.f32 0.35355338, %v803_v48  ;;  %v730_v5 = vpop.f32.mrf.mxu2 }
 0x386   : > { %v738_v58 = vmul.f32 %v730_v5, %v3032_v57 }
 0x387   : > { %v1114_v12 = vpop.f32.mrf.mxu0  ;;  %v3002_v50 = vadd.f32 %v807_v49, %v2962_v1 }
 0x388   : > { %v1118_v13 = vmul.f32 0.35355338, %v1114_v12 }
 0x389   : > { %v814_v51 = vsel %vm810_vm0, %v3002_v50, -inf }
 0x38a   : > { %v1120_v14 = vadd.f32 %v1118_v13, %v2962_v1 }
 0x38c   : > { %v1124_v15 = vsel %vm810_vm0, %v1120_v14, -inf }
 0x38d   : > { %1125 = vmax.xlane.f32.xlu0 %v1124_v15  ;;  %v733_v52 = vpop.f32.mrf.mxu2 }
 0x38e   : > { %v739_v54 = vmul.f32 %v733_v52, %v3011_v53 }
 0x3e0   : > { %v939_v16 = vpop.xlane.xlu0 %938 }
 0x3e1   : > { %v943_v17 = vsub.f32 %v935_v62, %v939_v16 }
 0x3e3   : > { %v945_v18 = vmul.f32 1.442695, %v943_v17 }
 0x3e5   : > { %2576 = vpow2.f32 %v945_v18 }
 0x3e8   : > { %v942_v8 = vpop.xlane.xlu1 %941 }
 0x3e9   : > { %v944_v20 = vsub.f32 %v936_v3, %v942_v8 }
 0x3eb   : > { %v2970_v22 = vpop.eup %2576  ;;  %v947_v23 = vmul.f32 1.442695, %v944_v20 }
 0x3ec   : > { %v949_v24 = vsel %vm810_vm0, %v2970_v22, 0.0 }
 0x3ed   : > { %2578 = vpow2.f32 %v947_v23  ;;  %950 = vadd.xlane.f32.xlu1 %v949_v24 }
 0x3f3   : > { %v2974_v25 = vpop.eup %2578 }
 0x3f4   : > { %v952_v27 = vsel %vm810_vm0, %v2974_v25, 0.0 }
 0x3f5   : > { %953 = vadd.xlane.f32.xlu0 %v952_v27 }
 0x3f8   : > { %v1123_v29 = vpop.xlane.xlu2 %1122 }
 0x3f9   : > { %v1127_v31 = vsub.f32 %v1119_v10, %v1123_v29 }
 0x3fb   : > { %v1129_v32 = vmul.f32 1.442695, %v1127_v31 }
 0x3fd   : > { %2580 = vpow2.f32 %v1129_v32 }
 0x400   : > { %v1126_v33 = vpop.xlane.xlu0 %1125 }
 0x401   : > { %v1128_v35 = vsub.f32 %v1120_v14, %v1126_v33 }
 0x403   : > { %v2982_v37 = vpop.eup %2580  ;;  %v1131_v38 = vmul.f32 1.442695, %v1128_v35 }
 0x404   : > { %v1133_v40 = vsel %vm810_vm0, %v2982_v37, 0.0 }
 0x405   : > { %2582 = vpow2.f32 %v1131_v38  ;;  %1134 = vadd.xlane.f32.xlu1 %v1133_v40 }
 0x409   : > { %2525 = vrot.lane.b32.xlu0 %v2988_v41, %s2683_s30 }
 0x40b   : > { %v2992_v43 = vpop.eup %2582 }
 0x40c   : > { %v1136_v45 = vsel %vm810_vm0, %v2992_v43, 0.0 }
 0x40d   : > { %1137 = vadd.xlane.f32.xlu2 %v1136_v45 }
 0x415   : > { %812 = vmax.xlane.f32.xlu2 %v811_v19 }
 0x41d   : > { %815 = vmax.xlane.f32.xlu2 %v814_v51 }
 0x41e   : > { %2530 = vrot.lane.b32.xlu1 %v2988_v41, %s2684_s21 }
 0x426   : > { %750 = vrot.lane.b32.xlu1 %v739_v54, %s2677_s27 }
 0x42e   : > { %679 = vrot.lane.b32.xlu1 %v3018_v55, %s2677_s27 }
 0x435   : > { %681 = vrot.lane.b32.xlu2 %v3025_v56, %s2677_s27 }
 0x43d   : > { %748 = vrot.lane.b32.xlu2 %v738_v58, %s2677_s27  ;;  %s2686_s27 = smov 72  }
 0x445   : > { %2535 = vrot.lane.b32.xlu2 %v2988_v41, %s2685_s22 }
 0x460   : > { %v951_v59 = vpop.xlane.xlu1 %950 }
 0x461   : > { %2584 = vrcp.f32 %v951_v59  ;;  %v966_v10 = vand.u32 2147483648, %v951_v59  ;;  %vm960_vm3 = vweird.f32 %v951_v59  ;;  %v964_v11 = vand.u32 2147483647, %v951_v59 }
 0x463   : > { %v967_v15 = vor.u32 1.1754944e-38, %v966_v10  ;;  %vm965_vm5 = vcmp.eq.f32.partialorder %v964_v11, 8.507059e+37 }
 0x467   : > { %v2585_v61 = vpop.eup %2584 }
 0x468   : > { %v954_v62 = vpop.xlane.xlu0 %953  ;;  %v956_v63 = vmul.f32 %v2585_v61, %v951_v59  ;;  %vm961_vm2 = vweird.f32 %v2585_v61 }
 0x469   : > { %2586 = vrcp.f32 %v954_v62  ;;  %vm962_vm4 = vmor %vm960_vm3, %vm961_vm2  ;;  %v980_v20 = vand.u32 2147483648, %v954_v62  ;;  %vm974_vm7 = vweird.f32 %v954_v62  ;;  %v978_v29 = vand.u32 2147483647, %v954_v62 }
 0x46a   : > { %v957_v0 = vsub.f32 1.0, %v956_v63 }
 0x46b   : > { %v981_v35 = vor.u32 1.1754944e-38, %v980_v20  ;;  %vm979_vm9 = vcmp.eq.f32.partialorder %v978_v29, 8.507059e+37 }
 0x46c   : > { %v958_v3 = vmul.f32 %v2585_v61, %v957_v0 }
 0x46e   : > { %v959_v6 = vadd.f32 %v2585_v61, %v958_v3 }
 0x46f   : > { %v2587_v2 = vpop.eup %2586 }
 0x470   : > { %v970_v4 = vmul.f32 %v2587_v2, %v954_v62  ;;  %v963_v13 = vsel %vm962_vm4, %v2585_v61, %v959_v6  ;;  %vm975_vm6 = vweird.f32 %v2587_v2 }
 0x471   : > { %v968_v17 = vsel %vm965_vm5, %v967_v15, %v963_v13  ;;  %vm976_vm8 = vmor %vm974_vm7, %vm975_vm6  ;;  %v3051_v13 = vld [vmem:[%s2777_s14 + $0x8] sm:$0xff] }
 0x472   : > { %v971_v7 = vsub.f32 1.0, %v970_v4  ;;  %v983_v27 = vmul.f32 %v2970_v22, %v968_v17  ;;  %1041 = vmatpush.msrb.mxu2 %v3051_v13 }
 0x474   : > { %v972_v14 = vmul.f32 %v2587_v2, %v971_v7 }
 0x476   : > { %v973_v8 = vadd.f32 %v2587_v2, %v972_v14 }
 0x478   : > { %v1135_v12 = vpop.xlane.xlu1 %1134  ;;  %v977_v33 = vsel %vm976_vm8, %v2587_v2, %v973_v8 }
 0x479   : > { %2588 = vrcp.f32 %v1135_v12  ;;  %v982_v40 = vsel %vm979_vm9, %v981_v35, %v977_v33  ;;  %v1150_v51 = vand.u32 2147483648, %v1135_v12  ;;  %vm1144_vm11 = vweird.f32 %v1135_v12  ;;  %v762_v35 = vld [vmem:[%s2777_s14 + $0x10] sm:$0xff] }
 0x47a   : > { %v984_v45 = vmul.f32 %v2974_v25, %v982_v40  ;;  %v1148_v54 = vand.u32 2147483647, %v1135_v12  ;;  %1225 = vmatpush.msra.mxu2 %v762_v35 }
 0x47b   : > { %v2526_v16 = vpop.permute.xlu0 %2525  ;;  %v1151_v61 = vor.u32 1.1754944e-38, %v1150_v51 }
 0x47c   : > { %v2527_v18 = vunpack.i.l.bf16 %v2526_v16  ;;  %v2528_v23 = vunpack.i.h.bf16 %v2526_v16  ;;  %vm1149_vm13 = vcmp.eq.f32.partialorder %v1148_v54, 8.507059e+37 }
 0x47e   : > { %1011 = vmatpush.msra.mxu1 %v2527_v18 }
 0x47f   : > { %v2589_v24 = vpop.eup %2588 }
 0x480   : > { %v1140_v31 = vmul.f32 %v2589_v24, %v1135_v12  ;;  %v1138_v32 = vpop.xlane.xlu2 %1137  ;;  %1012 = vmatpush.msra.mxu1 %v2528_v23  ;;  %vm1145_vm10 = vweird.f32 %v2589_v24 }
 0x481   : > { %2590 = vrcp.f32 %v1138_v32  ;;  %2423 = vmatmul.msk.f32.vlgmr.msra.gmra.mxu1 %vm810_vm0, %v983_v27  ;;  %vm1146_vm12 = vmor %vm1144_vm11, %vm1145_vm10  ;;  %v1164_v4 = vand.u32 2147483648, %v1138_v32  ;;  %vm1158_vm2 = vweird.f32 %v1138_v32  ;;  %v1162_v12 = vand.u32 2147483647, %v1138_v32 }
 0x482   : > { %v1141_v38 = vsub.f32 1.0, %v1140_v31 }
 0x483   : > { %v1165_v14 = vor.u32 1.1754944e-38, %v1164_v4  ;;  %vm1163_vm4 = vcmp.eq.f32.partialorder %v1162_v12, 8.507059e+37 }
 0x484   : > { %v1142_v42 = vmul.f32 %v2589_v24, %v1141_v38  ;;  %v3080_v38 = vld [vmem:[%s2777_s14] sm:$0xff] }
 0x486   : > { %v1143_v19 = vadd.f32 %v2589_v24, %v1142_v42 }
 0x487   : > { %v2591_v44 = vpop.eup %2590 }
 0x488   : > { %v1154_v48 = vmul.f32 %v2591_v44, %v1138_v32  ;;  %v813_v49 = vpop.xlane.xlu2 %812  ;;  %v1147_v58 = vsel %vm1146_vm12, %v2589_v24, %v1143_v19  ;;  %vm1159_vm14 = vweird.f32 %v2591_v44 }
 0x489   : > { %v817_v22 = vsub.f32 %v2997_v47, %v813_v49  ;;  %2424 = vmatmul.msk.f32.gmra.mxu1 %vm810_vm0, %v984_v45  ;;  %v1152_v63 = vsel %vm1149_vm13, %v1151_v61, %v1147_v58  ;;  %vm1160_vm3 = vmor %vm1158_vm2, %vm1159_vm14 }
 0x48a   : > { %v1155_v5 = vsub.f32 1.0, %v1154_v48  ;;  %v1167_v11 = vmul.f32 %v2982_v37, %v1152_v63 }
 0x48b   : > { %v819_v52 = vmul.f32 1.442695, %v817_v22 }
 0x48c   : > { %v1156_v59 = vmul.f32 %v2591_v44, %v1155_v5 }
 0x48d   : > { %2592 = vpow2.f32 %v819_v52 }
 0x48e   : > { %v1157_v2 = vadd.f32 %v2591_v44, %v1156_v59 }
 0x490   : > { %v2531_v25 = vpop.permute.xlu1 %2530  ;;  %v816_v62 = vpop.xlane.xlu2 %815 }
 0x491   : > { %v2532_v0 = vunpack.i.l.bf16 %v2531_v25  ;;  %v818_v47 = vsub.f32 %v3002_v50, %v816_v62  ;;  %v2533_v6 = vunpack.i.h.bf16 %v2531_v25  ;;  %v1161_v50 = vsel %vm1160_vm3, %v2591_v44, %v1157_v2 }
 0x492   : > { %v1166_v17 = vsel %vm1163_vm4, %v1165_v14, %v1161_v50 }
 0x493   : > { %v3044_v3 = vpop.eup %2592  ;;  %v821_v7 = vmul.f32 1.442695, %v818_v47  ;;  %1195 = vmatpush.msrb.mxu1 %v2532_v0  ;;  %v1168_v8 = vmul.f32 %v2992_v43, %v1166_v17 }
 0x494   : > { %v823_v10 = vsel %vm810_vm0, %v3044_v3, 0.0 }
 0x495   : > { %2594 = vpow2.f32 %v821_v7  ;;  %824 = vadd.xlane.f32.xlu0 %v823_v10  ;;  %1196 = vmatpush.msrb.mxu1 %v2533_v6  ;;  %v665_v6 = vmul.f32 %v2978_v28, %v3032_v57  ;;  %v666_v28 = vmul.f32 %v2980_v34, %v3011_v53 }
 0x496   : > { %2433 = vmatmul.msk.f32.vlgmr.msrb.gmra.mxu1 %vm810_vm0, %v1167_v11 }
 0x498   : > { %v751_v15 = vpop.permute.xlu1 %750  ;;  %v682_v16 = vpop.permute.xlu2 %681 }
 0x499   : > { %v690_v27 = vmul.f32 %v682_v16, %v2882_v21 }
 0x49b   : > { %v3054_v18 = vpop.eup %2594  ;;  %v3066_v31 = vadd.f32 %v751_v15, %v690_v27 }
 0x49c   : > { %v826_v37 = vsel %vm810_vm0, %v3054_v18, 0.0 }
 0x49d   : > { %827 = vadd.xlane.f32.xlu1 %v826_v37 }
 0x49e   : > { %2434 = vmatmul.msk.f32.gmra.mxu1 %vm810_vm0, %v1168_v8 }
 0x4a0   : > { %v680_v20 = vpop.permute.xlu1 %679  ;;  %v749_v23 = vpop.permute.xlu2 %748 }
 0x4a1   : > { %v689_v24 = vmul.f32 %v680_v20, %v2873_v9 }
 0x4a3   : > { %v3062_v29 = vadd.f32 %v749_v23, %v689_v24 }
 0x4a5   : > { %1397 = vrot.lane.b32.xlu2 %v3062_v29, %s2678_s16 }
 0x4a8   : > { %v2536_v32 = vpop.permute.xlu2 %2535 }
 0x4a9   : > { %1399 = vrot.lane.b32.xlu0 %v3066_v31, %s2678_s16  ;;  %v2537_v43 = vunpack.i.l.bf16 %v2536_v32  ;;  %v2538_v33 = vunpack.i.h.bf16 %v2536_v32  ;;  %v3132_v32 = vld [vmem:[%s3392_s1 + $0x18] sm:$0xff] }
 0x4ab   : > { %885 = vmatpush.msrb.mxu3 %v2537_v43 }
 0x4ad   : > { %1241 = vrot.lane.b32.xlu2 %v2916_v46, %s2686_s27  ;;  %886 = vmatpush.msrb.mxu3 %v2538_v33 }
 0x4af   : > { %1070 = vmatpush.msra.mxu3 %v3080_v38 }
 0x4b1   : > { %1239 = vrot.lane.b32.xlu0 %v2909_v30, %s2686_s27 }
 0x4b5   : > { %1235 = vrot.lane.b32.xlu2 %v2904_v39, %s2687_s26 }
 0x4b6   : > { %1237 = vrot.lane.b32.xlu1 %v2899_v36, %s2687_s26 }
 0x4fe   : > { %v1014_v40 = vpop.f32.mrf.mxu1 }
 0x4ff   : > { %2425 = vmatmul.msk.f32.vlgmr.msrb.gmra.mxu2 %vm772_vm15, %v1014_v40  ;;  %v1398_v45 = vpop.permute.xlu2 %1397 }
 0x506   : > { %v1017_v46 = vpop.f32.mrf.mxu1 }
 0x507   : > { %2426 = vmatmul.msk.f32.gmra.mxu2 %vm772_vm15, %v1017_v46  ;;  %v1242_v47 = vpop.permute.xlu2 %1241  ;;  %v3140_v46 = vpack.i.bf16 %v2873_v9, %v2882_v21 }
 0x508   : > { %v825_v30 = vpop.xlane.xlu0 %824 }
 0x509   : > { %2596 = vrcp.f32 %v825_v30  ;;  %v840_v48 = vand.u32 2147483648, %v825_v30  ;;  %v838_v19 = vand.u32 2147483647, %v825_v30  ;;  %vm834_vm6 = vweird.f32 %v825_v30 }
 0x50b   : > { %v841_v52 = vor.u32 1.1754944e-38, %v840_v48  ;;  %vm839_vm8 = vcmp.eq.f32.partialorder %v838_v19, 8.507059e+37 }
 0x50f   : > { %v2597_v42 = vpop.eup %2596  ;;  %v1236_v24 = vpop.permute.xlu2 %1235 }
 0x510   : > { %v830_v44 = vmul.f32 %v2597_v42, %v825_v30  ;;  %v828_v39 = vpop.xlane.xlu1 %827  ;;  %vm835_vm5 = vweird.f32 %v2597_v42 }
 0x511   : > { %2598 = vrcp.f32 %v828_v39  ;;  %vm836_vm7 = vmor %vm834_vm6, %vm835_vm5  ;;  %v854_v62 = vand.u32 2147483648, %v828_v39  ;;  %v852_v4 = vand.u32 2147483647, %v828_v39  ;;  %vm848_vm10 = vweird.f32 %v828_v39 }
 0x512   : > { %v831_v36 = vsub.f32 1.0, %v830_v44 }
 0x513   : > { %v1198_v49 = vpop.f32.mrf.mxu1  ;;  %v855_v10 = vor.u32 1.1754944e-38, %v854_v62  ;;  %vm853_vm12 = vcmp.eq.f32.partialorder %v852_v4, 8.507059e+37 }
 0x514   : > { %v832_v22 = vmul.f32 %v2597_v42, %v831_v36  ;;  %2435 = vmatmul.msk.f32.vlgmr.msra.gmra.mxu2 %vm772_vm15, %v1198_v49 }
 0x516   : > { %v833_v5 = vadd.f32 %v2597_v42, %v832_v22 }
 0x517   : > { %v2599_v51 = vpop.eup %2598 }
 0x518   : > { %v844_v54 = vmul.f32 %v2599_v51, %v828_v39  ;;  %v837_v58 = vsel %vm836_vm7, %v2597_v42, %v833_v5  ;;  %vm849_vm9 = vweird.f32 %v2599_v51 }
 0x519   : > { %v842_v59 = vsel %vm839_vm8, %v841_v52, %v837_v58  ;;  %vm850_vm11 = vmor %vm848_vm10, %vm849_vm9 }
 0x51a   : > { %v845_v61 = vsub.f32 1.0, %v844_v54  ;;  %v857_v25 = vmul.f32 %v3044_v3, %v842_v59  ;;  %v620_v3 = vmul.f32 %v2873_v9, %v3018_v55  ;;  %v621_v55 = vmul.f32 %v2882_v21, %v3025_v56  ;;  %v3124_v56 = vld [vmem:[%s3392_s1 + $0x10] sm:$0xff] }
 0x51b   : > { %v1400_v63 = vpop.permute.xlu0 %1399  ;;  %v1201_v0 = vpop.f32.mrf.mxu1 }
 0x51c   : > { %v846_v2 = vmul.f32 %v2599_v51, %v845_v61  ;;  %2417 = vmatmul.msk.f32.vlgmr.msrb.gmra.mxu3 %vm810_vm0, %v857_v25  ;;  %2436 = vmatmul.msk.f32.gmra.mxu2 %vm772_vm15, %v1201_v0  ;;  %v3096_v50 = vadd.f32 %v665_v6, %v620_v3  ;;  %v3108_v57 = vadd.f32 %v666_v28, %v621_v55 }
 0x51d   : > { %2437 = vmatpush.xpose.msk.msrb.mxu3 %vm772_vm15, %v1242_v47  ;;  %2447 = vmatpush.xpose.msk.msrb.mxu2 %vm772_vm15, %v1400_v63 }
 0x51e   : > { %v847_v7 = vadd.f32 %v2599_v51, %v846_v2 }
 0x520   : > { %v851_v11 = vsel %vm850_vm11, %v2599_v51, %v847_v7 }
 0x521   : > { %2448 = vmatpush.xpose.msk.msrb.mxu2 %vm772_vm15, %v1398_v45  ;;  %v856_v12 = vsel %vm853_vm12, %v855_v10, %v851_v11 }
 0x522   : > { %v858_v14 = vmul.f32 %v3054_v18, %v856_v12 }
 0x523   : > { %v1240_v15 = vpop.permute.xlu0 %1239 }
 0x524   : > { %2418 = vmatmul.msk.f32.gmra.mxu3 %vm810_vm0, %v858_v14  ;;  %2449 = vmatmul.msk.f32.vlgmr.msrb.gmra.mxu2 %vm772_vm15, %v3096_v50 }
 0x525   : > { %1668 = vmatpush.msra.mxu2 %v3051_v13  ;;  %2438 = vmatpush.xpose.msk.msrb.mxu3 %vm772_vm15, %v1240_v15 }
 0x527   : > { %1852 = vmatpush.msrb.mxu2 %v762_v35 }
 0x528   : > { %v1238_v40 = vpop.permute.xlu1 %1237 }
 0x52c   : > { %2450 = vmatmul.msk.f32.gmra.mxu2 %vm772_vm15, %v3108_v57 }
 0x582   : > { %v3112_v13 = vpop.f32.mrf.mxu2 }
 0x58a   : > { %v3114_v16 = vpop.f32.mrf.mxu2 }
 0x597   : > { %v3116_v17 = vpop.f32.mrf.mxu2 }
 0x59f   : > { %v888_v18 = vpop.f32.mrf.mxu3  ;;  %v3118_v37 = vpop.f32.mrf.mxu2 }
 0x5a0   : > { %2427 = vmatmul.msk.f32.vlgmr.msra.gmra.mxu3 %vm772_vm15, %v888_v18 }
 0x5a7   : > { %v891_v34 = vpop.f32.mrf.mxu3  ;;  %v1428_v53 = vpop.f32.mrf.mxu2 }
 0x5a8   : > { %v1434_v8 = vmul.f32 0.35355338, %v1428_v53  ;;  %2428 = vmatmul.msk.f32.gmra.mxu3 %vm772_vm15, %v891_v34 }
 0x5aa   : > { %v1436_v20 = vadd.f32 %v3124_v56, %v1434_v8 }
 0x5ac   : > { %v1438_v23 = vsel %vm810_vm0, %v1436_v20, -inf }
 0x5ad   : > { %1439 = vmax.xlane.f32.xlu0 %v1438_v23 }
 0x5af   : > { %v1431_v27 = vpop.f32.mrf.mxu2 }
 0x5b0   : > { %v1435_v43 = vmul.f32 0.35355338, %v1431_v27  ;;  %2439 = vmatmul.msk.f32.vlgmr.msrb.gmra.mxu3 %vm772_vm15, %v1236_v24 }
 0x5b2   : > { %v1437_v33 = vadd.f32 %v3132_v32, %v1435_v43 }
 0x5b4   : > { %v1441_v35 = vsel %vm810_vm0, %v1437_v33, -inf }
 0x5b5   : > { %1442 = vmax.xlane.f32.xlu2 %v1441_v35 }
 0x5b8   : > { %2440 = vmatmul.msk.f32.gmra.mxu3 %vm772_vm15, %v1238_v40 }
 0x5cd   : > { %2540 = vrot.lane.b32.xlu2 %v3140_v46, %s2685_s22 }
 0x5d5   : > { %2545 = vrot.lane.b32.xlu2 %v2988_v41, %s2688_s28 }
 0x5dd   : > { %1521 = vrot.lane.b32.xlu2 %v3096_v50, %s2679_s29 }
 0x5e5   : > { %1523 = vrot.lane.b32.xlu2 %v3108_v57, %s2679_s29  ;;  %s3403_s29 = scalar_lea.vmem %s3397_s6, %s2757_s19 }
 0x5ed   : > { %1711 = vrot.lane.b32.xlu2 %v3066_v31, %s2682_s15 }
 0x5f5   : > { %1866 = vrot.lane.b32.xlu2 %v3062_v29, %s2686_s27 }
 0x5fd   : > { %1707 = vrot.lane.b32.xlu2 %v3108_v57, %s2680_s12 }
 0x620   : > { %v1440_v9 = vpop.xlane.xlu0 %1439 }
 0x621   : > { %v1444_v21 = vsub.f32 %v1436_v20, %v1440_v9 }
 0x623   : > { %v1446_v30 = vmul.f32 1.442695, %v1444_v21  ;;  %v3156_v42 = vpop.f32.mrf.mxu3 }
 0x625   : > { %2600 = vpow2.f32 %v1446_v30 }
 0x628   : > { %v1443_v41 = vpop.xlane.xlu2 %1442 }
 0x629   : > { %v1445_v44 = vsub.f32 %v1437_v33, %v1443_v41 }
 0x62b   : > { %v2601_v39 = vpop.eup %2600  ;;  %v1448_v45 = vmul.f32 1.442695, %v1445_v44  ;;  %v3158_v36 = vpop.f32.mrf.mxu3 }
 0x62c   : > { %v1450_v48 = vsel %vm810_vm0, %v2601_v39, 0.0 }
 0x62d   : > { %2602 = vpow2.f32 %v1448_v45  ;;  %1451 = vadd.xlane.f32.xlu1 %v1450_v48 }
 0x630   : > { %v2541_v49 = vpop.permute.xlu2 %2540 }
 0x631   : > { %v2542_v22 = vunpack.i.l.bf16 %v2541_v49  ;;  %v2543_v5 = vunpack.i.h.bf16 %v2541_v49 }
 0x633   : > { %v3161_v19 = vpop.eup %2602  ;;  %v1268_v51 = vpop.f32.mrf.mxu3  ;;  %1512 = vmatpush.msra.mxu3 %v2542_v22 }
 0x634   : > { %v1274_v52 = vmul.f32 0.35355338, %v1268_v51  ;;  %v1453_v54 = vsel %vm810_vm0, %v3161_v19, 0.0 }
 0x635   : > { %1454 = vadd.xlane.f32.xlu0 %v1453_v54  ;;  %1513 = vmatpush.msra.mxu3 %v2543_v5 }
 0x636   : > { %v1276_v59 = vadd.f32 %v1274_v52, %v2955_v60 }
 0x637   : > { %1697 = vmatpush.msrb.mxu3 %v3080_v38 }
 0x638   : > { %v2546_v58 = vpop.permute.xlu2 %2545  ;;  %v1278_v0 = vsel %vm810_vm0, %v1276_v59, -inf }
 0x639   : > { %v2547_v61 = vunpack.i.l.bf16 %v2546_v58  ;;  %v2548_v25 = vunpack.i.h.bf16 %v2546_v58 }
 0x63b   : > { %v1271_v62 = vpop.f32.mrf.mxu3  ;;  %1352 = vmatpush.msra.mxu0 %v2547_v61 }
 0x63c   : > { %v1275_v63 = vmul.f32 0.35355338, %v1271_v62 }
 0x63d   : > { %1279 = vmax.xlane.f32.xlu0 %v1278_v0  ;;  %1353 = vmatpush.msra.mxu0 %v2548_v25 }
 0x63e   : > { %v1277_v47 = vadd.f32 %v1275_v63, %v2962_v1 }
 0x640   : > { %v1281_v2 = vsel %vm810_vm0, %v1277_v47, -inf }
 0x645   : > { %1282 = vmax.xlane.f32.xlu0 %v1281_v2 }
 0x6a0   : > { %v1452_v4 = vpop.xlane.xlu1 %1451 }
 0x6a1   : > { %2604 = vrcp.f32 %v1452_v4  ;;  %v1467_v7 = vand.u32 2147483648, %v1452_v4  ;;  %v1465_v11 = vand.u32 2147483647, %v1452_v4  ;;  %vm1461_vm14 = vweird.f32 %v1452_v4 }
 0x6a3   : > { %v1468_v15 = vor.u32 1.1754944e-38, %v1467_v7  ;;  %vm1466_vm3 = vcmp.eq.f32.partialorder %v1465_v11, 8.507059e+37 }
 0x6a7   : > { %v2605_v38 = vpop.eup %2604 }
 0x6a8   : > { %v1457_v6 = vmul.f32 %v2605_v38, %v1452_v4  ;;  %v1455_v3 = vpop.xlane.xlu0 %1454  ;;  %vm1462_vm13 = vweird.f32 %v2605_v38 }
 0x6a9   : > { %2606 = vrcp.f32 %v1455_v3  ;;  %vm1463_vm2 = vmor %vm1461_vm14, %vm1462_vm13  ;;  %v1481_v20 = vand.u32 2147483648, %v1455_v3  ;;  %v1479_v27 = vand.u32 2147483647, %v1455_v3  ;;  %vm1475_vm5 = vweird.f32 %v1455_v3 }
 0x6aa   : > { %v1458_v60 = vsub.f32 1.0, %v1457_v6 }
 0x6ab   : > { %v1482_v33 = vor.u32 1.1754944e-38, %v1481_v20  ;;  %vm1480_vm7 = vcmp.eq.f32.partialorder %v1479_v27, 8.507059e+37  ;;  %v3206_v20 = vld [vmem:[%s2777_s14 + $0x18] sm:$0xff] }
 0x6ac   : > { %v1459_v10 = vmul.f32 %v2605_v38, %v1458_v60  ;;  %1382 = vmatpush.msra.mxu1 %v3206_v20 }
 0x6ae   : > { %v1460_v12 = vadd.f32 %v2605_v38, %v1459_v10 }
 0x6af   : > { %v2607_v14 = vpop.eup %2606 }
 0x6b0   : > { %v1464_v1 = vsel %vm1463_vm2, %v2605_v38, %v1460_v12  ;;  %v1471_v28 = vmul.f32 %v2607_v14, %v1455_v3  ;;  %v1280_v55 = vpop.xlane.xlu0 %1279  ;;  %vm1476_vm4 = vweird.f32 %v2607_v14 }
 0x6b1   : > { %v1469_v18 = vsel %vm1466_vm3, %v1468_v15, %v1464_v1  ;;  %v1284_v34 = vsub.f32 %v1276_v59, %v1280_v55  ;;  %vm1477_vm6 = vmor %vm1475_vm5, %vm1476_vm4 }
 0x6b2   : > { %v1472_v53 = vsub.f32 1.0, %v1471_v28  ;;  %v1484_v8 = vmul.f32 %v2601_v39, %v1469_v18 }
 0x6b3   : > { %v1286_v23 = vmul.f32 1.442695, %v1284_v34 }
 0x6b4   : > { %v1473_v24 = vmul.f32 %v2607_v14, %v1472_v53  ;;  %2451 = vmatmul.msk.f32.vlgmr.msra.gmra.mxu3 %vm810_vm0, %v1484_v8 }
 0x6b5   : > { %2608 = vpow2.f32 %v1286_v23 }
 0x6b6   : > { %v1474_v43 = vadd.f32 %v2607_v14, %v1473_v24 }
 0x6b8   : > { %v1283_v35 = vpop.xlane.xlu0 %1282  ;;  %v1478_v40 = vsel %vm1477_vm6, %v2607_v14, %v1474_v43 }
 0x6b9   : > { %v1285_v9 = vsub.f32 %v1277_v47, %v1283_v35  ;;  %v1483_v21 = vsel %vm1480_vm7, %v1482_v33, %v1478_v40 }
 0x6ba   : > { %v1485_v30 = vmul.f32 %v3161_v19, %v1483_v21 }
 0x6bb   : > { %v2609_v41 = vpop.eup %2608  ;;  %v1288_v44 = vmul.f32 1.442695, %v1285_v9 }
 0x6bc   : > { %2452 = vmatmul.msk.f32.gmra.mxu3 %vm810_vm0, %v1485_v30  ;;  %v1290_v39 = vsel %vm810_vm0, %v2609_v41, 0.0 }
 0x6bd   : > { %2610 = vpow2.f32 %v1288_v44  ;;  %1291 = vadd.xlane.f32.xlu1 %v1290_v39 }
 0x6c3   : > { %v2611_v45 = vpop.eup %2610 }
 0x6c4   : > { %v1293_v48 = vsel %vm810_vm0, %v2611_v45, 0.0 }
 0x6c5   : > { %1294 = vadd.xlane.f32.xlu0 %v1293_v48 }
 0x6d6   : > { %1527 = vrot.lane.b32.xlu1 %v3066_v31, %s2681_s13 }
 0x6d9   : > { %1525 = vrot.lane.b32.xlu0 %v3062_v29, %s2681_s13 }
 0x6de   : > { %1709 = vrot.lane.b32.xlu1 %v3062_v29, %s2682_s15  ;;  %v1522_v29 = vpop.permute.xlu2 %1521 }
 0x6e1   : > { %1868 = vrot.lane.b32.xlu0 %v3066_v31, %s2686_s27 }
 0x6e6   : > { %1862 = vrot.lane.b32.xlu1 %v3096_v50, %s2687_s26  ;;  %v1524_v2 = vpop.permute.xlu2 %1523 }
 0x6e9   : > { %1705 = vrot.lane.b32.xlu0 %v3096_v50, %s2680_s12 }
 0x6ee   : > { %v1712_v15 = vpop.permute.xlu2 %1711 }
 0x6f1   : > { %1864 = vrot.lane.b32.xlu0 %v3108_v57, %s2687_s26 }
 0x6f6   : > { %v1867_v55 = vpop.permute.xlu2 %1866 }
 0x6fe   : > { %v1708_v8 = vpop.permute.xlu2 %1707 }
 0x730   : > { %v1292_v49 = vpop.xlane.xlu1 %1291 }
 0x731   : > { %2612 = vrcp.f32 %v1292_v49  ;;  %v1307_v52 = vand.u32 2147483648, %v1292_v49  ;;  %v1305_v58 = vand.u32 2147483647, %v1292_v49  ;;  %vm1301_vm9 = vweird.f32 %v1292_v49 }
 0x733   : > { %v1308_v57 = vor.u32 1.1754944e-38, %v1307_v52  ;;  %vm1306_vm11 = vcmp.eq.f32.partialorder %v1305_v58, 8.507059e+37 }
 0x737   : > { %v2613_v22 = vpop.eup %2612  ;;  %v1515_v19 = vpop.f32.mrf.mxu3 }
 0x738   : > { %v1297_v5 = vmul.f32 %v2613_v22, %v1292_v49  ;;  %v1295_v51 = vpop.xlane.xlu0 %1294  ;;  %2461 = vmatmul.msk.f32.vlgmr.msrb.gmra.mxu3 %vm772_vm15, %v1515_v19  ;;  %vm1302_vm8 = vweird.f32 %v2613_v22 }
 0x739   : > { %2614 = vrcp.f32 %v1295_v51  ;;  %vm1303_vm10 = vmor %vm1301_vm9, %vm1302_vm8  ;;  %v1321_v4 = vand.u32 2147483648, %v1295_v51  ;;  %v1319_v6 = vand.u32 2147483647, %v1295_v51  ;;  %vm1315_vm13 = vweird.f32 %v1295_v51 }
 0x73a   : > { %v1298_v31 = vsub.f32 1.0, %v1297_v5 }
 0x73b   : > { %v1322_v60 = vor.u32 1.1754944e-38, %v1321_v4  ;;  %vm1320_vm2 = vcmp.eq.f32.partialorder %v1319_v6, 8.507059e+37 }
 0x73c   : > { %v1299_v54 = vmul.f32 %v2613_v22, %v1298_v31 }
 0x73e   : > { %v1300_v59 = vadd.f32 %v2613_v22, %v1299_v54 }
 0x73f   : > { %v2615_v50 = vpop.eup %2614  ;;  %v1518_v61 = vpop.f32.mrf.mxu3 }
 0x740   : > { %v1304_v25 = vsel %vm1303_vm10, %v2613_v22, %v1300_v59  ;;  %v1311_v62 = vmul.f32 %v2615_v50, %v1295_v51  ;;  %2462 = vmatmul.msk.f32.gmra.mxu3 %vm772_vm15, %v1518_v61  ;;  %vm1316_vm12 = vweird.f32 %v2615_v50 }
 0x741   : > { %v1309_v63 = vsel %vm1306_vm11, %v1308_v57, %v1304_v25  ;;  %vm1317_vm14 = vmor %vm1315_vm13, %vm1316_vm12 }
 0x742   : > { %v1312_v0 = vsub.f32 1.0, %v1311_v62  ;;  %v1324_v47 = vmul.f32 %v2609_v41, %v1309_v63 }
 0x744   : > { %v1313_v38 = vmul.f32 %v2615_v50, %v1312_v0  ;;  %2441 = vmatmul.msk.f32.vlgmr.msra.gmra.mxu0 %vm810_vm0, %v1324_v47 }
 0x746   : > { %v1314_v3 = vadd.f32 %v2615_v50, %v1313_v38 }
 0x748   : > { %v1528_v7 = vpop.permute.xlu1 %1527  ;;  %v1318_v10 = vsel %vm1317_vm14, %v2615_v50, %v1314_v3 }
 0x749   : > { %2453 = vmatpush.xpose.msk.msrb.mxu0 %vm772_vm15, %v1528_v7  ;;  %v1323_v11 = vsel %vm1320_vm2, %v1322_v60, %v1318_v10 }
 0x74a   : > { %v1325_v12 = vmul.f32 %v2611_v45, %v1323_v11 }
 0x74b   : > { %v1526_v14 = vpop.permute.xlu0 %1525 }
 0x74c   : > { %2442 = vmatmul.msk.f32.gmra.mxu0 %vm810_vm0, %v1325_v12 }
 0x74d   : > { %2454 = vmatpush.xpose.msk.msrb.mxu0 %vm772_vm15, %v1526_v14 }
 0x750   : > { %v1710_v1 = vpop.permute.xlu1 %1709 }
 0x751   : > { %2463 = vmatpush.xpose.msk.msra.mxu0 %vm772_vm15, %v1712_v15 }
 0x753   : > { %v1869_v28 = vpop.permute.xlu0 %1868 }
 0x754   : > { %2455 = vmatmul.msk.f32.vlgmr.msrb.gmra.mxu0 %vm772_vm15, %v1522_v29  ;;  %2471 = vmatpush.xpose.msk.msra.mxu3 %vm772_vm15, %v1869_v28 }
 0x755   : > { %2464 = vmatpush.xpose.msk.msra.mxu0 %vm772_vm15, %v1710_v1 }
 0x758   : > { %2472 = vmatpush.xpose.msk.msra.mxu3 %vm772_vm15, %v1867_v55  ;;  %v1863_v18 = vpop.permute.xlu1 %1862 }
 0x75b   : > { %v1706_v34 = vpop.permute.xlu0 %1705  ;;  %2473 = vmatmul.msk.f32.vlgmr.msra.gmra.mxu3 %vm772_vm15, %v1863_v18 }
 0x75c   : > { %2456 = vmatmul.msk.f32.gmra.mxu0 %vm772_vm15, %v1524_v2 }
 0x763   : > { %v1865_v53 = vpop.permute.xlu0 %1864 }
 0x764   : > { %2465 = vmatmul.msk.f32.vlgmr.msra.gmra.mxu0 %vm772_vm15, %v1706_v34  ;;  %2474 = vmatmul.msk.f32.gmra.mxu3 %vm772_vm15, %v1865_v53 }
 0x76c   : > { %2466 = vmatmul.msk.f32.gmra.mxu0 %vm772_vm15, %v1708_v8 }
 0x7bb   : > { %v3211_v27 = vpop.f32.mrf.mxu3 }
 0x7c1   : > { %v1355_v23 = vpop.f32.mrf.mxu0 }
 0x7c2   : > { %2443 = vmatmul.msk.f32.vlgmr.msra.gmra.mxu1 %vm772_vm15, %v1355_v23 }
 0x7c3   : > { %v3214_v40 = vpop.f32.mrf.mxu3 }
 0x7c9   : > { %v1358_v24 = vpop.f32.mrf.mxu0 }
 0x7ca   : > { %2444 = vmatmul.msk.f32.gmra.mxu1 %vm772_vm15, %v1358_v24 }
 0x7d1   : > { %v1554_v43 = vpop.f32.mrf.mxu0 }
 0x7d2   : > { %v1560_v33 = vmul.f32 0.35355338, %v1554_v43 }
 0x7d4   : > { %v1562_v35 = vadd.f32 %v3124_v56, %v1560_v33  ;;  %v1073_v33 = vadd.f32 %v3156_v42, %v3112_v13 }
 0x7d6   : > { %v1564_v9 = vsel %vm810_vm0, %v1562_v35, -inf }
 0x7d7   : > { %1565 = vmax.xlane.f32.xlu1 %v1564_v9  ;;  %v1233_v9 = vadd.f32 %v3116_v17, %v1073_v33 }
 0x7d9   : > { %v1557_v21 = vpop.f32.mrf.mxu0 }
 0x7da   : > { %v1561_v30 = vmul.f32 0.35355338, %v1557_v21 }
 0x7dc   : > { %v1563_v41 = vadd.f32 %v3132_v32, %v1561_v30  ;;  %v2664_v30 = vld [vmem:[#allocation2] sm:$0xff] }
 0x7de   : > { %v1895_v44 = vpop.f32.mrf.mxu3  ;;  %v1567_v39 = vsel %vm810_vm0, %v1563_v41, -inf }
 0x7df   : > { %v1901_v45 = vmul.f32 0.35355338, %v1895_v44  ;;  %1568 = vmax.xlane.f32.xlu2 %v1567_v39 }
 0x7e1   : > { %v1738_v48 = vpop.f32.mrf.mxu0  ;;  %v1903_v49 = vadd.f32 %v3124_v56, %v1901_v45  ;;  %v1076_v45 = vadd.f32 %v3158_v36, %v3114_v16 }
 0x7e2   : > { %v1744_v22 = vmul.f32 0.35355338, %v1738_v48  ;;  %v2665_v48 = vld [vmem:[#allocation2 + $0x8] sm:$0xff] }
 0x7e3   : > { %v1905_v19 = vsel %vm810_vm0, %v1903_v49, -inf  ;;  %v1234_v42 = vadd.f32 %v3118_v37, %v1076_v45 }
 0x7e4   : > { %1906 = vmax.xlane.f32.xlu1 %v1905_v19  ;;  %v1746_v5 = vadd.f32 %v3124_v56, %v1744_v22 }
 0x7e6   : > { %v1748_v51 = vsel %vm810_vm0, %v1746_v5, -inf }
 0x7e7   : > { %1749 = vmax.xlane.f32.xlu0 %v1748_v51  ;;  %v1898_v29 = vpop.f32.mrf.mxu3 }
 0x7e8   : > { %v1902_v31 = vmul.f32 0.35355338, %v1898_v29 }
 0x7e9   : > { %v1741_v52 = vpop.f32.mrf.mxu0 }
 0x7ea   : > { %v1745_v54 = vmul.f32 0.35355338, %v1741_v52  ;;  %v1904_v58 = vadd.f32 %v3132_v32, %v1902_v31 }
 0x7ec   : > { %v1747_v59 = vadd.f32 %v3132_v32, %v1745_v54  ;;  %v1908_v57 = vsel %vm810_vm0, %v1904_v58, -inf }
 0x7ee   : > { %v1751_v50 = vsel %vm810_vm0, %v1747_v59, -inf }
 0x7ef   : > { %1752 = vmax.xlane.f32.xlu2 %v1751_v50  ;;  %1909 = vmax.xlane.f32.xlu0 %v1908_v57 }
 0x84a   : > { %v1566_v61 = vpop.xlane.xlu1 %1565 }
 0x84b   : > { %v1570_v25 = vsub.f32 %v1562_v35, %v1566_v61  ;;  %v1384_v35 = vpop.f32.mrf.mxu1 }
 0x84c   : > { %v1390_v21 = vadd.f32 %v1384_v35, %v1233_v9 }
 0x84d   : > { %v1572_v56 = vmul.f32 1.442695, %v1570_v25 }
 0x84f   : > { %2616 = vpow2.f32 %v1572_v56 }
 0x852   : > { %v1569_v62 = vpop.xlane.xlu2 %1568 }
 0x853   : > { %v1571_v63 = vsub.f32 %v1563_v41, %v1569_v62  ;;  %v3258_v41 = vadd.f32 %v2664_v30, %v1390_v21  ;;  %v1387_v13 = vpop.f32.mrf.mxu1 }
 0x854   : > { %v1391_v17 = vadd.f32 %v1387_v13, %v1234_v42 }
 0x855   : > { %v3227_v0 = vpop.eup %2616  ;;  %v1574_v47 = vmul.f32 1.442695, %v1571_v63  ;;  %v2024_v44 = vmul.f32 %v3258_v41, %v3258_v41 }
 0x856   : > { %v1576_v2 = vsel %vm810_vm0, %v3227_v0, 0.0 }
 0x857   : > { %2618 = vpow2.f32 %v1574_v47  ;;  %1577 = vadd.xlane.f32.xlu2 %v1576_v2  ;;  %v1907_v4 = vpop.xlane.xlu1 %1906  ;;  %v2028_v39 = vsel %vm494_vm1, %v2024_v44, 0.0 }
 0x858   : > { %v1911_v60 = vsub.f32 %v1903_v49, %v1907_v4  ;;  %v3268_v49 = vadd.f32 %v2665_v48, %v1391_v17 }
 0x85a   : > { %v1750_v32 = vpop.xlane.xlu0 %1749  ;;  %v1913_v10 = vmul.f32 1.442695, %v1911_v60  ;;  %v2025_v22 = vmul.f32 %v3268_v49, %v3268_v49 }
 0x85b   : > { %v1754_v38 = vsub.f32 %v1746_v5, %v1750_v32 }
 0x85d   : > { %v3231_v6 = vpop.eup %2618  ;;  %v1756_v3 = vmul.f32 1.442695, %v1754_v38 }
 0x85e   : > { %v1579_v7 = vsel %vm810_vm0, %v3231_v6, 0.0 }
 0x85f   : > { %2620 = vpow2.f32 %v1756_v3  ;;  %1580 = vadd.xlane.f32.xlu1 %v1579_v7 }
 0x860   : > { %2622 = vpow2.f32 %v1913_v10 }
 0x862   : > { %v1753_v11 = vpop.xlane.xlu2 %1752  ;;  %v1910_v12 = vpop.xlane.xlu0 %1909 }
 0x863   : > { %v1755_v14 = vsub.f32 %v1747_v59, %v1753_v11  ;;  %v1912_v28 = vsub.f32 %v1904_v58, %v1910_v12 }
 0x865   : > { %v3235_v15 = vpop.eup %2620  ;;  %v1758_v1 = vmul.f32 1.442695, %v1755_v14  ;;  %v1915_v18 = vmul.f32 1.442695, %v1912_v28 }
 0x866   : > { %v1760_v55 = vsel %vm810_vm0, %v3235_v15, 0.0  ;;  %v3239_v34 = vpop.eup %2622 }
 0x867   : > { %2624 = vpow2.f32 %v1758_v1  ;;  %1761 = vadd.xlane.f32.xlu0 %v1760_v55  ;;  %v1917_v23 = vsel %vm810_vm0, %v3239_v34, 0.0 }
 0x868   : > { %2626 = vpow2.f32 %v1915_v18 }
 0x86d   : > { %v3241_v53 = vpop.eup %2624 }
 0x86e   : > { %v1763_v8 = vsel %vm810_vm0, %v3241_v53, 0.0  ;;  %v3249_v24 = vpop.eup %2626 }
 0x86f   : > { %2550 = vrot.lane.b32.xlu2 %v3140_v46, %s2683_s30  ;;  %1764 = vadd.xlane.f32.xlu1 %v1763_v8  ;;  %v1920_v43 = vsel %vm810_vm0, %v3249_v24, 0.0 }
 0x870   : > { %1918 = vadd.xlane.f32.xlu0 %v1917_v23 }
 0x877   : > { %1921 = vadd.xlane.f32.xlu1 %v1920_v43 }
 0x884   : > { %2555 = vrot.lane.b32.xlu0 %v3140_v46, %s2684_s21 }
 0x890   : > { %2560 = vrot.lane.b32.xlu1 %v3140_v46, %s2688_s28  ;;  %v2031_v46 = vsel %vm494_vm1, %v2025_v22, 0.0 }
 0x898   : > { %2029 = vadd.xlane.f32.xlu2 %v2028_v39 }
 0x8ae   : > { %2032 = vadd.xlane.f32.xlu0 %v2031_v46 }
 0x8ca   : > { %v1578_v19 = vpop.xlane.xlu2 %1577 }
 0x8cb   : > { %2628 = vrcp.f32 %v1578_v19  ;;  %v1593_v37 = vand.u32 2147483648, %v1578_v19  ;;  %v1591_v58 = vand.u32 2147483647, %v1578_v19  ;;  %vm1587_vm4 = vweird.f32 %v1578_v19 }
 0x8cd   : > { %v1594_v57 = vor.u32 1.1754944e-38, %v1593_v37  ;;  %vm1592_vm6 = vcmp.eq.f32.partialorder %v1591_v58, 8.507059e+37 }
 0x8d1   : > { %v2629_v5 = vpop.eup %2628 }
 0x8d2   : > { %v1583_v51 = vmul.f32 %v2629_v5, %v1578_v19  ;;  %v2551_v29 = vpop.permute.xlu2 %2550  ;;  %v1581_v31 = vpop.xlane.xlu1 %1580  ;;  %vm1588_vm3 = vweird.f32 %v2629_v5 }
 0x8d3   : > { %v2552_v16 = vunpack.i.l.bf16 %v2551_v29  ;;  %2630 = vrcp.f32 %v1581_v31  ;;  %v2553_v52 = vunpack.i.h.bf16 %v2551_v29  ;;  %vm1589_vm5 = vmor %vm1587_vm4, %vm1588_vm3  ;;  %v1607_v2 = vand.u32 2147483648, %v1581_v31 }
 0x8d4   : > { %v1584_v36 = vsub.f32 1.0, %v1583_v51  ;;  %v1605_v4 = vand.u32 2147483647, %v1581_v31  ;;  %vm1601_vm8 = vweird.f32 %v1581_v31 }
 0x8d5   : > { %1638 = vmatpush.msrb.mxu1 %v2552_v16  ;;  %v1608_v60 = vor.u32 1.1754944e-38, %v1607_v2 }
 0x8d6   : > { %v1585_v54 = vmul.f32 %v2629_v5, %v1584_v36  ;;  %vm1606_vm10 = vcmp.eq.f32.partialorder %v1605_v4, 8.507059e+37 }
 0x8d7   : > { %1639 = vmatpush.msrb.mxu1 %v2553_v52 }
 0x8d8   : > { %v1586_v59 = vadd.f32 %v2629_v5, %v1585_v54 }
 0x8d9   : > { %v2631_v50 = vpop.eup %2630 }
 0x8da   : > { %v1590_v61 = vsel %vm1589_vm5, %v2629_v5, %v1586_v59  ;;  %v1597_v25 = vmul.f32 %v2631_v50, %v1581_v31  ;;  %v1762_v56 = vpop.xlane.xlu0 %1761  ;;  %vm1602_vm7 = vweird.f32 %v2631_v50 }
 0x8db   : > { %v1595_v62 = vsel %vm1592_vm6, %v1594_v57, %v1590_v61  ;;  %2632 = vrcp.f32 %v1762_v56  ;;  %vm1603_vm9 = vmor %vm1601_vm8, %vm1602_vm7  ;;  %v1777_v9 = vand.u32 2147483648, %v1762_v56  ;;  %vm1771_vm12 = vweird.f32 %v1762_v56 }
 0x8dc   : > { %v1598_v63 = vsub.f32 1.0, %v1597_v25  ;;  %v1610_v47 = vmul.f32 %v3227_v0, %v1595_v62  ;;  %v1775_v21 = vand.u32 2147483647, %v1762_v56 }
 0x8dd   : > { %v1778_v45 = vor.u32 1.1754944e-38, %v1777_v9 }
 0x8de   : > { %v1599_v32 = vmul.f32 %v2631_v50, %v1598_v63  ;;  %2457 = vmatmul.msk.f32.vlgmr.msrb.gmra.mxu1 %vm810_vm0, %v1610_v47  ;;  %vm1776_vm14 = vcmp.eq.f32.partialorder %v1775_v21, 8.507059e+37 }
 0x8e0   : > { %v1600_v38 = vadd.f32 %v2631_v50, %v1599_v32 }
 0x8e1   : > { %v2633_v3 = vpop.eup %2632 }
 0x8e2   : > { %v1765_v7 = vpop.xlane.xlu1 %1764  ;;  %v1604_v10 = vsel %vm1603_vm9, %v2631_v50, %v1600_v38  ;;  %v1767_v12 = vmul.f32 %v2633_v3, %v1762_v56  ;;  %vm1772_vm11 = vweird.f32 %v2633_v3 }
 0x8e3   : > { %2634 = vrcp.f32 %v1765_v7  ;;  %v1609_v11 = vsel %vm1606_vm10, %v1608_v60, %v1604_v10  ;;  %v1919_v14 = vpop.xlane.xlu0 %1918  ;;  %vm1773_vm13 = vmor %vm1771_vm12, %vm1772_vm11  ;;  %v1791_v19 = vand.u32 2147483648, %v1765_v7  ;;  %vm1785_vm3 = vweird.f32 %v1765_v7 }
 0x8e4   : > { %v1611_v0 = vmul.f32 %v3231_v6, %v1609_v11  ;;  %2636 = vrcp.f32 %v1919_v14  ;;  %v1768_v1 = vsub.f32 1.0, %v1767_v12  ;;  %v1789_v29 = vand.u32 2147483647, %v1765_v7  ;;  %v2102_v11 = vld [vmem:[%s2782_s20 + $0x18] sm:$0xff]  ;;  %v2101_v12 = vld [vmem:[%s2782_s20 + $0x10] sm:$0xff] }
 0x8e5   : > { %v1792_v37 = vor.u32 1.1754944e-38, %v1791_v19  ;;  %v1934_v52 = vand.u32 2147483648, %v1919_v14  ;;  %vm1928_vm6 = vweird.f32 %v1919_v14  ;;  %v1932_v54 = vand.u32 2147483647, %v1919_v14 }
 0x8e6   : > { %2458 = vmatmul.msk.f32.gmra.mxu1 %vm810_vm0, %v1611_v0  ;;  %v1769_v55 = vmul.f32 %v2633_v3, %v1768_v1  ;;  %vm1790_vm7 = vcmp.eq.f32.partialorder %v1789_v29, 8.507059e+37  ;;  %v2099_v1 = vld [vmem:[%s2782_s20] sm:$0xff] }
 0x8e7   : > { %v1935_v50 = vor.u32 1.1754944e-38, %v1934_v52  ;;  %vm1933_vm9 = vcmp.eq.f32.partialorder %v1932_v54, 8.507059e+37 }
 0x8e8   : > { %v1770_v43 = vadd.f32 %v2633_v3, %v1769_v55 }
 0x8e9   : > { %v2635_v28 = vpop.eup %2634 }
 0x8ea   : > { %v1781_v18 = vmul.f32 %v2635_v28, %v1765_v7  ;;  %v3277_v8 = vpop.xlane.xlu1 %1921  ;;  %v2637_v23 = vpop.eup %2636  ;;  %v1774_v6 = vsel %vm1773_vm13, %v2633_v3, %v1770_v43  ;;  %vm1786_vm2 = vweird.f32 %v2635_v28 }
 0x8eb   : > { %2638 = vrcp.f32 %v3277_v8  ;;  %v1924_v35 = vmul.f32 %v2637_v23, %v1919_v14  ;;  %v1779_v42 = vsel %vm1776_vm14, %v1778_v45, %v1774_v6  ;;  %vm1787_vm4 = vmor %vm1785_vm3, %vm1786_vm2  ;;  %vm1929_vm5 = vweird.f32 %v2637_v23 }
 0x8ec   : > { %v1782_v33 = vsub.f32 1.0, %v1781_v18  ;;  %v1794_v51 = vmul.f32 %v3235_v15, %v1779_v42  ;;  %vm1930_vm8 = vmor %vm1928_vm6, %vm1929_vm5  ;;  %vm1942_vm11 = vweird.f32 %v3277_v8  ;;  %v1946_v2 = vand.u32 2147483647, %v3277_v8 }
 0x8ed   : > { %v1925_v44 = vsub.f32 1.0, %v1924_v35 }
 0x8ee   : > { %v1783_v30 = vmul.f32 %v2635_v28, %v1782_v33  ;;  %vm1947_vm13 = vcmp.eq.f32.partialorder %v1946_v2, 8.507059e+37 }
 0x8ef   : > { %v1926_v48 = vmul.f32 %v2637_v23, %v1925_v44 }
 0x8f0   : > { %v1784_v46 = vadd.f32 %v2635_v28, %v1783_v30 }
 0x8f1   : > { %v2639_v39 = vpop.eup %2638  ;;  %v1927_v31 = vadd.f32 %v2637_v23, %v1926_v48 }
 0x8f2   : > { %v1938_v22 = vmul.f32 %v2639_v39, %v3277_v8  ;;  %v1788_v36 = vsel %vm1787_vm4, %v2635_v28, %v1784_v46  ;;  %vm1943_vm10 = vweird.f32 %v2639_v39 }
 0x8f3   : > { %v1793_v58 = vsel %vm1790_vm7, %v1792_v37, %v1788_v36  ;;  %v1931_v59 = vsel %vm1930_vm8, %v2637_v23, %v1927_v31  ;;  %vm1944_vm12 = vmor %vm1942_vm11, %vm1943_vm10 }
 0x8f4   : > { %v1939_v16 = vsub.f32 1.0, %v1938_v22  ;;  %v1795_v61 = vmul.f32 %v3241_v53, %v1793_v58  ;;  %v1936_v25 = vsel %vm1933_vm9, %v1935_v50, %v1931_v59  ;;  %v2666_v59 = vld [vmem:[#allocation2 + $0x10] sm:$0xff] }
 0x8f5   : > { %v1951_v47 = vmul.f32 %v3239_v34, %v1936_v25 }
 0x8f6   : > { %v2556_v13 = vpop.permute.xlu0 %2555  ;;  %v1940_v15 = vmul.f32 %v2639_v39, %v1939_v16 }
 0x8f7   : > { %v2557_v17 = vunpack.i.l.bf16 %v2556_v13  ;;  %v2558_v5 = vunpack.i.h.bf16 %v2556_v13  ;;  %v3308_v13 = vld [vmem:[%s3403_s29] ss:$0 sm:$0xff] }
 0x8f8   : > { %v1941_v62 = vadd.f32 %v2639_v39, %v1940_v15 }
 0x8f9   : > { %1822 = vmatpush.msra.mxu1 %v2557_v17 }
 0x8fa   : > { %v1945_v53 = vsel %vm1944_vm12, %v2639_v39, %v1941_v62  ;;  %vm2252_vm12 = vcmask 523264  }
 0x8fb   : > { %1823 = vmatpush.msra.mxu1 %v2558_v5 }
 0x8fc   : > { %2467 = vmatmul.msk.f32.vlgmr.msra.gmra.mxu1 %vm810_vm0, %v1794_v51 }
 0x8fd   : > { %2009 = vmatpush.msrb.mxu1 %v3206_v20  ;;  %v1948_v20 = vand.u32 2147483648, %v3277_v8 }
 0x8ff   : > { %v1949_v32 = vor.u32 1.1754944e-38, %v1948_v20  ;;  %v2667_v20 = vld [vmem:[#allocation2 + $0x18] sm:$0xff] }
 0x901   : > { %v1950_v4 = vsel %vm1947_vm13, %v1949_v32, %v1945_v53  ;;  %v2251_v32 = vld [vmem:[%s2787_s24 + $0x38] sm:$0xff] }
 0x902   : > { %v2561_v57 = vpop.permute.xlu1 %2560  ;;  %v1952_v38 = vmul.f32 %v3249_v24, %v1950_v4  ;;  %v2100_v24 = vld [vmem:[%s2782_s20 + $0x8] sm:$0xff]  ;;  %2273 = vmatpush.msrb.mxu3 %v2251_v32 }
 0x903   : > { %v2562_v56 = vunpack.i.l.bf16 %v2561_v57  ;;  %v2563_v63 = vunpack.i.h.bf16 %v2561_v57 }
 0x904   : > { %2468 = vmatmul.msk.f32.gmra.mxu1 %vm810_vm0, %v1795_v61 }
 0x905   : > { %1979 = vmatpush.msrb.mxu0 %v2562_v56 }
 0x907   : > { %1980 = vmatpush.msrb.mxu0 %v2563_v63 }
 0x908   : > { %2475 = vmatmul.msk.f32.vlgmr.msrb.gmra.mxu0 %vm810_vm0, %v1951_v47 }
 0x90b   : > { %v2030_v3 = vpop.xlane.xlu2 %2029 }
 0x90c   : > { %v2040_v60 = vmul.f32 %v2030_v3, %v2825_v26 }
 0x90e   : > { %v2044_v7 = vadd.f32 1e-06, %v2040_v60  ;;  %v2248_v60 = vld [vmem:[%s2787_s24 + $0x20] sm:$0xff] }
 0x910   : > { %2476 = vmatmul.msk.f32.gmra.mxu0 %vm810_vm0, %v1952_v38  ;;  %2640 = vrsqrt.f32 %v2044_v7  ;;  %vm2054_vm14 = vweird.f32 %v2044_v7  ;;  %v2250_v38 = vld [vmem:[%s2787_s24 + $0x30] sm:$0xff] }
 0x911   : > { %2274 = vmatpush.msrb.mxu3 %v2250_v38 }
 0x916   : > { %v2641_v55 = vpop.eup %2640 }
 0x917   : > { %v2049_v18 = vmul.f32 %v2641_v55, %v2044_v7  ;;  %vm2055_vm0 = vweird.f32 %v2641_v55 }
 0x918   : > { %vm2056_vm2 = vmor %vm2054_vm14, %vm2055_vm0 }
 0x919   : > { %v2050_v8 = vmul.f32 %v2641_v55, %v2049_v18 }
 0x91b   : > { %v2051_v43 = vmul.f32 0.5, %v2050_v8 }
 0x91d   : > { %v2052_v35 = vsub.f32 1.5, %v2051_v43 }
 0x91f   : > { %v2053_v6 = vmul.f32 %v2641_v55, %v2052_v35 }
 0x921   : > { %v2033_v10 = vpop.xlane.xlu0 %2032  ;;  %v2057_v44 = vsel %vm2056_vm2, %v2641_v55, %v2053_v6 }
 0x922   : > { %v2041_v14 = vmul.f32 %v2033_v10, %v2825_v26  ;;  %v2088_v42 = vmul.f32 %v2057_v44, %v3258_v41  ;;  %v2247_v10 = vld [vmem:[%s2787_s24 + $0x18] sm:$0xff] }
 0x924   : > { %v2045_v28 = vadd.f32 1e-06, %v2041_v14  ;;  %v2095_v22 = vmul.f32 %v3308_v13, %v2088_v42  ;;  %v2245_v14 = vld [vmem:[%s2787_s24 + $0x8] sm:$0xff] }
 0x926   : > { %2642 = vrsqrt.f32 %v2045_v28  ;;  %vm2064_vm4 = vweird.f32 %v2045_v28 }
 0x92c   : > { %v2643_v23 = vpop.eup %2642 }
 0x92d   : > { %v2059_v33 = vmul.f32 %v2643_v23, %v2045_v28  ;;  %vm2065_vm3 = vweird.f32 %v2643_v23 }
 0x92e   : > { %vm2066_vm5 = vmor %vm2064_vm4, %vm2065_vm3 }
 0x92f   : > { %v2060_v9 = vmul.f32 %v2643_v23, %v2059_v33 }
 0x931   : > { %v2061_v30 = vmul.f32 0.5, %v2060_v9 }
 0x933   : > { %v2062_v39 = vsub.f32 1.5, %v2061_v30 }
 0x935   : > { %v2063_v17 = vmul.f32 %v2643_v23, %v2062_v39 }
 0x937   : > { %v2067_v46 = vsel %vm2066_vm5, %v2643_v23, %v2063_v17 }
 0x938   : > { %v2089_v19 = vmul.f32 %v2067_v46, %v3268_v49 }
 0x93a   : > { %v2096_v51 = vmul.f32 %v3308_v13, %v2089_v19 }
 0x95b   : > { %v1641_v34 = vpop.f32.mrf.mxu1 }
 0x95c   : > { %2459 = vmatmul.msk.f32.vlgmr.msra.gmra.mxu2 %vm772_vm15, %v1641_v34  ;;  %v2249_v34 = vld [vmem:[%s2787_s24 + $0x28] sm:$0xff] }
 0x95d   : > { %2127 = vmatpush.msra.mxu2 %v2102_v11  ;;  %2275 = vmatpush.msrb.mxu3 %v2249_v34  ;;  %v2246_v11 = vld [vmem:[%s2787_s24 + $0x10] sm:$0xff] }
 0x95f   : > { %2128 = vmatpush.msra.mxu2 %v2101_v12  ;;  %2276 = vmatpush.msrb.mxu3 %v2248_v60 }
 0x961   : > { %2129 = vmatpush.msra.mxu2 %v2100_v24  ;;  %2277 = vmatpush.msrb.mxu3 %v2247_v10 }
 0x963   : > { %v1644_v0 = vpop.f32.mrf.mxu1  ;;  %2130 = vmatpush.msra.mxu2 %v2099_v1  ;;  %2278 = vmatpush.msrb.mxu3 %v2246_v11 }
 0x964   : > { %2460 = vmatmul.msk.f32.gmra.mxu2 %vm772_vm15, %v1644_v0  ;;  %v2244_v0 = vld [vmem:[%s2787_s24] sm:$0xff] }
 0x965   : > { %2279 = vmatpush.msrb.mxu3 %v2245_v14 }
 0x967   : > { %2280 = vmatpush.msrb.mxu3 %v2244_v0 }
 0x979   : > { %v1825_v21 = vpop.f32.mrf.mxu1 }
 0x97a   : > { %2469 = vmatmul.msk.f32.vlgmr.msrb.gmra.mxu2 %vm772_vm15, %v1825_v21 }
 0x981   : > { %v1828_v45 = vpop.f32.mrf.mxu1 }
 0x982   : > { %2470 = vmatmul.msk.f32.gmra.mxu2 %vm772_vm15, %v1828_v45 }
 0x985   : > { %v1982_v48 = vpop.f32.mrf.mxu0 }
 0x986   : > { %2477 = vmatmul.msk.f32.vlgmr.msrb.gmra.mxu1 %vm772_vm15, %v1982_v48 }
 0x98a   : > { %2479 = vmatmul.msk.f32.vlgmr.msra.gmra.mxu2 %vm494_vm1, %v2095_v22 }
 0x98d   : > { %v1985_v5 = vpop.f32.mrf.mxu0 }
 0x98e   : > { %2478 = vmatmul.msk.f32.gmra.mxu1 %vm772_vm15, %v1985_v5 }
 0x992   : > { %2480 = vmatmul.msk.f32.gmra.mxu2 %vm494_vm1, %v2096_v51 }
 0x9df   : > { %v1670_v29 = vpop.f32.mrf.mxu2 }
 0x9e0   : > { %v1700_v36 = vadd.f32 %v3211_v27, %v1670_v29 }
 0x9e7   : > { %v1673_v31 = vpop.f32.mrf.mxu2 }
 0x9e8   : > { %v1703_v50 = vadd.f32 %v3214_v40, %v1673_v31 }
 0x9fd   : > { %v1854_v16 = vpop.f32.mrf.mxu2 }
 0x9fe   : > { %v1860_v37 = vadd.f32 %v1854_v16, %v1700_v36 }
 0xa03   : > { %v2011_v52 = vpop.f32.mrf.mxu1 }
 0xa04   : > { %v2017_v54 = vadd.f32 %v2011_v52, %v1860_v37 }
 0xa05   : > { %v1857_v58 = vpop.f32.mrf.mxu2 }
 0xa06   : > { %v3319_v15 = vadd.f32 %v2666_v59, %v2017_v54  ;;  %v1861_v61 = vadd.f32 %v1857_v58, %v1703_v50 }
 0xa08   : > { %v2026_v57 = vmul.f32 %v3319_v15, %v3319_v15 }
 0xa0a   : > { %v2034_v25 = vsel %vm494_vm1, %v2026_v57, 0.0 }
 0xa0b   : > { %v2014_v56 = vpop.f32.mrf.mxu1  ;;  %2035 = vadd.xlane.f32.xlu1 %v2034_v25 }
 0xa0c   : > { %v2018_v27 = vadd.f32 %v2014_v56, %v1861_v61 }
 0xa0d   : > { %v3325_v62 = vpop.f32.mrf.mxu2 }
 0xa0e   : > { %v3327_v63 = vadd.f32 %v2667_v20, %v2018_v27  ;;  %v2483_v53 = vmul.f32 -1.442695, %v3325_v62 }
 0xa10   : > { %v2027_v40 = vmul.f32 %v3327_v63, %v3327_v63  ;;  %2644 = vpow2.f32 %v2483_v53 }
 0xa12   : > { %v2037_v47 = vsel %vm494_vm1, %v2027_v40, 0.0 }
 0xa13   : > { %2038 = vadd.xlane.f32.xlu2 %v2037_v47 }
 0xa15   : > { %v3332_v2 = vpop.f32.mrf.mxu2 }
 0xa16   : > { %2230 = vrot.lane.b32.xlu0 %v3332_v2, %s2685_s22  ;;  %v2484_v4 = vmul.f32 -1.442695, %v3332_v2  ;;  %v2645_v3 = vpop.eup %2644 }
 0xa17   : > { %v2156_v7 = vadd.f32 1.0, %v2645_v3 }
 0xa18   : > { %2646 = vpow2.f32 %v2484_v4 }
 0xa19   : > { %2648 = vrcp.f32 %v2156_v7  ;;  %v2171_v6 = vand.u32 2147483648, %v2156_v7  ;;  %vm2165_vm6 = vweird.f32 %v2156_v7  ;;  %v2169_v30 = vand.u32 2147483647, %v2156_v7 }
 0xa1b   : > { %v2172_v17 = vor.u32 1.1754944e-38, %v2171_v6  ;;  %vm2170_vm8 = vcmp.eq.f32.partialorder %v2169_v30, 8.507059e+37 }
 0xa1e   : > { %v2647_v12 = vpop.eup %2646 }
 0xa1f   : > { %v2157_v24 = vadd.f32 1.0, %v2647_v12  ;;  %v2649_v1 = vpop.eup %2648 }
 0xa20   : > { %v2161_v28 = vmul.f32 %v2649_v1, %v2156_v7  ;;  %vm2166_vm15 = vweird.f32 %v2649_v1 }
 0xa21   : > { %2650 = vrcp.f32 %v2157_v24  ;;  %vm2167_vm7 = vmor %vm2165_vm6, %vm2166_vm15  ;;  %v2186_v29 = vand.u32 2147483648, %v2157_v24  ;;  %vm2180_vm10 = vweird.f32 %v2157_v24  ;;  %v2184_v31 = vand.u32 2147483647, %v2157_v24 }
 0xa22   : > { %v2162_v55 = vsub.f32 1.0, %v2161_v28 }
 0xa23   : > { %v2187_v58 = vor.u32 1.1754944e-38, %v2186_v29  ;;  %vm2185_vm0 = vcmp.eq.f32.partialorder %v2184_v31, 8.507059e+37 }
 0xa24   : > { %v2163_v33 = vmul.f32 %v2649_v1, %v2162_v55 }
 0xa26   : > { %v2164_v21 = vadd.f32 %v2649_v1, %v2163_v33 }
 0xa27   : > { %v2651_v18 = vpop.eup %2650 }
 0xa28   : > { %v2176_v43 = vmul.f32 %v2651_v18, %v2157_v24  ;;  %v2168_v42 = vsel %vm2167_vm7, %v2649_v1, %v2164_v21  ;;  %vm2181_vm9 = vweird.f32 %v2651_v18 }
 0xa29   : > { %v2173_v19 = vsel %vm2170_vm8, %v2172_v17, %v2168_v42  ;;  %vm2182_vm11 = vmor %vm2180_vm10, %vm2181_vm9 }
 0xa2a   : > { %v2177_v9 = vsub.f32 1.0, %v2176_v43  ;;  %v2220_v16 = vmul.f32 %v2173_v19, %v3325_v62 }
 0xa2b   : > { %2228 = vrot.lane.b32.xlu2 %v3325_v62, %s2685_s22 }
 0xa2c   : > { %v2178_v45 = vmul.f32 %v2651_v18, %v2177_v9 }
 0xa2e   : > { %v2179_v5 = vadd.f32 %v2651_v18, %v2178_v45 }
 0xa30   : > { %v2183_v37 = vsel %vm2182_vm11, %v2651_v18, %v2179_v5 }
 0xa31   : > { %v2188_v61 = vsel %vm2185_vm0, %v2187_v58, %v2183_v37 }
 0xa32   : > { %v2221_v62 = vmul.f32 %v2188_v61, %v3332_v2 }
 0xa7e   : > { %v2036_v8 = vpop.xlane.xlu1 %2035 }
 0xa7f   : > { %v2042_v23 = vmul.f32 %v2036_v8, %v2825_v26 }
 0xa81   : > { %v2046_v35 = vadd.f32 1e-06, %v2042_v23 }
 0xa83   : > { %2652 = vrsqrt.f32 %v2046_v35  ;;  %vm2074_vm14 = vweird.f32 %v2046_v35 }
 0xa86   : > { %v2039_v44 = vpop.xlane.xlu2 %2038 }
 0xa87   : > { %v2043_v39 = vmul.f32 %v2039_v44, %v2825_v26 }
 0xa88   : > { %v2231_v56 = vpop.permute.xlu0 %2230 }
 0xa89   : > { %v2653_v48 = vpop.eup %2652  ;;  %v2047_v22 = vadd.f32 1e-06, %v2043_v39  ;;  %v2241_v47 = vmul.f32 %v2231_v56, %v2221_v62 }
 0xa8a   : > { %v2069_v46 = vmul.f32 %v2653_v48, %v2046_v35  ;;  %vm2075_vm13 = vweird.f32 %v2653_v48 }
 0xa8b   : > { %2654 = vrsqrt.f32 %v2047_v22  ;;  %vm2076_vm2 = vmor %vm2074_vm14, %vm2075_vm13  ;;  %vm2084_vm4 = vweird.f32 %v2047_v22 }
 0xa8c   : > { %v2070_v51 = vmul.f32 %v2653_v48, %v2069_v46 }
 0xa8e   : > { %v2071_v36 = vmul.f32 0.5, %v2070_v51  ;;  %v2229_v26 = vpop.permute.xlu2 %2228 }
 0xa8f   : > { %v2240_v52 = vmul.f32 %v2229_v26, %v2220_v16 }
 0xa90   : > { %v2072_v54 = vsub.f32 1.5, %v2071_v36 }
 0xa91   : > { %v2655_v59 = vpop.eup %2654  ;;  %2487 = vmatmul.msk.f32.vlgmr.msrb.gmra.mxu3 %vm2252_vm12, %v2240_v52 }
 0xa92   : > { %v2073_v50 = vmul.f32 %v2653_v48, %v2072_v54  ;;  %v2079_v57 = vmul.f32 %v2655_v59, %v2047_v22  ;;  %vm2085_vm3 = vweird.f32 %v2655_v59 }
 0xa93   : > { %vm2086_vm5 = vmor %vm2084_vm4, %vm2085_vm3 }
 0xa94   : > { %v2080_v25 = vmul.f32 %v2655_v59, %v2079_v57  ;;  %v2077_v27 = vsel %vm2076_vm2, %v2653_v48, %v2073_v50 }
 0xa95   : > { %v2090_v20 = vmul.f32 %v2077_v27, %v3319_v15 }
 0xa96   : > { %v2081_v40 = vmul.f32 0.5, %v2080_v25 }
 0xa97   : > { %v2097_v53 = vmul.f32 %v3308_v13, %v2090_v20 }
 0xa98   : > { %v2082_v32 = vsub.f32 1.5, %v2081_v40 }
 0xa99   : > { %2481 = vmatmul.msk.f32.gmra.mxu2 %vm494_vm1, %v2097_v53  ;;  %2488 = vmatmul.msk.f32.gmra.mxu3 %vm2252_vm12, %v2241_v47 }
 0xa9a   : > { %v2083_v4 = vmul.f32 %v2655_v59, %v2082_v32 }
 0xa9c   : > { %v2087_v38 = vsel %vm2086_vm5, %v2655_v59, %v2083_v4 }
 0xa9d   : > { %v2091_v3 = vmul.f32 %v2087_v38, %v3327_v63 }
 0xa9f   : > { %v2098_v2 = vmul.f32 %v3308_v13, %v2091_v3 }
 0xaa1   : > { %2482 = vmatmul.msk.f32.gmra.mxu2 %vm494_vm1, %v2098_v2 }
 0xb14   : > { %v2282_v34 = vpop.f32.mrf.mxu3 }
 0xb15   : > { %v2294_v60 = vadd.f32 %v2282_v34, %v3258_v41 }
 0xb17   : > { %2298 = vst.msk [vmem:[#allocation2] sm:$0xff] %vm494_vm1, %v2294_v60 }
 0xb18   : > { %2302 = vst.msk [vmem:[%s3402_s11] sm:$0xff] %vm494_vm1, %v2294_v60 }
 0xb1c   : > { %v2138_v7 = vpop.f32.mrf.mxu2  ;;  %v2285_v10 = vpop.f32.mrf.mxu3 }
 0xb1d   : > { %v2295_v11 = vadd.f32 %v2285_v10, %v3268_v49  ;;  %2232 = vrot.lane.b32.xlu1 %v2138_v7, %s2685_s22  ;;  %v2485_v13 = vmul.f32 -1.442695, %v2138_v7 }
 0xb1f   : > { %2299 = vst.msk [vmem:[#allocation2 + $0x8] sm:$0xff] %vm494_vm1, %v2295_v11  ;;  %2656 = vpow2.f32 %v2485_v13 }
 0xb20   : > { %2303 = vst.msk [vmem:[%s3402_s11 + $0x8] sm:$0xff] %vm494_vm1, %v2295_v11 }
 0xb24   : > { %v2141_v41 = vpop.f32.mrf.mxu2 }
 0xb25   : > { %2234 = vrot.lane.b32.xlu0 %v2141_v41, %s2685_s22  ;;  %v2486_v12 = vmul.f32 -1.442695, %v2141_v41  ;;  %v2657_v14 = vpop.eup %2656 }
 0xb26   : > { %v2158_v0 = vadd.f32 1.0, %v2657_v14 }
 0xb27   : > { %2658 = vpow2.f32 %v2486_v12 }
 0xb28   : > { %2660 = vrcp.f32 %v2158_v0  ;;  %v2201_v35 = vand.u32 2147483648, %v2158_v0  ;;  %vm2195_vm6 = vweird.f32 %v2158_v0  ;;  %v2199_v9 = vand.u32 2147483647, %v2158_v0 }
 0xb2a   : > { %v2202_v30 = vor.u32 1.1754944e-38, %v2201_v35  ;;  %vm2200_vm8 = vcmp.eq.f32.partialorder %v2199_v9, 8.507059e+37 }
 0xb2d   : > { %v2659_v49 = vpop.eup %2658 }
 0xb2e   : > { %v2159_v24 = vadd.f32 1.0, %v2659_v49  ;;  %v2661_v1 = vpop.eup %2660 }
 0xb2f   : > { %v2191_v28 = vmul.f32 %v2661_v1, %v2158_v0  ;;  %vm2196_vm15 = vweird.f32 %v2661_v1 }
 0xb30   : > { %2662 = vrcp.f32 %v2159_v24  ;;  %vm2197_vm7 = vmor %vm2195_vm6, %vm2196_vm15  ;;  %v2216_v45 = vand.u32 2147483648, %v2159_v24  ;;  %vm2210_vm10 = vweird.f32 %v2159_v24  ;;  %v2214_v42 = vand.u32 2147483647, %v2159_v24 }
 0xb31   : > { %v2192_v55 = vsub.f32 1.0, %v2191_v28 }
 0xb32   : > { %v2217_v19 = vor.u32 1.1754944e-38, %v2216_v45  ;;  %vm2215_vm13 = vcmp.eq.f32.partialorder %v2214_v42, 8.507059e+37 }
 0xb33   : > { %v2193_v23 = vmul.f32 %v2661_v1, %v2192_v55 }
 0xb35   : > { %v2194_v33 = vadd.f32 %v2661_v1, %v2193_v23 }
 0xb36   : > { %v2663_v18 = vpop.eup %2662 }
 0xb37   : > { %v2206_v8 = vmul.f32 %v2663_v18, %v2159_v24  ;;  %v2198_v6 = vsel %vm2197_vm7, %v2661_v1, %v2194_v33  ;;  %vm2211_vm9 = vweird.f32 %v2663_v18 }
 0xb38   : > { %v2203_v44 = vsel %vm2200_vm8, %v2202_v30, %v2198_v6  ;;  %vm2212_vm11 = vmor %vm2210_vm10, %vm2211_vm9 }
 0xb39   : > { %v2207_v43 = vsub.f32 1.0, %v2206_v8  ;;  %v2222_v17 = vmul.f32 %v2203_v44, %v2138_v7 }
 0xb3b   : > { %v2208_v21 = vmul.f32 %v2663_v18, %v2207_v43 }
 0xb3d   : > { %v2209_v39 = vadd.f32 %v2663_v18, %v2208_v21 }
 0xb3f   : > { %v2213_v22 = vsel %vm2212_vm11, %v2663_v18, %v2209_v39 }
 0xb40   : > { %v2218_v5 = vsel %vm2215_vm13, %v2217_v19, %v2213_v22 }
 0xb41   : > { %v2223_v51 = vmul.f32 %v2218_v5, %v2141_v41 }
 0xb8f   : > { %v2233_v48 = vpop.permute.xlu1 %2232 }
 0xb90   : > { %v2242_v46 = vmul.f32 %v2233_v48, %v2222_v17 }
 0xb92   : > { %2489 = vmatmul.msk.f32.gmra.mxu3 %vm2252_vm12, %v2242_v46 }
 0xb97   : > { %v2235_v29 = vpop.permute.xlu0 %2234 }
 0xb98   : > { %v2243_v31 = vmul.f32 %v2235_v29, %v2223_v51 }
 0xb9a   : > { %2490 = vmatmul.msk.f32.gmra.mxu3 %vm2252_vm12, %v2243_v31 }
 0xc15   : > { %v2288_v16 = vpop.f32.mrf.mxu3 }
 0xc16   : > { %v2296_v36 = vadd.f32 %v2288_v16, %v3319_v15 }
 0xc18   : > { %2300 = vst.msk [vmem:[#allocation2 + $0x10] sm:$0xff] %vm494_vm1, %v2296_v36 }
 0xc19   : > { %2304 = vst.msk [vmem:[%s3402_s11 + $0x10] sm:$0xff] %vm494_vm1, %v2296_v36 }
 0xc1d   : > { %v2291_v26 = vpop.f32.mrf.mxu3 }
 0xc1e   : > { %v2297_v37 = vadd.f32 %v2291_v26, %v3327_v63 }
 0xc20   : > { %2301 = vst.msk [vmem:[#allocation2 + $0x18] sm:$0xff] %vm494_vm1, %v2297_v37 }
 0xc21   : > { %2305 = vst.msk [vmem:[%s3402_s11 + $0x18] sm:$0xff] %vm494_vm1, %v2297_v37 }
 0xc22 PF: > { %s21_s17 = sadd.s32 1, %s2674_s17  }
 0xc23   : > { %p18_p5 = scmp.ge.s32.totalorder %s21_s17, 4  }
 0xc25   :  { %20 = sbr.rel (!%p18_p5) target bundleno = 1 (0x1), region = 110 }

</bundles_post_ra>
